<compile_context>
chip_gen: v6e
topology: v6e:2x2x1
jax: 0.10.0
libtpu: 0.0.40
codegen_flags: <defaults>
</compile_context>

<pallas_src>
import functools

import jax
import jax.numpy as jnp
from jax.experimental import pallas as pl
from jax.experimental.pallas import tpu as pltpu


def _round_up(n: int, m: int) -> int:
    return ((n + m - 1) // m) * m


def _choose_tile(padded_b: int, cap: int = 512) -> int:
    """Largest multiple-of-8 divisor of padded_b that is <= cap; prefer tiles
    that leave a grid of >= 2 steps so v7x's two TensorCores both get work."""
    divisors = [t for t in range(8, min(padded_b, cap) + 1, 8)
                if padded_b % t == 0]
    if not divisors:
        return padded_b
    multi = [t for t in divisors if padded_b // t >= 2]
    return max(multi) if multi else max(divisors)


def _vae_kernel(
    x_ref, eps_ref,
    w_e1_ref, b_e1_ref,
    w_e2_ref, b_e2_ref,
    w_ml_ref, b_ml_ref,      # fused [mu | log_var] head: (64, 2Z), (1, 2Z)
    w_d1_ref, b_d1_ref,
    w_d2_ref, b_d2_ref,
    w_d3_ref, b_d3_ref,
    recon_ref, lat_ref,      # lat: (TB, 4*Z) packed [mu | log_var | z | pad]
    *, z_dim: int,
):
    f32 = jnp.float32
    bf16 = jnp.bfloat16

    x = x_ref[...]                                               # (TB, D) bf16

    # ---- encoder: bf16 operands, f32 MXU accumulation, f32 elementwise ----
    h = jnp.dot(x, w_e1_ref[...],
                preferred_element_type=f32) + b_e1_ref[...]      # (TB, 512)
    h = jnp.maximum(h, 0.0)
    h = jnp.dot(h.astype(bf16), w_e2_ref[...],
                preferred_element_type=f32) + b_e2_ref[...]      # (TB, 64)
    h = jnp.maximum(h, 0.0)

    # Fused mu/log_var head: single lane-dense N=2Z matmul, free static split.
    ml = jnp.dot(h.astype(bf16), w_ml_ref[...],
                 preferred_element_type=f32) + b_ml_ref[...]     # (TB, 2Z)
    mu = ml[:, :z_dim]
    log_var = ml[:, z_dim:]

    # ---- reparameterization: z = mu + eps * exp(log_var / 2) ----
    std = jnp.exp(log_var * 0.5)
    z = mu + eps_ref[...] * std                                  # (TB, Z)

    # ---- decoder ----
    d = jnp.dot(z.astype(bf16), w_d1_ref[...],
                preferred_element_type=f32) + b_d1_ref[...]      # (TB, 64)
    d = jnp.maximum(d, 0.0)
    d = jnp.dot(d.astype(bf16), w_d2_ref[...],
                preferred_element_type=f32) + b_d2_ref[...]      # (TB, 512)
    d = jnp.maximum(d, 0.0)
    logits = jnp.dot(d.astype(bf16), w_d3_ref[...],
                     preferred_element_type=f32) + b_d3_ref[...]  # (TB, D)
    # Sigmoid stays in [0,1]; emit bf16 to halve the recon HBM stream.
    recon_ref[...] = jax.nn.sigmoid(logits).astype(recon_ref.dtype)

    # Lane-dense packed latent slab: reuse the MXU-produced ml block directly.
    # Layout: [mu | log_var | z | zero-pad] -> (TB, 4Z).
    lat_ref[...] = jnp.concatenate([ml, z, jnp.zeros_like(z)], axis=-1)


@functools.partial(jax.jit, static_argnames=("input_dim",))
def simple_vae_forward(x_nchw, eps, params, *, input_dim):
    """x_nchw: (B, C, H, W) float32. Returns (recon_nchw, z, mu, log_var)."""
    C, H, W = input_dim
    B = x_nchw.shape[0]
    D = C * H * W
    # x streamed to the kernel in bf16 (it is bf16-cast before the first
    # matmul anyway) -> halves the largest HBM input stream.
    x_flat = x_nchw.reshape(B, D).astype(jnp.bfloat16)

    (w_e1, b_e1, w_e2, b_e2, w_mu, b_mu, w_lv, b_lv,
     w_d1, b_d1, w_d2, b_d2, w_d3, b_d3) = params
    Z = w_mu.shape[1]

    # Fuse the two z_dim heads into one lane-dense (64, 2Z) weight/bias.
    w_ml = jnp.concatenate([w_mu, w_lv], axis=1)
    b_ml = jnp.concatenate([b_mu, b_lv], axis=1)

    # Batch tiling: pad only to the sublane multiple (8), then pick a tile
    # that divides padded_b exactly (no second full-array pad copy of x),
    # capped at 512 rows and preferring a grid of >= 2 steps.
    padded_b = _round_up(B, 8)
    tile_b = _choose_tile(padded_b)
    eps_p = eps.astype(jnp.float32)
    if padded_b != B:
        pad = padded_b - B
        x_flat = jnp.pad(x_flat, ((0, pad), (0, 0)))
        eps_p = jnp.pad(eps_p, ((0, pad), (0, 0)))

    def batch_spec(cols):
        return pl.BlockSpec((tile_b, cols), lambda i: (i, 0))

    def resident(arr):
        # Constant block index -> weight stays in VMEM across all grid steps.
        return pl.BlockSpec(arr.shape, lambda i: (0, 0))

    in_specs = [
        batch_spec(D),                     # x (bf16)
        batch_spec(Z),                     # eps (f32)
        resident(w_e1), resident(b_e1),
        resident(w_e2), resident(b_e2),
        resident(w_ml), resident(b_ml),
        resident(w_d1), resident(b_d1),
        resident(w_d2), resident(b_d2),
        resident(w_d3), resident(b_d3),
    ]
    out_specs = (batch_spec(D), batch_spec(4 * Z))
    out_shapes = (
        jax.ShapeDtypeStruct((padded_b, D), jnp.bfloat16),      # recon (flat)
        jax.ShapeDtypeStruct((padded_b, 4 * Z), jnp.float32),   # packed latent
    )

    recon_flat, lat = pl.pallas_call(
        functools.partial(_vae_kernel, z_dim=Z),
        out_shape=out_shapes,
        grid=(padded_b // tile_b,),
        in_specs=in_specs,
        out_specs=out_specs,
        compiler_params=pltpu.CompilerParams(
            dimension_semantics=("parallel",),   # shards batch over v7x's 2 TCs
            vmem_limit_bytes=48 * 1024 * 1024,   # headroom on v5e/v6e/v7x
        ),
    )(x_flat, eps_p,
      w_e1, b_e1, w_e2, b_e2, w_ml, b_ml,
      w_d1, b_d1, w_d2, b_d2, w_d3, b_d3)

    recon = recon_flat[:B].astype(jnp.float32).reshape(B, C, H, W)
    mu = lat[:B, 0:Z]
    log_var = lat[:B, Z:2 * Z]
    z = lat[:B, 2 * Z:3 * Z]
    return recon, z, mu, log_var


def init_params(key, input_dim, z_dim=64):
    """Kaiming-uniform-ish init like nn.Linear; weights stored in bf16."""
    C, H, W = input_dim
    D = C * H * W
    dims = [
        (D, 512),      # encoder_linear1
        (512, 64),     # encoder_linear2
        (64, z_dim),   # mu
        (64, z_dim),   # log_var
        (z_dim, 64),   # decoder_linear1
        (64, 512),     # decoder_linear2
        (512, D),      # decoder_linear3
    ]
    params = []
    for (fan_in, fan_out) in dims:
        key, kw, kb = jax.random.split(key, 3)
        bound = 1.0 / jnp.sqrt(fan_in)
        # Weights stored as (in, out) so the kernel does x @ W directly
        # (equivalent to PyTorch's x @ W.T with W of shape (out, in)).
        # Stored in bf16: the small-batch regime is HBM-bound on weight DMA.
        w = jax.random.uniform(kw, (fan_in, fan_out), jnp.float32,
                               minval=-bound, maxval=bound).astype(jnp.bfloat16)
        b = jax.random.uniform(kb, (1, fan_out), jnp.float32,
                               minval=-bound, maxval=bound)
        params += [w, b]
    return tuple(params)


if __name__ == "__main__":
    # Small shapes consistent with the module: input_dim=(4, 16, 16) -> D=1024.
    input_dim = (4, 16, 16)
    z_dim = 64
    B = 2

    key = jax.random.PRNGKey(0)
    k_x, k_eps, k_p = jax.random.split(key, 3)

    x = jax.random.uniform(k_x, (B,) + input_dim, jnp.float32)
    # epsilon ~ N(0, 1), drawn deterministically (torch.randn equivalent).
    eps = jax.random.normal(k_eps, (B, z_dim), jnp.float32)
    params = init_params(k_p, input_dim, z_dim)

    recon, z, mu, log_var = simple_vae_forward(x, eps, params,
                                               input_dim=input_dim)
    jax.block_until_ready((recon, z, mu, log_var))

    assert recon.shape == (B,) + input_dim
    assert z.shape == (B, z_dim)
    assert mu.shape == (B, z_dim)
    assert log_var.shape == (B, z_dim)
    assert bool(jnp.all(jnp.isfinite(recon)))
    assert bool(jnp.all((recon >= 0.0) & (recon <= 1.0)))
    # Reparameterization consistency check against the packed-slab outputs.
    assert bool(jnp.allclose(z, mu + eps * jnp.exp(0.5 * log_var),
                             rtol=1e-3, atol=1e-3))
    print("KERNEL_OK")
</pallas_src>

<mosaic_0001>
module attributes {stable_mosaic.version = 11 : i64} {
  func.func @_vae_kernel(%arg0: i32, %arg1: memref<8x1024xbf16, #tpu.memory_space<vmem>>, %arg2: memref<8x64xf32, #tpu.memory_space<vmem>>, %arg3: memref<1024x512xbf16, #tpu.memory_space<vmem>>, %arg4: memref<1x512xf32, #tpu.memory_space<vmem>>, %arg5: memref<512x64xbf16, #tpu.memory_space<vmem>>, %arg6: memref<1x64xf32, #tpu.memory_space<vmem>>, %arg7: memref<64x128xbf16, #tpu.memory_space<vmem>>, %arg8: memref<1x128xf32, #tpu.memory_space<vmem>>, %arg9: memref<64x64xbf16, #tpu.memory_space<vmem>>, %arg10: memref<1x64xf32, #tpu.memory_space<vmem>>, %arg11: memref<64x512xbf16, #tpu.memory_space<vmem>>, %arg12: memref<1x512xf32, #tpu.memory_space<vmem>>, %arg13: memref<512x1024xbf16, #tpu.memory_space<vmem>>, %arg14: memref<1x1024xf32, #tpu.memory_space<vmem>>, %arg15: memref<8x1024xbf16, #tpu.memory_space<vmem>>, %arg16: memref<8x256xf32, #tpu.memory_space<vmem>>) attributes {dimension_semantics = [#tpu.dimension_semantics<parallel>], iteration_bounds = array<i64: 1>, scalar_prefetch = 0 : i64, scratch_operands = 0 : i64, tpu.core_type = #tpu.core_type<tc>, window_params = [{transform_indices = @transform_0, window_bounds = array<i64: 8, 1024>}, {transform_indices = @transform_1, window_bounds = array<i64: 8, 64>}, {pipeline_mode = #tpu.pipeline_mode<synchronous>, transform_indices = @transform_2, window_bounds = array<i64: 1024, 512>}, {pipeline_mode = #tpu.pipeline_mode<synchronous>, transform_indices = @transform_3, window_bounds = array<i64: 1, 512>}, {pipeline_mode = #tpu.pipeline_mode<synchronous>, transform_indices = @transform_4, window_bounds = array<i64: 512, 64>}, {pipeline_mode = #tpu.pipeline_mode<synchronous>, transform_indices = @transform_5, window_bounds = array<i64: 1, 64>}, {pipeline_mode = #tpu.pipeline_mode<synchronous>, transform_indices = @transform_6, window_bounds = array<i64: 64, 128>}, {pipeline_mode = #tpu.pipeline_mode<synchronous>, transform_indices = @transform_7, window_bounds = array<i64: 1, 128>}, {pipeline_mode = #tpu.pipeline_mode<synchronous>, transform_indices = @transform_8, window_bounds = array<i64: 64, 64>}, {pipeline_mode = #tpu.pipeline_mode<synchronous>, transform_indices = @transform_9, window_bounds = array<i64: 1, 64>}, {pipeline_mode = #tpu.pipeline_mode<synchronous>, transform_indices = @transform_10, window_bounds = array<i64: 64, 512>}, {pipeline_mode = #tpu.pipeline_mode<synchronous>, transform_indices = @transform_11, window_bounds = array<i64: 1, 512>}, {pipeline_mode = #tpu.pipeline_mode<synchronous>, transform_indices = @transform_12, window_bounds = array<i64: 512, 1024>}, {pipeline_mode = #tpu.pipeline_mode<synchronous>, transform_indices = @transform_13, window_bounds = array<i64: 1, 1024>}, {transform_indices = @transform_14, window_bounds = array<i64: 8, 1024>}, {transform_indices = @transform_15, window_bounds = array<i64: 8, 256>}]} {
    %c0 = arith.constant 0 : index
    %c0_0 = arith.constant 0 : index
    %0 = vector.load %arg1[%c0, %c0_0] : memref<8x1024xbf16, #tpu.memory_space<vmem>>, vector<8x1024xbf16>
    %c0_1 = arith.constant 0 : index
    %c0_2 = arith.constant 0 : index
    %1 = vector.load %arg3[%c0_1, %c0_2] : memref<1024x512xbf16, #tpu.memory_space<vmem>>, vector<1024x512xbf16>
    %cst = arith.constant dense<0.000000e+00> : vector<8x512xf32>
    %2 = tpu.matmul %0, %1, %cst {dimension_numbers = #tpu.dot_dimension_numbers<[1], [0], [0], [1], [0, 0, 1, 1], [], []>} : vector<8x1024xbf16>, vector<1024x512xbf16>, vector<8x512xf32> -> vector<8x512xf32>
    %c0_3 = arith.constant 0 : index
    %c0_4 = arith.constant 0 : index
    %3 = vector.load %arg4[%c0_3, %c0_4] : memref<1x512xf32, #tpu.memory_space<vmem>>, vector<1x512xf32>
    %4 = vector.broadcast %3 : vector<1x512xf32> to vector<8x512xf32>
    %5 = arith.addf %2, %4 : vector<8x512xf32>
    %cst_5 = arith.constant 0.000000e+00 : f32
    %6 = vector.broadcast %cst_5 : f32 to vector<8x512xf32>
    %7 = arith.maximumf %5, %6 : vector<8x512xf32>
    %8 = arith.truncf %7 : vector<8x512xf32> to vector<8x512xbf16>
    %c0_6 = arith.constant 0 : index
    %c0_7 = arith.constant 0 : index
    %9 = vector.load %arg5[%c0_6, %c0_7] : memref<512x64xbf16, #tpu.memory_space<vmem>>, vector<512x64xbf16>
    %cst_8 = arith.constant dense<0.000000e+00> : vector<8x64xf32>
    %10 = tpu.matmul %8, %9, %cst_8 {dimension_numbers = #tpu.dot_dimension_numbers<[1], [0], [0], [1], [0, 0, 1, 1], [], []>} : vector<8x512xbf16>, vector<512x64xbf16>, vector<8x64xf32> -> vector<8x64xf32>
    %c0_9 = arith.constant 0 : index
    %c0_10 = arith.constant 0 : index
    %11 = vector.load %arg6[%c0_9, %c0_10] : memref<1x64xf32, #tpu.memory_space<vmem>>, vector<1x64xf32>
    %12 = vector.broadcast %11 : vector<1x64xf32> to vector<8x64xf32>
    %13 = arith.addf %10, %12 : vector<8x64xf32>
    %cst_11 = arith.constant 0.000000e+00 : f32
    %14 = vector.broadcast %cst_11 : f32 to vector<8x64xf32>
    %15 = arith.maximumf %13, %14 : vector<8x64xf32>
    %16 = arith.truncf %15 : vector<8x64xf32> to vector<8x64xbf16>
    %c0_12 = arith.constant 0 : index
    %c0_13 = arith.constant 0 : index
    %17 = vector.load %arg7[%c0_12, %c0_13] : memref<64x128xbf16, #tpu.memory_space<vmem>>, vector<64x128xbf16>
    %cst_14 = arith.constant dense<0.000000e+00> : vector<8x128xf32>
    %18 = tpu.matmul %16, %17, %cst_14 {dimension_numbers = #tpu.dot_dimension_numbers<[1], [0], [0], [1], [0, 0, 1, 1], [], []>} : vector<8x64xbf16>, vector<64x128xbf16>, vector<8x128xf32> -> vector<8x128xf32>
    %c0_15 = arith.constant 0 : index
    %c0_16 = arith.constant 0 : index
    %19 = vector.load %arg8[%c0_15, %c0_16] : memref<1x128xf32, #tpu.memory_space<vmem>>, vector<1x128xf32>
    %20 = vector.broadcast %19 : vector<1x128xf32> to vector<8x128xf32>
    %21 = arith.addf %18, %20 : vector<8x128xf32>
    %22 = vector.extract_strided_slice %21 {offsets = [0, 0], sizes = [8, 64], strides = [1, 1]} : vector<8x128xf32> to vector<8x64xf32>
    %23 = vector.extract_strided_slice %21 {offsets = [0, 64], sizes = [8, 64], strides = [1, 1]} : vector<8x128xf32> to vector<8x64xf32>
    %cst_17 = arith.constant 5.000000e-01 : f32
    %24 = vector.broadcast %cst_17 : f32 to vector<8x64xf32>
    %25 = arith.mulf %23, %24 : vector<8x64xf32>
    %26 = math.exp %25 : vector<8x64xf32>
    %c0_18 = arith.constant 0 : index
    %c0_19 = arith.constant 0 : index
    %27 = vector.load %arg2[%c0_18, %c0_19] : memref<8x64xf32, #tpu.memory_space<vmem>>, vector<8x64xf32>
    %28 = arith.mulf %27, %26 : vector<8x64xf32>
    %29 = arith.addf %22, %28 : vector<8x64xf32>
    %30 = arith.truncf %29 : vector<8x64xf32> to vector<8x64xbf16>
    %c0_20 = arith.constant 0 : index
    %c0_21 = arith.constant 0 : index
    %31 = vector.load %arg9[%c0_20, %c0_21] : memref<64x64xbf16, #tpu.memory_space<vmem>>, vector<64x64xbf16>
    %cst_22 = arith.constant dense<0.000000e+00> : vector<8x64xf32>
    %32 = tpu.matmul %30, %31, %cst_22 {dimension_numbers = #tpu.dot_dimension_numbers<[1], [0], [0], [1], [0, 0, 1, 1], [], []>} : vector<8x64xbf16>, vector<64x64xbf16>, vector<8x64xf32> -> vector<8x64xf32>
    %c0_23 = arith.constant 0 : index
    %c0_24 = arith.constant 0 : index
    %33 = vector.load %arg10[%c0_23, %c0_24] : memref<1x64xf32, #tpu.memory_space<vmem>>, vector<1x64xf32>
    %34 = vector.broadcast %33 : vector<1x64xf32> to vector<8x64xf32>
    %35 = arith.addf %32, %34 : vector<8x64xf32>
    %cst_25 = arith.constant 0.000000e+00 : f32
    %36 = vector.broadcast %cst_25 : f32 to vector<8x64xf32>
    %37 = arith.maximumf %35, %36 : vector<8x64xf32>
    %38 = arith.truncf %37 : vector<8x64xf32> to vector<8x64xbf16>
    %c0_26 = arith.constant 0 : index
    %c0_27 = arith.constant 0 : index
    %39 = vector.load %arg11[%c0_26, %c0_27] : memref<64x512xbf16, #tpu.memory_space<vmem>>, vector<64x512xbf16>
    %cst_28 = arith.constant dense<0.000000e+00> : vector<8x512xf32>
    %40 = tpu.matmul %38, %39, %cst_28 {dimension_numbers = #tpu.dot_dimension_numbers<[1], [0], [0], [1], [0, 0, 1, 1], [], []>} : vector<8x64xbf16>, vector<64x512xbf16>, vector<8x512xf32> -> vector<8x512xf32>
    %c0_29 = arith.constant 0 : index
    %c0_30 = arith.constant 0 : index
    %41 = vector.load %arg12[%c0_29, %c0_30] : memref<1x512xf32, #tpu.memory_space<vmem>>, vector<1x512xf32>
    %42 = vector.broadcast %41 : vector<1x512xf32> to vector<8x512xf32>
    %43 = arith.addf %40, %42 : vector<8x512xf32>
    %cst_31 = arith.constant 0.000000e+00 : f32
    %44 = vector.broadcast %cst_31 : f32 to vector<8x512xf32>
    %45 = arith.maximumf %43, %44 : vector<8x512xf32>
    %46 = arith.truncf %45 : vector<8x512xf32> to vector<8x512xbf16>
    %c0_32 = arith.constant 0 : index
    %c0_33 = arith.constant 0 : index
    %47 = vector.load %arg13[%c0_32, %c0_33] : memref<512x1024xbf16, #tpu.memory_space<vmem>>, vector<512x1024xbf16>
    %cst_34 = arith.constant dense<0.000000e+00> : vector<8x1024xf32>
    %48 = tpu.matmul %46, %47, %cst_34 {dimension_numbers = #tpu.dot_dimension_numbers<[1], [0], [0], [1], [0, 0, 1, 1], [], []>} : vector<8x512xbf16>, vector<512x1024xbf16>, vector<8x1024xf32> -> vector<8x1024xf32>
    %c0_35 = arith.constant 0 : index
    %c0_36 = arith.constant 0 : index
    %49 = vector.load %arg14[%c0_35, %c0_36] : memref<1x1024xf32, #tpu.memory_space<vmem>>, vector<1x1024xf32>
    %50 = vector.broadcast %49 : vector<1x1024xf32> to vector<8x1024xf32>
    %51 = arith.addf %48, %50 : vector<8x1024xf32>
    %52 = arith.negf %51 : vector<8x1024xf32>
    %53 = math.exp %52 : vector<8x1024xf32>
    %cst_37 = arith.constant 1.000000e+00 : f32
    %54 = vector.broadcast %cst_37 : f32 to vector<8x1024xf32>
    %55 = arith.addf %54, %53 : vector<8x1024xf32>
    %56 = arith.divf %54, %55 : vector<8x1024xf32>
    %57 = arith.truncf %56 : vector<8x1024xf32> to vector<8x1024xbf16>
    %c0_38 = arith.constant 0 : index
    %c0_39 = arith.constant 0 : index
    %58 = vector.load %arg15[%c0_38, %c0_39] : memref<8x1024xbf16, #tpu.memory_space<vmem>>, vector<8x1024xbf16>
    tpu.vector_store %arg15[%c0_38, %c0_39], %57 {strides = array<i32>} : memref<8x1024xbf16, #tpu.memory_space<vmem>>, vector<8x1024xbf16>,
    %cst_40 = arith.constant 0.000000e+00 : f32
    %59 = vector.broadcast %cst_40 : f32 to vector<8x64xf32>
    %60 = tpu.concatenate %21, %29, %59 in 1 : vector<8x128xf32>, vector<8x64xf32>, vector<8x64xf32> -> vector<8x256xf32>
    %c0_41 = arith.constant 0 : index
    %c0_42 = arith.constant 0 : index
    %61 = vector.load %arg16[%c0_41, %c0_42] : memref<8x256xf32, #tpu.memory_space<vmem>>, vector<8x256xf32>
    tpu.vector_store %arg16[%c0_41, %c0_42], %60 {strides = array<i32>} : memref<8x256xf32, #tpu.memory_space<vmem>>, vector<8x256xf32>,
    return
  }
  func.func @transform_0(%arg0: i32) -> (i32, i32) {
    %c0_i32 = arith.constant 0 : i32
    %c0_i32_0 = arith.constant 0 : i32
    return %arg0, %c0_i32 : i32, i32
  }
  func.func @transform_1(%arg0: i32) -> (i32, i32) {
    %c0_i32 = arith.constant 0 : i32
    %c0_i32_0 = arith.constant 0 : i32
    return %arg0, %c0_i32 : i32, i32
  }
  func.func @transform_2(%arg0: i32) -> (i32, i32) {
    %c0_i32 = arith.constant 0 : i32
    %c0_i32_0 = arith.constant 0 : i32
    %c0_i32_1 = arith.constant 0 : i32
    return %c0_i32, %c0_i32_0 : i32, i32
  }
  func.func @transform_3(%arg0: i32) -> (i32, i32) {
    %c0_i32 = arith.constant 0 : i32
    %c0_i32_0 = arith.constant 0 : i32
    %c0_i32_1 = arith.constant 0 : i32
    return %c0_i32, %c0_i32_0 : i32, i32
  }
  func.func @transform_4(%arg0: i32) -> (i32, i32) {
    %c0_i32 = arith.constant 0 : i32
    %c0_i32_0 = arith.constant 0 : i32
    %c0_i32_1 = arith.constant 0 : i32
    return %c0_i32, %c0_i32_0 : i32, i32
  }
  func.func @transform_5(%arg0: i32) -> (i32, i32) {
    %c0_i32 = arith.constant 0 : i32
    %c0_i32_0 = arith.constant 0 : i32
    %c0_i32_1 = arith.constant 0 : i32
    return %c0_i32, %c0_i32_0 : i32, i32
  }
  func.func @transform_6(%arg0: i32) -> (i32, i32) {
    %c0_i32 = arith.constant 0 : i32
    %c0_i32_0 = arith.constant 0 : i32
    %c0_i32_1 = arith.constant 0 : i32
    return %c0_i32, %c0_i32_0 : i32, i32
  }
  func.func @transform_7(%arg0: i32) -> (i32, i32) {
    %c0_i32 = arith.constant 0 : i32
    %c0_i32_0 = arith.constant 0 : i32
    %c0_i32_1 = arith.constant 0 : i32
    return %c0_i32, %c0_i32_0 : i32, i32
  }
  func.func @transform_8(%arg0: i32) -> (i32, i32) {
    %c0_i32 = arith.constant 0 : i32
    %c0_i32_0 = arith.constant 0 : i32
    %c0_i32_1 = arith.constant 0 : i32
    return %c0_i32, %c0_i32_0 : i32, i32
  }
  func.func @transform_9(%arg0: i32) -> (i32, i32) {
    %c0_i32 = arith.constant 0 : i32
    %c0_i32_0 = arith.constant 0 : i32
    %c0_i32_1 = arith.constant 0 : i32
    return %c0_i32, %c0_i32_0 : i32, i32
  }
  func.func @transform_10(%arg0: i32) -> (i32, i32) {
    %c0_i32 = arith.constant 0 : i32
    %c0_i32_0 = arith.constant 0 : i32
    %c0_i32_1 = arith.constant 0 : i32
    return %c0_i32, %c0_i32_0 : i32, i32
  }
  func.func @transform_11(%arg0: i32) -> (i32, i32) {
    %c0_i32 = arith.constant 0 : i32
    %c0_i32_0 = arith.constant 0 : i32
    %c0_i32_1 = arith.constant 0 : i32
    return %c0_i32, %c0_i32_0 : i32, i32
  }
  func.func @transform_12(%arg0: i32) -> (i32, i32) {
    %c0_i32 = arith.constant 0 : i32
    %c0_i32_0 = arith.constant 0 : i32
    %c0_i32_1 = arith.constant 0 : i32
    return %c0_i32, %c0_i32_0 : i32, i32
  }
  func.func @transform_13(%arg0: i32) -> (i32, i32) {
    %c0_i32 = arith.constant 0 : i32
    %c0_i32_0 = arith.constant 0 : i32
    %c0_i32_1 = arith.constant 0 : i32
    return %c0_i32, %c0_i32_0 : i32, i32
  }
  func.func @transform_14(%arg0: i32) -> (i32, i32) {
    %c0_i32 = arith.constant 0 : i32
    %c0_i32_0 = arith.constant 0 : i32
    return %arg0, %c0_i32 : i32, i32
  }
  func.func @transform_15(%arg0: i32) -> (i32, i32) {
    %c0_i32 = arith.constant 0 : i32
    %c0_i32_0 = arith.constant 0 : i32
    return %arg0, %c0_i32 : i32, i32
  }
}

</mosaic_0001>

<bundles_post_ra>
// kernel: simple_vae_forward.1
= control target key start
LH: loop header
LB: loop body
LE: loop exit
PB: predicated region body
PF: predicated region fallthrough
CT: control target
= control target key end

     0   :  { %21 = vsyncpa [#allocation3], 0  ;;  %s6409_s0 = inlined_call_operand.vmem [shape: bf16[8,1024], index: 0, kind: input, shape index: {}]   ;;  %s6410_s1 = inlined_call_operand.vmem [shape: f32[8,64], index: 1, kind: input, shape index: {}]   ;;  %s6411_s2 = inlined_call_operand.hbm [shape: bf16[1024,512], index: 2, kind: input, shape index: {}]   ;;  %s6412_s3 = inlined_call_operand.vmem [shape: f32[1,512], index: 3, kind: input, shape index: {}]   ;;  %s6413_s4 = inlined_call_operand.vmem [shape: bf16[512,64], index: 4, kind: input, shape index: {}]   ;;  %s6414_s5 = inlined_call_operand.vmem [shape: f32[1,64], index: 5, kind: input, shape index: {}]   ;;  %s6415_s6 = inlined_call_operand.vmem [shape: bf16[64,128], index: 6, kind: input, shape index: {}]   ;;  %s6416_s7 = inlined_call_operand.vmem [shape: f32[1,128], index: 7, kind: input, shape index: {}]   ;;  %s6417_s8 = inlined_call_operand.vmem [shape: bf16[64,64], index: 8, kind: input, shape index: {}]   ;;  %s6418_s9 = inlined_call_operand.vmem [shape: f32[1,64], index: 9, kind: input, shape index: {}]   ;;  %s6419_s10 = inlined_call_operand.vmem [shape: bf16[64,512], index: 10, kind: input, shape index: {}]   ;;  %s6420_s11 = inlined_call_operand.vmem [shape: f32[1,512], index: 11, kind: input, shape index: {}]   ;;  %s6421_s12 = inlined_call_operand.hbm [shape: bf16[512,1024], index: 12, kind: input, shape index: {}]   ;;  %s6422_s13 = inlined_call_operand.vmem [shape: f32[1,1024], index: 13, kind: input, shape index: {}]   ;;  %s6423_s14 = inlined_call_operand.vmem [shape: bf16[8,1024], index: 14, kind: output, shape index: {0}]   ;;  %s6424_s15 = inlined_call_operand.vmem [shape: f32[8,256], index: 15, kind: output, shape index: {1}]  }
   0x1   :  { %22 = vsyncpa [#allocation5], 0  ;;  %s5962_s18 = smov [#allocation2]  }
   0x2   :  { %s32_s19 = sshll.u32 %s5962_s18, 4  ;;  %s33_s19 = int_to_ptr.vmem [resolvable:$true] %s32_s19 }
   0x3   :  { %s5926_s20 = scalar_lea.vmem %s33_s19, 32768  ;;  %p5931_p1 = scmp.lt.s32.totalorder %s33_s19, %s33_s19 }
   0x4   :  { %p5927_p0 = scmp.ne.s32.totalorder %s33_s19, %s5926_s20  ;;  %p5932_p2 = scmp.lt.s32.totalorder %s5926_s20, %s5926_s20 }
   0x6   :  { %p5933_p3 = por %p5932_p2, %p5931_p1 }
   0x8   :  { %p5934_p4 = pnand %p5933_p3, %p5927_p0 }
   0xa   :  { %5937 = shalt.err (!%p5934_p4)
}
   0xb   :  { %s5963_s21 = smov 256   ;;  %s5964_s22 = smov 16  }
   0xc   :  { %38 = dma.hbm_to_vmem [thread:$0]  %s6411_s2, 32768, %s33_s19, [#allocation3], %s5963_s21, %s5963_s21, %s5964_s22  }
   0xd   :  { %s5965_s25 = smov [#allocation4]  }
   0xe   :  { %s62_s26 = sshll.u32 %s5965_s25, 4  ;;  %s63_s26 = int_to_ptr.vmem [resolvable:$true] %s62_s26 }
   0xf   :  { %s5946_s27 = scalar_lea.vmem %s63_s26, 32768  ;;  %p5951_p6 = scmp.lt.s32.totalorder %s63_s26, %s63_s26 }
  0x10   :  { %p5947_p5 = scmp.ne.s32.totalorder %s63_s26, %s5946_s27  ;;  %p5952_p7 = scmp.lt.s32.totalorder %s5946_s27, %s5946_s27 }
  0x12   :  { %p5953_p8 = por %p5952_p7, %p5951_p6 }
  0x14   :  { %p5954_p9 = pnand %p5953_p8, %p5947_p5 }
  0x16   :  { %5957 = shalt.err (!%p5954_p9)
}
  0x17   :  { %s5966_s28 = smov 512   ;;  %s5967_s29 = smov 32  }
  0x18   :  { %68 = dma.hbm_to_vmem [thread:$0]  %s6421_s12, 32768, %s63_s26, [#allocation5], %s5966_s28, %s5966_s28, %s5967_s29  }
  0x19   :  { %5958 = dma.done.wait [#allocation3], 32768  }
  0x1a   :  { %5959 = vsyncadd [#allocation3], 4294934528 }
  0x1b   :  { %5960 = dma.done.wait [#allocation5], 32768  }
  0x1c   :  { %5961 = vsyncadd [#allocation5], 4294934528  ;;  %v5428_v0 = vld [vmem:[#allocation2 + $0xe4] ss:$16 sps:$4 sm:$0xff]   ;;  %v5432_v2 = vld [vmem:[#allocation2 + $0xe0] ss:$16 sps:$4 sm:$0xff]  }
  0x1d   :  { %v5430_v1 = vld [vmem:[#allocation2 + $0x2e4] ss:$16 sps:$4 sm:$0xff]   ;;  %1668 = vmatprep.subr.bf16.mxu0 %v5428_v0  ;;  %v5433_v3 = vld [vmem:[#allocation2 + $0x2e0] ss:$16 sps:$4 sm:$0xff]   ;;  %v79_v48 = vld [vmem:[%s6409_s0 + $0x8] sm:$0xff]  ;;  %vm5969_vm0 = vmmov 0  }
  0x1e   :  { %1709 = vmatprep.subr.bf16.mxu1 %v5430_v1  ;;  %v5434_v4 = vld [vmem:[#allocation2 + $0xc4] ss:$16 sps:$4 sm:$0xff]   ;;  %1669 = vmatpush1.bf16.msra.mxu0 %v5432_v2  ;;  %v5438_v6 = vld [vmem:[#allocation2 + $0xc0] ss:$16 sps:$4 sm:$0xff]   ;;  %v6066_v51 = vcombine.high %v79_v48, %v79_v48  ;;  %vm2388_vm1 = vcmask 523264  }
  0x1f   :  { %1710 = vmatpush1.bf16.msra.mxu1 %v5433_v3  ;;  %v5436_v5 = vld [vmem:[#allocation2 + $0x2c4] ss:$16 sps:$4 sm:$0xff]   ;;  %1670 = vmatprep.subr.bf16.mxu0 %v5434_v4  ;;  %v5439_v7 = vld [vmem:[#allocation2 + $0x2c0] ss:$16 sps:$4 sm:$0xff]  }
  0x20   :  { %1711 = vmatprep.subr.bf16.mxu1 %v5436_v5  ;;  %v5440_v8 = vld [vmem:[#allocation2 + $0xa4] ss:$16 sps:$4 sm:$0xff]   ;;  %v5444_v10 = vld [vmem:[#allocation2 + $0xa0] ss:$16 sps:$4 sm:$0xff]   ;;  %1741 = vmatprep.mubr.bf16.mxu1 %v6066_v51 }
  0x21   :  { %v5442_v9 = vld [vmem:[#allocation2 + $0x2a4] ss:$16 sps:$4 sm:$0xff]   ;;  %v5445_v11 = vld [vmem:[#allocation2 + $0x2a0] ss:$16 sps:$4 sm:$0xff]  }
  0x22   :  { %1671 = vmatpush1.bf16.msra.mxu0 %v5438_v6  ;;  %v5446_v12 = vld [vmem:[#allocation2 + $0x84] ss:$16 sps:$4 sm:$0xff]   ;;  %v5450_v14 = vld [vmem:[#allocation2 + $0x80] ss:$16 sps:$4 sm:$0xff]  }
  0x23   :  { %1712 = vmatpush1.bf16.msra.mxu1 %v5439_v7  ;;  %1672 = vmatprep.subr.bf16.mxu0 %v5440_v8  ;;  %v5448_v13 = vld [vmem:[#allocation2 + $0x284] ss:$16 sps:$4 sm:$0xff]   ;;  %v5451_v15 = vld [vmem:[#allocation2 + $0x280] ss:$16 sps:$4 sm:$0xff]   ;;  %v6072_v7 = vcombine.low %v79_v48, %v79_v48 }
  0x24   :  { %1713 = vmatprep.subr.bf16.mxu1 %v5442_v9  ;;  %v5452_v16 = vld [vmem:[#allocation2 + $0x64] ss:$16 sps:$4 sm:$0xff]   ;;  %v5456_v18 = vld [vmem:[#allocation2 + $0x60] ss:$16 sps:$4 sm:$0xff]  }
  0x25   :  { %v5454_v17 = vld [vmem:[#allocation2 + $0x264] ss:$16 sps:$4 sm:$0xff]   ;;  %v5457_v19 = vld [vmem:[#allocation2 + $0x260] ss:$16 sps:$4 sm:$0xff]  }
  0x26   :  { %1673 = vmatpush1.bf16.msra.mxu0 %v5444_v10  ;;  %v5458_v20 = vld [vmem:[#allocation2 + $0x44] ss:$16 sps:$4 sm:$0xff]   ;;  %v5462_v22 = vld [vmem:[#allocation2 + $0x40] ss:$16 sps:$4 sm:$0xff]  }
  0x27   :  { %1714 = vmatpush1.bf16.msra.mxu1 %v5445_v11  ;;  %1674 = vmatprep.subr.bf16.mxu0 %v5446_v12  ;;  %v5460_v21 = vld [vmem:[#allocation2 + $0x244] ss:$16 sps:$4 sm:$0xff]   ;;  %v5463_v23 = vld [vmem:[#allocation2 + $0x240] ss:$16 sps:$4 sm:$0xff]  }
  0x28   :  { %1715 = vmatprep.subr.bf16.mxu1 %v5448_v13  ;;  %v5464_v24 = vld [vmem:[#allocation2 + $0x24] ss:$16 sps:$4 sm:$0xff]   ;;  %v5468_v26 = vld [vmem:[#allocation2 + $0x20] ss:$16 sps:$4 sm:$0xff]  }
  0x29   :  { %v5466_v25 = vld [vmem:[#allocation2 + $0x224] ss:$16 sps:$4 sm:$0xff]   ;;  %v5469_v27 = vld [vmem:[#allocation2 + $0x220] ss:$16 sps:$4 sm:$0xff]  }
  0x2a   :  { %1675 = vmatpush1.bf16.msra.mxu0 %v5450_v14  ;;  %v5470_v28 = vld [vmem:[#allocation2 + $0x4] ss:$16 sps:$4 sm:$0xff]   ;;  %v5474_v30 = vld [vmem:[#allocation2] ss:$16 sps:$4 sm:$0xff]  }
  0x2b   :  { %1716 = vmatpush1.bf16.msra.mxu1 %v5451_v15  ;;  %1676 = vmatprep.subr.bf16.mxu0 %v5452_v16  ;;  %v5472_v29 = vld [vmem:[#allocation2 + $0x204] ss:$16 sps:$4 sm:$0xff]   ;;  %v5475_v31 = vld [vmem:[#allocation2 + $0x200] ss:$16 sps:$4 sm:$0xff]  }
  0x2c   :  { %1717 = vmatprep.subr.bf16.mxu1 %v5454_v17  ;;  %v5476_v32 = vld [vmem:[#allocation2 + $0x1e4] ss:$16 sps:$4 sm:$0xff]   ;;  %v5480_v34 = vld [vmem:[#allocation2 + $0x1e0] ss:$16 sps:$4 sm:$0xff]  }
  0x2d   :  { %v5478_v33 = vld [vmem:[#allocation2 + $0x3e4] ss:$16 sps:$4 sm:$0xff]   ;;  %v5481_v35 = vld [vmem:[#allocation2 + $0x3e0] ss:$16 sps:$4 sm:$0xff]  }
  0x2e   :  { %1677 = vmatpush1.bf16.msra.mxu0 %v5456_v18  ;;  %v5482_v36 = vld [vmem:[#allocation2 + $0x1c4] ss:$16 sps:$4 sm:$0xff]   ;;  %v5486_v38 = vld [vmem:[#allocation2 + $0x1c0] ss:$16 sps:$4 sm:$0xff]  }
  0x2f   :  { %1718 = vmatpush1.bf16.msra.mxu1 %v5457_v19  ;;  %1678 = vmatprep.subr.bf16.mxu0 %v5458_v20  ;;  %v5484_v37 = vld [vmem:[#allocation2 + $0x3c4] ss:$16 sps:$4 sm:$0xff]   ;;  %v5487_v39 = vld [vmem:[#allocation2 + $0x3c0] ss:$16 sps:$4 sm:$0xff]  }
  0x30   :  { %1719 = vmatprep.subr.bf16.mxu1 %v5460_v21  ;;  %v5488_v40 = vld [vmem:[#allocation2 + $0x1a4] ss:$16 sps:$4 sm:$0xff]   ;;  %v5492_v42 = vld [vmem:[#allocation2 + $0x1a0] ss:$16 sps:$4 sm:$0xff]  }
  0x31   :  { %v5490_v41 = vld [vmem:[#allocation2 + $0x3a4] ss:$16 sps:$4 sm:$0xff]   ;;  %v5493_v43 = vld [vmem:[#allocation2 + $0x3a0] ss:$16 sps:$4 sm:$0xff]  }
  0x32   :  { %1679 = vmatpush1.bf16.msra.mxu0 %v5462_v22  ;;  %v5494_v44 = vld [vmem:[#allocation2 + $0x184] ss:$16 sps:$4 sm:$0xff]   ;;  %v5498_v49 = vld [vmem:[#allocation2 + $0x180] ss:$16 sps:$4 sm:$0xff]  }
  0x33   :  { %1720 = vmatpush1.bf16.msra.mxu1 %v5463_v23  ;;  %1680 = vmatprep.subr.bf16.mxu0 %v5464_v24  ;;  %v5496_v45 = vld [vmem:[#allocation2 + $0x384] ss:$16 sps:$4 sm:$0xff]   ;;  %v5499_v50 = vld [vmem:[#allocation2 + $0x380] ss:$16 sps:$4 sm:$0xff]  }
  0x34   :  { %1721 = vmatprep.subr.bf16.mxu1 %v5466_v25  ;;  %v78_v46 = vld [vmem:[%s6409_s0] sm:$0xff] }
  0x35   :  { %v6061_v47 = vcombine.high %v78_v46, %v78_v46  ;;  %v5500_v52 = vld [vmem:[#allocation2 + $0x164] ss:$16 sps:$4 sm:$0xff]   ;;  %v5504_v54 = vld [vmem:[#allocation2 + $0x160] ss:$16 sps:$4 sm:$0xff]   ;;  %v6070_v6 = vcombine.low %v78_v46, %v78_v46 }
  0x36   :  { %1681 = vmatpush1.bf16.msra.mxu0 %v5468_v26  ;;  %v5502_v53 = vld [vmem:[#allocation2 + $0x364] ss:$16 sps:$4 sm:$0xff]   ;;  %v5505_v55 = vld [vmem:[#allocation2 + $0x360] ss:$16 sps:$4 sm:$0xff]  }
  0x37   :  { %1722 = vmatpush1.bf16.msra.mxu1 %v5469_v27  ;;  %1682 = vmatprep.subr.bf16.mxu0 %v5470_v28  ;;  %v5506_v56 = vld [vmem:[#allocation2 + $0x144] ss:$16 sps:$4 sm:$0xff]   ;;  %v5510_v58 = vld [vmem:[#allocation2 + $0x140] ss:$16 sps:$4 sm:$0xff]  }
  0x38   :  { %1723 = vmatprep.subr.bf16.mxu1 %v5472_v29  ;;  %1700 = vmatprep.mubr.bf16.mxu0 %v6061_v47  ;;  %v5508_v57 = vld [vmem:[#allocation2 + $0x344] ss:$16 sps:$4 sm:$0xff]   ;;  %v5511_v59 = vld [vmem:[#allocation2 + $0x340] ss:$16 sps:$4 sm:$0xff]  }
  0x39   :  { %v5512_v60 = vld [vmem:[#allocation2 + $0x124] ss:$16 sps:$4 sm:$0xff]   ;;  %v5516_v62 = vld [vmem:[#allocation2 + $0x120] ss:$16 sps:$4 sm:$0xff]  }
  0x3a   :  { %1683 = vmatpush1.bf16.msra.mxu0 %v5474_v30  ;;  %v5514_v61 = vld [vmem:[#allocation2 + $0x324] ss:$16 sps:$4 sm:$0xff]   ;;  %v5517_v63 = vld [vmem:[#allocation2 + $0x320] ss:$16 sps:$4 sm:$0xff]  }
  0x3b   :  { %1724 = vmatpush1.bf16.msra.mxu1 %v5475_v31  ;;  %1684 = vmatprep.subr.bf16.mxu0 %v5476_v32  ;;  %v5518_v0 = vld [vmem:[#allocation2 + $0x104] ss:$16 sps:$4 sm:$0xff]   ;;  %v5522_v2 = vld [vmem:[#allocation2 + $0x100] ss:$16 sps:$4 sm:$0xff]  }
  0x3c   :  { %1725 = vmatprep.subr.bf16.mxu1 %v5478_v33  ;;  %v5520_v1 = vld [vmem:[#allocation2 + $0x304] ss:$16 sps:$4 sm:$0xff]   ;;  %v5523_v3 = vld [vmem:[#allocation2 + $0x300] ss:$16 sps:$4 sm:$0xff]   ;;  %v6084_v33 = vld [vmem:[%s6409_s0 + $0x18] sm:$0xff] }
  0x3d   :  { %v5530_v4 = vld [vmem:[#allocation2 + $0x4e4] ss:$16 sps:$4 sm:$0xff]   ;;  %v5528_v8 = vld [vmem:[#allocation2 + $0x4e0] ss:$16 sps:$4 sm:$0xff]  }
  0x3e   :  { %1685 = vmatpush2.bf16.msra.mxu0 %v5480_v34  ;;  %v5533_v5 = vld [vmem:[#allocation2 + $0x6e4] ss:$16 sps:$4 sm:$0xff]   ;;  %v5531_v9 = vld [vmem:[#allocation2 + $0x6e0] ss:$16 sps:$4 sm:$0xff]  }
  0x3f   :  { %1726 = vmatpush2.bf16.msra.mxu1 %v5481_v35  ;;  %1686 = vmatprep.subr.bf16.mxu0 %v5482_v36  ;;  %v5536_v10 = vld [vmem:[#allocation2 + $0x4c4] ss:$16 sps:$4 sm:$0xff]   ;;  %v5534_v12 = vld [vmem:[#allocation2 + $0x4c0] ss:$16 sps:$4 sm:$0xff]  }
  0x40   :  { %1727 = vmatprep.subr.bf16.mxu1 %v5484_v37  ;;  %v5539_v11 = vld [vmem:[#allocation2 + $0x6c4] ss:$16 sps:$4 sm:$0xff]   ;;  %v5537_v13 = vld [vmem:[#allocation2 + $0x6c0] ss:$16 sps:$4 sm:$0xff]   ;;  %v6092_v37 = vcombine.high %v6084_v33, %v6084_v33 }
  0x41   :  { %v5542_v14 = vld [vmem:[#allocation2 + $0x4a4] ss:$16 sps:$4 sm:$0xff]   ;;  %v5540_v16 = vld [vmem:[#allocation2 + $0x4a0] ss:$16 sps:$4 sm:$0xff]  }
  0x42   :  { %1687 = vmatpush2.bf16.msra.mxu0 %v5486_v38  ;;  %v5545_v15 = vld [vmem:[#allocation2 + $0x6a4] ss:$16 sps:$4 sm:$0xff]   ;;  %v5543_v17 = vld [vmem:[#allocation2 + $0x6a0] ss:$16 sps:$4 sm:$0xff]  }
  0x43   :  { %1728 = vmatpush2.bf16.msra.mxu1 %v5487_v39  ;;  %1688 = vmatprep.subr.bf16.mxu0 %v5488_v40  ;;  %v5548_v18 = vld [vmem:[#allocation2 + $0x484] ss:$16 sps:$4 sm:$0xff]   ;;  %v5546_v20 = vld [vmem:[#allocation2 + $0x480] ss:$16 sps:$4 sm:$0xff]  }
  0x44   :  { %1729 = vmatprep.subr.bf16.mxu1 %v5490_v41  ;;  %v5551_v19 = vld [vmem:[#allocation2 + $0x684] ss:$16 sps:$4 sm:$0xff]   ;;  %v5549_v21 = vld [vmem:[#allocation2 + $0x680] ss:$16 sps:$4 sm:$0xff]  }
  0x45   :  { %v5554_v22 = vld [vmem:[#allocation2 + $0x464] ss:$16 sps:$4 sm:$0xff]   ;;  %v5552_v24 = vld [vmem:[#allocation2 + $0x460] ss:$16 sps:$4 sm:$0xff]  }
  0x46   :  { %1689 = vmatpush2.bf16.msra.mxu0 %v5492_v42  ;;  %v5557_v23 = vld [vmem:[#allocation2 + $0x664] ss:$16 sps:$4 sm:$0xff]   ;;  %v5555_v25 = vld [vmem:[#allocation2 + $0x660] ss:$16 sps:$4 sm:$0xff]  }
  0x47   :  { %1730 = vmatpush2.bf16.msra.mxu1 %v5493_v43  ;;  %1690 = vmatprep.subr.bf16.mxu0 %v5494_v44  ;;  %v5560_v26 = vld [vmem:[#allocation2 + $0x444] ss:$16 sps:$4 sm:$0xff]   ;;  %v5558_v28 = vld [vmem:[#allocation2 + $0x440] ss:$16 sps:$4 sm:$0xff]  }
  0x48   :  { %1731 = vmatprep.subr.bf16.mxu1 %v5496_v45  ;;  %v5563_v27 = vld [vmem:[#allocation2 + $0x644] ss:$16 sps:$4 sm:$0xff]   ;;  %v5561_v29 = vld [vmem:[#allocation2 + $0x640] ss:$16 sps:$4 sm:$0xff]  }
  0x49   :  { %v5566_v30 = vld [vmem:[#allocation2 + $0x424] ss:$16 sps:$4 sm:$0xff]   ;;  %v5564_v34 = vld [vmem:[#allocation2 + $0x420] ss:$16 sps:$4 sm:$0xff]  }
  0x4a   :  { %1691 = vmatpush2.bf16.msra.mxu0 %v5498_v49  ;;  %v5569_v31 = vld [vmem:[#allocation2 + $0x624] ss:$16 sps:$4 sm:$0xff]   ;;  %v5567_v35 = vld [vmem:[#allocation2 + $0x620] ss:$16 sps:$4 sm:$0xff]  }
  0x4b   :  { %1732 = vmatpush2.bf16.msra.mxu1 %v5499_v50  ;;  %1692 = vmatprep.subr.bf16.mxu0 %v5500_v52  ;;  %v6079_v32 = vld [vmem:[%s6409_s0 + $0x10] sm:$0xff] }
  0x4c   :  { %1733 = vmatprep.subr.bf16.mxu1 %v5502_v53  ;;  %v6088_v36 = vcombine.high %v6079_v32, %v6079_v32  ;;  %v5572_v38 = vld [vmem:[#allocation2 + $0x404] ss:$16 sps:$4 sm:$0xff]   ;;  %v5570_v40 = vld [vmem:[#allocation2 + $0x400] ss:$16 sps:$4 sm:$0xff]  }
  0x4d   :  { %v5575_v39 = vld [vmem:[#allocation2 + $0x604] ss:$16 sps:$4 sm:$0xff]   ;;  %v5573_v41 = vld [vmem:[#allocation2 + $0x600] ss:$16 sps:$4 sm:$0xff]  }
  0x4e   :  { %1693 = vmatpush2.bf16.msra.mxu0 %v5504_v54  ;;  %v5578_v42 = vld [vmem:[#allocation2 + $0x5e4] ss:$16 sps:$4 sm:$0xff]   ;;  %v5576_v44 = vld [vmem:[#allocation2 + $0x5e0] ss:$16 sps:$4 sm:$0xff]  }
  0x4f   :  { %1734 = vmatpush2.bf16.msra.mxu1 %v5505_v55  ;;  %1694 = vmatprep.subr.bf16.mxu0 %v5506_v56  ;;  %v5581_v43 = vld [vmem:[#allocation2 + $0x7e4] ss:$16 sps:$4 sm:$0xff]   ;;  %v5579_v45 = vld [vmem:[#allocation2 + $0x7e0] ss:$16 sps:$4 sm:$0xff]  }
  0x50   :  { %1735 = vmatprep.subr.bf16.mxu1 %v5508_v57  ;;  %v5584_v46 = vld [vmem:[#allocation2 + $0x5c4] ss:$16 sps:$4 sm:$0xff]   ;;  %v5582_v49 = vld [vmem:[#allocation2 + $0x5c0] ss:$16 sps:$4 sm:$0xff]  }
  0x51   :  { %v5587_v48 = vld [vmem:[#allocation2 + $0x7c4] ss:$16 sps:$4 sm:$0xff]   ;;  %v5585_v50 = vld [vmem:[#allocation2 + $0x7c0] ss:$16 sps:$4 sm:$0xff]  }
  0x52   :  { %1695 = vmatpush2.bf16.msra.mxu0 %v5510_v58  ;;  %v5590_v52 = vld [vmem:[#allocation2 + $0x5a4] ss:$16 sps:$4 sm:$0xff]   ;;  %v5588_v54 = vld [vmem:[#allocation2 + $0x5a0] ss:$16 sps:$4 sm:$0xff]  }
  0x53   :  { %1736 = vmatpush2.bf16.msra.mxu1 %v5511_v59  ;;  %1696 = vmatprep.subr.bf16.mxu0 %v5512_v60  ;;  %v5593_v53 = vld [vmem:[#allocation2 + $0x7a4] ss:$16 sps:$4 sm:$0xff]   ;;  %v5591_v55 = vld [vmem:[#allocation2 + $0x7a0] ss:$16 sps:$4 sm:$0xff]  }
  0x54   :  { %1737 = vmatprep.subr.bf16.mxu1 %v5514_v61  ;;  %v5596_v56 = vld [vmem:[#allocation2 + $0x584] ss:$16 sps:$4 sm:$0xff]   ;;  %v5594_v58 = vld [vmem:[#allocation2 + $0x580] ss:$16 sps:$4 sm:$0xff]  }
  0x55   :  { %v5599_v57 = vld [vmem:[#allocation2 + $0x784] ss:$16 sps:$4 sm:$0xff]   ;;  %v5597_v59 = vld [vmem:[#allocation2 + $0x780] ss:$16 sps:$4 sm:$0xff]  }
  0x56   :  { %1697 = vmatpush2.bf16.msra.mxu0 %v5516_v62  ;;  %v5602_v60 = vld [vmem:[#allocation2 + $0x564] ss:$16 sps:$4 sm:$0xff]   ;;  %v5600_v62 = vld [vmem:[#allocation2 + $0x560] ss:$16 sps:$4 sm:$0xff]  }
  0x57   :  { %1738 = vmatpush2.bf16.msra.mxu1 %v5517_v63  ;;  %1698 = vmatprep.subr.bf16.mxu0 %v5518_v0  ;;  %v5605_v61 = vld [vmem:[#allocation2 + $0x764] ss:$16 sps:$4 sm:$0xff]   ;;  %v5603_v63 = vld [vmem:[#allocation2 + $0x760] ss:$16 sps:$4 sm:$0xff]  }
  0x58   :  { %1739 = vmatprep.subr.bf16.mxu1 %v5520_v1  ;;  %v5608_v0 = vld [vmem:[#allocation2 + $0x544] ss:$16 sps:$4 sm:$0xff]  }
  0x59   :  { %v5611_v1 = vld [vmem:[#allocation2 + $0x744] ss:$16 sps:$4 sm:$0xff]  }
  0x5a   :  { %1699 = vmatpush2.bf16.msra.mxu0 %v5522_v2  ;;  %v5606_v2 = vld [vmem:[#allocation2 + $0x540] ss:$16 sps:$4 sm:$0xff]  }
  0x5b   :  { %1740 = vmatpush2.bf16.msra.mxu1 %v5523_v3  ;;  %1750 = vmatprep.subr.bf16.mxu0 %v5530_v4  ;;  %v5609_v3 = vld [vmem:[#allocation2 + $0x740] ss:$16 sps:$4 sm:$0xff]   ;;  %v5614_v4 = vld [vmem:[#allocation2 + $0x524] ss:$16 sps:$4 sm:$0xff]  }
  0x5c   :  { %1791 = vmatprep.subr.bf16.mxu1 %v5533_v5  ;;  %v5617_v5 = vld [vmem:[#allocation2 + $0x724] ss:$16 sps:$4 sm:$0xff]  }
  0x5d   :  { %1701 = vmatmul.mubr.bf16.vlgmr.msra.gmra.mxu0 %v6070_v6 }
  0x5e   :  { %1742 = vmatmul.mubr.bf16.vlgmr.msra.gmra.mxu1 %v6072_v7  ;;  %1751 = vmatpush1.bf16.msra.mxu0 %v5528_v8  ;;  %v5612_v8 = vld [vmem:[#allocation2 + $0x520] ss:$16 sps:$4 sm:$0xff]  }
  0x5f   :  { %1792 = vmatpush1.bf16.msra.mxu1 %v5531_v9  ;;  %1752 = vmatprep.subr.bf16.mxu0 %v5536_v10  ;;  %v5615_v9 = vld [vmem:[#allocation2 + $0x720] ss:$16 sps:$4 sm:$0xff]   ;;  %v5620_v10 = vld [vmem:[#allocation2 + $0x504] ss:$16 sps:$4 sm:$0xff]  }
  0x60   :  { %1793 = vmatprep.subr.bf16.mxu1 %v5539_v11  ;;  %1782 = vmatprep.mubr.bf16.mxu0 %v6088_v36  ;;  %v5623_v11 = vld [vmem:[#allocation2 + $0x704] ss:$16 sps:$4 sm:$0xff]  }
  0x61   :  { %1823 = vmatprep.mubr.bf16.mxu1 %v6092_v37 }
  0x62   :  { %1753 = vmatpush1.bf16.msra.mxu0 %v5534_v12  ;;  %v5618_v12 = vld [vmem:[#allocation2 + $0x500] ss:$16 sps:$4 sm:$0xff]  }
  0x63   :  { %1794 = vmatpush1.bf16.msra.mxu1 %v5537_v13  ;;  %1754 = vmatprep.subr.bf16.mxu0 %v5542_v14  ;;  %v5621_v13 = vld [vmem:[#allocation2 + $0x700] ss:$16 sps:$4 sm:$0xff]   ;;  %v5630_v14 = vld [vmem:[#allocation2 + $0xec] ss:$16 sps:$4 sm:$0xff]  }
  0x64   :  { %1795 = vmatprep.subr.bf16.mxu1 %v5545_v15  ;;  %v5633_v15 = vld [vmem:[#allocation2 + $0x2ec] ss:$16 sps:$4 sm:$0xff]  }
  0x66   :  { %1755 = vmatpush1.bf16.msra.mxu0 %v5540_v16  ;;  %v6098_v16 = vcombine.low %v6079_v32, %v6079_v32  ;;  %v5654_v32 = vld [vmem:[#allocation2 + $0x6c] ss:$16 sps:$4 sm:$0xff]  }
  0x67   :  { %1796 = vmatpush1.bf16.msra.mxu1 %v5543_v17  ;;  %1756 = vmatprep.subr.bf16.mxu0 %v5548_v18  ;;  %v6102_v17 = vcombine.low %v6084_v33, %v6084_v33  ;;  %v5628_v18 = vld [vmem:[#allocation2 + $0xe8] ss:$16 sps:$4 sm:$0xff]   ;;  %v5657_v33 = vld [vmem:[#allocation2 + $0x26c] ss:$16 sps:$4 sm:$0xff]  }
  0x68   :  { %1797 = vmatprep.subr.bf16.mxu1 %v5551_v19  ;;  %v5631_v19 = vld [vmem:[#allocation2 + $0x2e8] ss:$16 sps:$4 sm:$0xff]  }
  0x6a   :  { %1757 = vmatpush1.bf16.msra.mxu0 %v5546_v20  ;;  %v5636_v20 = vld [vmem:[#allocation2 + $0xcc] ss:$16 sps:$4 sm:$0xff]  }
  0x6b   :  { %1798 = vmatpush1.bf16.msra.mxu1 %v5549_v21  ;;  %1758 = vmatprep.subr.bf16.mxu0 %v5554_v22  ;;  %v5639_v21 = vld [vmem:[#allocation2 + $0x2cc] ss:$16 sps:$4 sm:$0xff]   ;;  %v5634_v22 = vld [vmem:[#allocation2 + $0xc8] ss:$16 sps:$4 sm:$0xff]  }
  0x6c   :  { %1799 = vmatprep.subr.bf16.mxu1 %v5557_v23  ;;  %v5637_v23 = vld [vmem:[#allocation2 + $0x2c8] ss:$16 sps:$4 sm:$0xff]  }
  0x6e   :  { %1759 = vmatpush1.bf16.msra.mxu0 %v5552_v24  ;;  %v5642_v24 = vld [vmem:[#allocation2 + $0xac] ss:$16 sps:$4 sm:$0xff]  }
  0x6f   :  { %1800 = vmatpush1.bf16.msra.mxu1 %v5555_v25  ;;  %1760 = vmatprep.subr.bf16.mxu0 %v5560_v26  ;;  %v5645_v25 = vld [vmem:[#allocation2 + $0x2ac] ss:$16 sps:$4 sm:$0xff]   ;;  %v5640_v26 = vld [vmem:[#allocation2 + $0xa8] ss:$16 sps:$4 sm:$0xff]  }
  0x70   :  { %1801 = vmatprep.subr.bf16.mxu1 %v5563_v27  ;;  %v5643_v27 = vld [vmem:[#allocation2 + $0x2a8] ss:$16 sps:$4 sm:$0xff]  }
  0x72   :  { %1761 = vmatpush1.bf16.msra.mxu0 %v5558_v28  ;;  %v5648_v28 = vld [vmem:[#allocation2 + $0x8c] ss:$16 sps:$4 sm:$0xff]  }
  0x73   :  { %1802 = vmatpush1.bf16.msra.mxu1 %v5561_v29  ;;  %1762 = vmatprep.subr.bf16.mxu0 %v5566_v30  ;;  %v5651_v29 = vld [vmem:[#allocation2 + $0x28c] ss:$16 sps:$4 sm:$0xff]   ;;  %v5646_v30 = vld [vmem:[#allocation2 + $0x88] ss:$16 sps:$4 sm:$0xff]  }
  0x74   :  { %1803 = vmatprep.subr.bf16.mxu1 %v5569_v31  ;;  %v5649_v31 = vld [vmem:[#allocation2 + $0x288] ss:$16 sps:$4 sm:$0xff]  }
  0x76   :  { %1763 = vmatpush1.bf16.msra.mxu0 %v5564_v34  ;;  %v5652_v34 = vld [vmem:[#allocation2 + $0x68] ss:$16 sps:$4 sm:$0xff]  }
  0x77   :  { %1804 = vmatpush1.bf16.msra.mxu1 %v5567_v35  ;;  %1764 = vmatprep.subr.bf16.mxu0 %v5572_v38  ;;  %v5663_v35 = vld [vmem:[#allocation2 + $0x24c] ss:$16 sps:$4 sm:$0xff]   ;;  %v5658_v38 = vld [vmem:[#allocation2 + $0x48] ss:$16 sps:$4 sm:$0xff]  }
  0x78   :  { %1805 = vmatprep.subr.bf16.mxu1 %v5575_v39  ;;  %v5661_v39 = vld [vmem:[#allocation2 + $0x248] ss:$16 sps:$4 sm:$0xff]  }
  0x7a   :  { %1765 = vmatpush1.bf16.msra.mxu0 %v5570_v40  ;;  %v5666_v40 = vld [vmem:[#allocation2 + $0x2c] ss:$16 sps:$4 sm:$0xff]  }
  0x7b   :  { %1806 = vmatpush1.bf16.msra.mxu1 %v5573_v41  ;;  %1766 = vmatprep.subr.bf16.mxu0 %v5578_v42  ;;  %v5669_v41 = vld [vmem:[#allocation2 + $0x22c] ss:$16 sps:$4 sm:$0xff]   ;;  %v5664_v42 = vld [vmem:[#allocation2 + $0x28] ss:$16 sps:$4 sm:$0xff]  }
  0x7c   :  { %1807 = vmatprep.subr.bf16.mxu1 %v5581_v43  ;;  %v5667_v43 = vld [vmem:[#allocation2 + $0x228] ss:$16 sps:$4 sm:$0xff]  }
  0x7e   :  { %1767 = vmatpush2.bf16.msra.mxu0 %v5576_v44  ;;  %v5672_v44 = vld [vmem:[#allocation2 + $0xc] ss:$16 sps:$4 sm:$0xff]  }
  0x7f   :  { %1808 = vmatpush2.bf16.msra.mxu1 %v5579_v45  ;;  %1768 = vmatprep.subr.bf16.mxu0 %v5584_v46  ;;  %v5675_v45 = vld [vmem:[#allocation2 + $0x20c] ss:$16 sps:$4 sm:$0xff]   ;;  %v5670_v46 = vld [vmem:[#allocation2 + $0x8] ss:$16 sps:$4 sm:$0xff]  }
  0x80   :  { %1809 = vmatprep.subr.bf16.mxu1 %v5587_v48  ;;  %v5673_v48 = vld [vmem:[#allocation2 + $0x208] ss:$16 sps:$4 sm:$0xff]  }
  0x82   :  { %1769 = vmatpush2.bf16.msra.mxu0 %v5582_v49  ;;  %v5678_v49 = vld [vmem:[#allocation2 + $0x1ec] ss:$16 sps:$4 sm:$0xff]  }
  0x83   :  { %1810 = vmatpush2.bf16.msra.mxu1 %v5585_v50  ;;  %1770 = vmatprep.subr.bf16.mxu0 %v5590_v52  ;;  %v5681_v50 = vld [vmem:[#allocation2 + $0x3ec] ss:$16 sps:$4 sm:$0xff]   ;;  %v5676_v52 = vld [vmem:[#allocation2 + $0x1e8] ss:$16 sps:$4 sm:$0xff]  }
  0x84   :  { %1811 = vmatprep.subr.bf16.mxu1 %v5593_v53  ;;  %v5679_v53 = vld [vmem:[#allocation2 + $0x3e8] ss:$16 sps:$4 sm:$0xff]  }
  0x86   :  { %1771 = vmatpush2.bf16.msra.mxu0 %v5588_v54  ;;  %v5684_v54 = vld [vmem:[#allocation2 + $0x1cc] ss:$16 sps:$4 sm:$0xff]  }
  0x87   :  { %1812 = vmatpush2.bf16.msra.mxu1 %v5591_v55  ;;  %1772 = vmatprep.subr.bf16.mxu0 %v5596_v56  ;;  %v5687_v55 = vld [vmem:[#allocation2 + $0x3cc] ss:$16 sps:$4 sm:$0xff]   ;;  %v5682_v56 = vld [vmem:[#allocation2 + $0x1c8] ss:$16 sps:$4 sm:$0xff]  }
  0x88   :  { %1813 = vmatprep.subr.bf16.mxu1 %v5599_v57  ;;  %v5685_v57 = vld [vmem:[#allocation2 + $0x3c8] ss:$16 sps:$4 sm:$0xff]  }
  0x8a   :  { %1773 = vmatpush2.bf16.msra.mxu0 %v5594_v58  ;;  %v5690_v58 = vld [vmem:[#allocation2 + $0x1ac] ss:$16 sps:$4 sm:$0xff]  }
  0x8b   :  { %1814 = vmatpush2.bf16.msra.mxu1 %v5597_v59  ;;  %1774 = vmatprep.subr.bf16.mxu0 %v5602_v60  ;;  %v5693_v59 = vld [vmem:[#allocation2 + $0x3ac] ss:$16 sps:$4 sm:$0xff]   ;;  %v5688_v60 = vld [vmem:[#allocation2 + $0x1a8] ss:$16 sps:$4 sm:$0xff]  }
  0x8c   :  { %1815 = vmatprep.subr.bf16.mxu1 %v5605_v61  ;;  %v5691_v61 = vld [vmem:[#allocation2 + $0x3a8] ss:$16 sps:$4 sm:$0xff]  }
  0x8e   :  { %1775 = vmatpush2.bf16.msra.mxu0 %v5600_v62  ;;  %v5696_v62 = vld [vmem:[#allocation2 + $0x18c] ss:$16 sps:$4 sm:$0xff]  }
  0x8f   :  { %1816 = vmatpush2.bf16.msra.mxu1 %v5603_v63  ;;  %1776 = vmatprep.subr.bf16.mxu0 %v5608_v0  ;;  %v5699_v63 = vld [vmem:[#allocation2 + $0x38c] ss:$16 sps:$4 sm:$0xff]   ;;  %v5694_v0 = vld [vmem:[#allocation2 + $0x188] ss:$16 sps:$4 sm:$0xff]  }
  0x90   :  { %1817 = vmatprep.subr.bf16.mxu1 %v5611_v1  ;;  %v5697_v1 = vld [vmem:[#allocation2 + $0x388] ss:$16 sps:$4 sm:$0xff]  }
  0x92   :  { %1777 = vmatpush2.bf16.msra.mxu0 %v5606_v2  ;;  %v5702_v2 = vld [vmem:[#allocation2 + $0x16c] ss:$16 sps:$4 sm:$0xff]  }
  0x93   :  { %1818 = vmatpush2.bf16.msra.mxu1 %v5609_v3  ;;  %1778 = vmatprep.subr.bf16.mxu0 %v5614_v4  ;;  %v5705_v3 = vld [vmem:[#allocation2 + $0x36c] ss:$16 sps:$4 sm:$0xff]   ;;  %v5700_v4 = vld [vmem:[#allocation2 + $0x168] ss:$16 sps:$4 sm:$0xff]  }
  0x94   :  { %1819 = vmatprep.subr.bf16.mxu1 %v5617_v5  ;;  %v5703_v5 = vld [vmem:[#allocation2 + $0x368] ss:$16 sps:$4 sm:$0xff]  }
  0x96   :  { %1779 = vmatpush2.bf16.msra.mxu0 %v5612_v8  ;;  %v5708_v8 = vld [vmem:[#allocation2 + $0x14c] ss:$16 sps:$4 sm:$0xff]  }
  0x97   :  { %1820 = vmatpush2.bf16.msra.mxu1 %v5615_v9  ;;  %1780 = vmatprep.subr.bf16.mxu0 %v5620_v10  ;;  %v5711_v9 = vld [vmem:[#allocation2 + $0x34c] ss:$16 sps:$4 sm:$0xff]   ;;  %v5706_v10 = vld [vmem:[#allocation2 + $0x148] ss:$16 sps:$4 sm:$0xff]  }
  0x98   :  { %1821 = vmatprep.subr.bf16.mxu1 %v5623_v11  ;;  %v5709_v11 = vld [vmem:[#allocation2 + $0x348] ss:$16 sps:$4 sm:$0xff]  }
  0x9a   :  { %1781 = vmatpush2.bf16.msra.mxu0 %v5618_v12  ;;  %v5714_v12 = vld [vmem:[#allocation2 + $0x12c] ss:$16 sps:$4 sm:$0xff]  }
  0x9b   :  { %1822 = vmatpush2.bf16.msra.mxu1 %v5621_v13  ;;  %1832 = vmatprep.subr.bf16.mxu0 %v5630_v14  ;;  %v5717_v13 = vld [vmem:[#allocation2 + $0x32c] ss:$16 sps:$4 sm:$0xff]   ;;  %v5712_v14 = vld [vmem:[#allocation2 + $0x128] ss:$16 sps:$4 sm:$0xff]  }
  0x9c   :  { %1873 = vmatprep.subr.bf16.mxu1 %v5633_v15  ;;  %v5715_v15 = vld [vmem:[#allocation2 + $0x328] ss:$16 sps:$4 sm:$0xff]  }
  0x9d   :  { %1783 = vmatmul.mubr.bf16.vlgmr.msra.gmra.mxu0 %v6098_v16 }
  0x9e   :  { %1824 = vmatmul.mubr.bf16.vlgmr.msra.gmra.mxu1 %v6102_v17  ;;  %1833 = vmatpush1.bf16.msra.mxu0 %v5628_v18  ;;  %v5720_v18 = vld [vmem:[#allocation2 + $0x10c] ss:$16 sps:$4 sm:$0xff]  }
  0x9f   :  { %1874 = vmatpush1.bf16.msra.mxu1 %v5631_v19  ;;  %1834 = vmatprep.subr.bf16.mxu0 %v5636_v20  ;;  %v5723_v19 = vld [vmem:[#allocation2 + $0x30c] ss:$16 sps:$4 sm:$0xff]   ;;  %v5718_v20 = vld [vmem:[#allocation2 + $0x108] ss:$16 sps:$4 sm:$0xff]  }
  0xa0   :  { %1875 = vmatprep.subr.bf16.mxu1 %v5639_v21  ;;  %1864 = vmatprep.mubr.bf16.mxu0 %v6061_v47  ;;  %v5655_v47 = vld [vmem:[#allocation2 + $0x268] ss:$16 sps:$4 sm:$0xff]  }
  0xa1   :  { %1905 = vmatprep.mubr.bf16.mxu1 %v6066_v51  ;;  %v5660_v51 = vld [vmem:[#allocation2 + $0x4c] ss:$16 sps:$4 sm:$0xff]   ;;  %v5721_v21 = vld [vmem:[#allocation2 + $0x308] ss:$16 sps:$4 sm:$0xff]  }
  0xa2   :  { %1835 = vmatpush1.bf16.msra.mxu0 %v5634_v22  ;;  %v5726_v22 = vld [vmem:[#allocation2 + $0x4ec] ss:$16 sps:$4 sm:$0xff]  }
  0xa3   :  { %1876 = vmatpush1.bf16.msra.mxu1 %v5637_v23  ;;  %1836 = vmatprep.subr.bf16.mxu0 %v5642_v24  ;;  %v5729_v23 = vld [vmem:[#allocation2 + $0x6ec] ss:$16 sps:$4 sm:$0xff]   ;;  %v5724_v24 = vld [vmem:[#allocation2 + $0x4e8] ss:$16 sps:$4 sm:$0xff]  }
  0xa4   :  { %1877 = vmatprep.subr.bf16.mxu1 %v5645_v25  ;;  %v5727_v25 = vld [vmem:[#allocation2 + $0x6e8] ss:$16 sps:$4 sm:$0xff]  }
  0xa6   :  { %1837 = vmatpush1.bf16.msra.mxu0 %v5640_v26  ;;  %v5732_v26 = vld [vmem:[#allocation2 + $0x4cc] ss:$16 sps:$4 sm:$0xff]  }
  0xa7   :  { %1878 = vmatpush1.bf16.msra.mxu1 %v5643_v27  ;;  %1838 = vmatprep.subr.bf16.mxu0 %v5648_v28  ;;  %v5735_v27 = vld [vmem:[#allocation2 + $0x6cc] ss:$16 sps:$4 sm:$0xff]   ;;  %v5730_v28 = vld [vmem:[#allocation2 + $0x4c8] ss:$16 sps:$4 sm:$0xff]  }
  0xa8   :  { %1879 = vmatprep.subr.bf16.mxu1 %v5651_v29  ;;  %v5733_v29 = vld [vmem:[#allocation2 + $0x6c8] ss:$16 sps:$4 sm:$0xff]  }
  0xaa   :  { %1839 = vmatpush1.bf16.msra.mxu0 %v5646_v30  ;;  %v5738_v30 = vld [vmem:[#allocation2 + $0x4ac] ss:$16 sps:$4 sm:$0xff]  }
  0xab   :  { %1880 = vmatpush1.bf16.msra.mxu1 %v5649_v31  ;;  %1840 = vmatprep.subr.bf16.mxu0 %v5654_v32  ;;  %v5741_v31 = vld [vmem:[#allocation2 + $0x6ac] ss:$16 sps:$4 sm:$0xff]   ;;  %v5736_v32 = vld [vmem:[#allocation2 + $0x4a8] ss:$16 sps:$4 sm:$0xff]  }
  0xac   :  { %1881 = vmatprep.subr.bf16.mxu1 %v5657_v33  ;;  %v5739_v33 = vld [vmem:[#allocation2 + $0x6a8] ss:$16 sps:$4 sm:$0xff]  }
  0xae   :  { %1841 = vmatpush1.bf16.msra.mxu0 %v5652_v34  ;;  %v5744_v34 = vld [vmem:[#allocation2 + $0x48c] ss:$16 sps:$4 sm:$0xff]  }
  0xaf   :  { %1882 = vmatpush1.bf16.msra.mxu1 %v5655_v47  ;;  %1842 = vmatprep.subr.bf16.mxu0 %v5660_v51  ;;  %v5742_v47 = vld [vmem:[#allocation2 + $0x488] ss:$16 sps:$4 sm:$0xff]   ;;  %v5750_v51 = vld [vmem:[#allocation2 + $0x46c] ss:$16 sps:$4 sm:$0xff]  }
  0xb0   :  { %1883 = vmatprep.subr.bf16.mxu1 %v5663_v35  ;;  %v5753_v35 = vld [vmem:[#allocation2 + $0x66c] ss:$16 sps:$4 sm:$0xff]  }
  0xb2   :  { %1843 = vmatpush1.bf16.msra.mxu0 %v5658_v38  ;;  %v5748_v38 = vld [vmem:[#allocation2 + $0x468] ss:$16 sps:$4 sm:$0xff]  }
  0xb3   :  { %1884 = vmatpush1.bf16.msra.mxu1 %v5661_v39  ;;  %1844 = vmatprep.subr.bf16.mxu0 %v5666_v40  ;;  %v5751_v39 = vld [vmem:[#allocation2 + $0x668] ss:$16 sps:$4 sm:$0xff]   ;;  %v5756_v40 = vld [vmem:[#allocation2 + $0x44c] ss:$16 sps:$4 sm:$0xff]  }
  0xb4   :  { %1885 = vmatprep.subr.bf16.mxu1 %v5669_v41  ;;  %v5757_v41 = vld [vmem:[#allocation2 + $0x648] ss:$16 sps:$4 sm:$0xff]  }
  0xb6   :  { %1845 = vmatpush1.bf16.msra.mxu0 %v5664_v42  ;;  %v5762_v42 = vld [vmem:[#allocation2 + $0x42c] ss:$16 sps:$4 sm:$0xff]  }
  0xb7   :  { %1886 = vmatpush1.bf16.msra.mxu1 %v5667_v43  ;;  %1846 = vmatprep.subr.bf16.mxu0 %v5672_v44  ;;  %v5765_v43 = vld [vmem:[#allocation2 + $0x62c] ss:$16 sps:$4 sm:$0xff]   ;;  %v5760_v44 = vld [vmem:[#allocation2 + $0x428] ss:$16 sps:$4 sm:$0xff]  }
  0xb8   :  { %1887 = vmatprep.subr.bf16.mxu1 %v5675_v45  ;;  %v5763_v45 = vld [vmem:[#allocation2 + $0x628] ss:$16 sps:$4 sm:$0xff]  }
  0xba   :  { %1847 = vmatpush1.bf16.msra.mxu0 %v5670_v46  ;;  %v5768_v46 = vld [vmem:[#allocation2 + $0x40c] ss:$16 sps:$4 sm:$0xff]  }
  0xbb   :  { %1888 = vmatpush1.bf16.msra.mxu1 %v5673_v48  ;;  %1848 = vmatprep.subr.bf16.mxu0 %v5678_v49  ;;  %v5771_v48 = vld [vmem:[#allocation2 + $0x60c] ss:$16 sps:$4 sm:$0xff]   ;;  %v5766_v49 = vld [vmem:[#allocation2 + $0x408] ss:$16 sps:$4 sm:$0xff]  }
  0xbc   :  { %1889 = vmatprep.subr.bf16.mxu1 %v5681_v50  ;;  %v5769_v50 = vld [vmem:[#allocation2 + $0x608] ss:$16 sps:$4 sm:$0xff]  }
  0xbe   :  { %1849 = vmatpush2.bf16.msra.mxu0 %v5676_v52  ;;  %v5774_v52 = vld [vmem:[#allocation2 + $0x5ec] ss:$16 sps:$4 sm:$0xff]  }
  0xbf   :  { %1890 = vmatpush2.bf16.msra.mxu1 %v5679_v53  ;;  %1850 = vmatprep.subr.bf16.mxu0 %v5684_v54  ;;  %v5777_v53 = vld [vmem:[#allocation2 + $0x7ec] ss:$16 sps:$4 sm:$0xff]   ;;  %v5772_v54 = vld [vmem:[#allocation2 + $0x5e8] ss:$16 sps:$4 sm:$0xff]  }
  0xc0   :  { %1891 = vmatprep.subr.bf16.mxu1 %v5687_v55  ;;  %v5775_v55 = vld [vmem:[#allocation2 + $0x7e8] ss:$16 sps:$4 sm:$0xff]  }
  0xc2   :  { %1851 = vmatpush2.bf16.msra.mxu0 %v5682_v56  ;;  %v5780_v56 = vld [vmem:[#allocation2 + $0x5cc] ss:$16 sps:$4 sm:$0xff]  }
  0xc3   :  { %1892 = vmatpush2.bf16.msra.mxu1 %v5685_v57  ;;  %1852 = vmatprep.subr.bf16.mxu0 %v5690_v58  ;;  %v5783_v57 = vld [vmem:[#allocation2 + $0x7cc] ss:$16 sps:$4 sm:$0xff]   ;;  %v5778_v58 = vld [vmem:[#allocation2 + $0x5c8] ss:$16 sps:$4 sm:$0xff]  }
  0xc4   :  { %1893 = vmatprep.subr.bf16.mxu1 %v5693_v59  ;;  %v5781_v59 = vld [vmem:[#allocation2 + $0x7c8] ss:$16 sps:$4 sm:$0xff]  }
  0xc6   :  { %1853 = vmatpush2.bf16.msra.mxu0 %v5688_v60  ;;  %v5786_v60 = vld [vmem:[#allocation2 + $0x5ac] ss:$16 sps:$4 sm:$0xff]  }
  0xc7   :  { %1894 = vmatpush2.bf16.msra.mxu1 %v5691_v61  ;;  %1854 = vmatprep.subr.bf16.mxu0 %v5696_v62  ;;  %v5789_v61 = vld [vmem:[#allocation2 + $0x7ac] ss:$16 sps:$4 sm:$0xff]   ;;  %v5784_v62 = vld [vmem:[#allocation2 + $0x5a8] ss:$16 sps:$4 sm:$0xff]  }
  0xc8   :  { %1895 = vmatprep.subr.bf16.mxu1 %v5699_v63  ;;  %v5787_v63 = vld [vmem:[#allocation2 + $0x7a8] ss:$16 sps:$4 sm:$0xff]  }
  0xca   :  { %1855 = vmatpush2.bf16.msra.mxu0 %v5694_v0  ;;  %v5792_v0 = vld [vmem:[#allocation2 + $0x58c] ss:$16 sps:$4 sm:$0xff]  }
  0xcb   :  { %1896 = vmatpush2.bf16.msra.mxu1 %v5697_v1  ;;  %1856 = vmatprep.subr.bf16.mxu0 %v5702_v2  ;;  %v5795_v1 = vld [vmem:[#allocation2 + $0x78c] ss:$16 sps:$4 sm:$0xff]   ;;  %v5790_v2 = vld [vmem:[#allocation2 + $0x588] ss:$16 sps:$4 sm:$0xff]  }
  0xcc   :  { %1897 = vmatprep.subr.bf16.mxu1 %v5705_v3  ;;  %v5793_v3 = vld [vmem:[#allocation2 + $0x788] ss:$16 sps:$4 sm:$0xff]  }
  0xce   :  { %1857 = vmatpush2.bf16.msra.mxu0 %v5700_v4  ;;  %v5798_v4 = vld [vmem:[#allocation2 + $0x56c] ss:$16 sps:$4 sm:$0xff]  }
  0xcf   :  { %1898 = vmatpush2.bf16.msra.mxu1 %v5703_v5  ;;  %1858 = vmatprep.subr.bf16.mxu0 %v5708_v8  ;;  %v5801_v5 = vld [vmem:[#allocation2 + $0x76c] ss:$16 sps:$4 sm:$0xff]   ;;  %v5796_v8 = vld [vmem:[#allocation2 + $0x568] ss:$16 sps:$4 sm:$0xff]  }
  0xd0   :  { %1899 = vmatprep.subr.bf16.mxu1 %v5711_v9  ;;  %v5799_v9 = vld [vmem:[#allocation2 + $0x768] ss:$16 sps:$4 sm:$0xff]  }
  0xd2   :  { %1859 = vmatpush2.bf16.msra.mxu0 %v5706_v10  ;;  %v5804_v10 = vld [vmem:[#allocation2 + $0x54c] ss:$16 sps:$4 sm:$0xff]  }
  0xd3   :  { %1900 = vmatpush2.bf16.msra.mxu1 %v5709_v11  ;;  %1860 = vmatprep.subr.bf16.mxu0 %v5714_v12  ;;  %v5807_v11 = vld [vmem:[#allocation2 + $0x74c] ss:$16 sps:$4 sm:$0xff]   ;;  %v5802_v12 = vld [vmem:[#allocation2 + $0x548] ss:$16 sps:$4 sm:$0xff]  }
  0xd4   :  { %1901 = vmatprep.subr.bf16.mxu1 %v5717_v13  ;;  %v5805_v13 = vld [vmem:[#allocation2 + $0x748] ss:$16 sps:$4 sm:$0xff]  }
  0xd6   :  { %1861 = vmatpush2.bf16.msra.mxu0 %v5712_v14  ;;  %v5810_v14 = vld [vmem:[#allocation2 + $0x52c] ss:$16 sps:$4 sm:$0xff]  }
  0xd7   :  { %1902 = vmatpush2.bf16.msra.mxu1 %v5715_v15  ;;  %1862 = vmatprep.subr.bf16.mxu0 %v5720_v18  ;;  %v5813_v15 = vld [vmem:[#allocation2 + $0x72c] ss:$16 sps:$4 sm:$0xff]   ;;  %v5808_v18 = vld [vmem:[#allocation2 + $0x528] ss:$16 sps:$4 sm:$0xff]  }
  0xd8   :  { %1903 = vmatprep.subr.bf16.mxu1 %v5723_v19  ;;  %v5811_v19 = vld [vmem:[#allocation2 + $0x728] ss:$16 sps:$4 sm:$0xff]  }
  0xda   :  { %1863 = vmatpush2.bf16.msra.mxu0 %v5718_v20  ;;  %v5816_v20 = vld [vmem:[#allocation2 + $0x50c] ss:$16 sps:$4 sm:$0xff]  }
  0xdb   :  { %1904 = vmatpush2.bf16.msra.mxu1 %v5721_v21  ;;  %1914 = vmatprep.subr.bf16.mxu0 %v5726_v22  ;;  %v5819_v21 = vld [vmem:[#allocation2 + $0x70c] ss:$16 sps:$4 sm:$0xff]   ;;  %v5814_v22 = vld [vmem:[#allocation2 + $0x508] ss:$16 sps:$4 sm:$0xff]  }
  0xdc   :  { %1955 = vmatprep.subr.bf16.mxu1 %v5729_v23  ;;  %v5817_v23 = vld [vmem:[#allocation2 + $0x708] ss:$16 sps:$4 sm:$0xff]  }
  0xdd   :  { %1865 = vmatmul.mubr.bf16.vlgmr.msra.gmra.mxu0 %v6070_v6  ;;  %v5747_v6 = vld [vmem:[#allocation2 + $0x68c] ss:$16 sps:$4 sm:$0xff]  }
  0xde   :  { %1906 = vmatmul.mubr.bf16.vlgmr.msra.gmra.mxu1 %v6072_v7  ;;  %1915 = vmatpush1.bf16.msra.mxu0 %v5724_v24  ;;  %v5745_v7 = vld [vmem:[#allocation2 + $0x688] ss:$16 sps:$4 sm:$0xff]  }
  0xdf   :  { %1956 = vmatpush1.bf16.msra.mxu1 %v5727_v25  ;;  %1916 = vmatprep.subr.bf16.mxu0 %v5732_v26  ;;  %v5820_v24 = vld [vmem:[%s6413_s4 + $0x78] sm:$0xff]   ;;  %v5822_v26 = vld [vmem:[%s6413_s4 + $0x70] sm:$0xff]  }
  0xe0   :  { %1957 = vmatprep.subr.bf16.mxu1 %v5735_v27  ;;  %1946 = vmatprep.mubr.bf16.mxu0 %v6088_v36  ;;  %v5759_v36 = vld [vmem:[#allocation2 + $0x64c] ss:$16 sps:$4 sm:$0xff]  }
  0xe1   :  { %1987 = vmatprep.mubr.bf16.mxu1 %v6092_v37  ;;  %v5754_v37 = vld [vmem:[#allocation2 + $0x448] ss:$16 sps:$4 sm:$0xff]  }
  0xe2   :  { %1917 = vmatpush1.bf16.msra.mxu0 %v5730_v28  ;;  %v5821_v25 = vld [vmem:[%s6413_s4 + $0x38] sm:$0xff]  }
  0xe3   :  { %1958 = vmatpush1.bf16.msra.mxu1 %v5733_v29  ;;  %1918 = vmatprep.subr.bf16.mxu0 %v5738_v30  ;;  %v5823_v29 = vld [vmem:[%s6413_s4 + $0x30] sm:$0xff]  }
  0xe4   :  { %1959 = vmatprep.subr.bf16.mxu1 %v5741_v31 }
  0xe6   :  { %1919 = vmatpush1.bf16.msra.mxu0 %v5736_v32  ;;  %v5824_v32 = vld [vmem:[%s6413_s4 + $0x68] sm:$0xff]  }
  0xe7   :  { %1960 = vmatpush1.bf16.msra.mxu1 %v5739_v33  ;;  %1920 = vmatprep.subr.bf16.mxu0 %v5744_v34 }
  0xe8   :  { %1961 = vmatprep.subr.bf16.mxu1 %v5747_v6 }
  0xea   :  { %1921 = vmatpush1.bf16.msra.mxu0 %v5742_v47 }
  0xeb   :  { %1962 = vmatpush1.bf16.msra.mxu1 %v5745_v7  ;;  %1922 = vmatprep.subr.bf16.mxu0 %v5750_v51  ;;  %v5836_v7 = vld [vmem:[%s6413_s4 + $0xf8] sm:$0xff]  }
  0xec   :  { %1963 = vmatprep.subr.bf16.mxu1 %v5753_v35  ;;  %v5837_v51 = vld [vmem:[%s6413_s4 + $0xb8] sm:$0xff]   ;;  %v5838_v35 = vld [vmem:[%s6413_s4 + $0xf0] sm:$0xff]  }
  0xee   :  { %1923 = vmatpush1.bf16.msra.mxu0 %v5748_v38  ;;  %v5827_v38 = vld [vmem:[%s6413_s4 + $0x20] sm:$0xff]  }
  0xef   :  { %1964 = vmatpush1.bf16.msra.mxu1 %v5751_v39  ;;  %1924 = vmatprep.subr.bf16.mxu0 %v5756_v40  ;;  %v5839_v39 = vld [vmem:[%s6413_s4 + $0xb0] sm:$0xff]   ;;  %v5828_v40 = vld [vmem:[%s6413_s4 + $0x58] sm:$0xff]  }
  0xf0   :  { %1965 = vmatprep.subr.bf16.mxu1 %v5759_v36  ;;  %v5840_v36 = vld [vmem:[%s6413_s4 + $0xe8] sm:$0xff]  }
  0xf2   :  { %1925 = vmatpush1.bf16.msra.mxu0 %v5754_v37  ;;  %v5829_v37 = vld [vmem:[%s6413_s4 + $0x18] sm:$0xff]  }
  0xf3   :  { %1966 = vmatpush1.bf16.msra.mxu1 %v5757_v41  ;;  %1926 = vmatprep.subr.bf16.mxu0 %v5762_v42  ;;  %v5841_v41 = vld [vmem:[%s6413_s4 + $0xa8] sm:$0xff]   ;;  %v5830_v42 = vld [vmem:[%s6413_s4 + $0x50] sm:$0xff]  }
  0xf4   :  { %1967 = vmatprep.subr.bf16.mxu1 %v5765_v43  ;;  %v5842_v43 = vld [vmem:[%s6413_s4 + $0xe0] sm:$0xff]  }
  0xf6   :  { %1927 = vmatpush1.bf16.msra.mxu0 %v5760_v44  ;;  %v5831_v44 = vld [vmem:[%s6413_s4 + $0x10] sm:$0xff]  }
  0xf7   :  { %1968 = vmatpush1.bf16.msra.mxu1 %v5763_v45  ;;  %1928 = vmatprep.subr.bf16.mxu0 %v5768_v46  ;;  %v5843_v45 = vld [vmem:[%s6413_s4 + $0xa0] sm:$0xff]   ;;  %v5832_v46 = vld [vmem:[%s6413_s4 + $0x48] sm:$0xff]  }
  0xf8   :  { %1969 = vmatprep.subr.bf16.mxu1 %v5771_v48  ;;  %v5844_v48 = vld [vmem:[%s6413_s4 + $0xd8] sm:$0xff]  }
  0xfa   :  { %1929 = vmatpush1.bf16.msra.mxu0 %v5766_v49  ;;  %v5833_v49 = vld [vmem:[%s6413_s4 + $0x8] sm:$0xff]  }
  0xfb   :  { %1970 = vmatpush1.bf16.msra.mxu1 %v5769_v50  ;;  %1930 = vmatprep.subr.bf16.mxu0 %v5774_v52  ;;  %v5845_v50 = vld [vmem:[%s6413_s4 + $0x98] sm:$0xff]   ;;  %v5834_v52 = vld [vmem:[%s6413_s4 + $0x40] sm:$0xff]  }
  0xfc   :  { %1971 = vmatprep.subr.bf16.mxu1 %v5777_v53  ;;  %v5835_v53 = vld [vmem:[%s6413_s4] sm:$0xff]  }
  0xfe   :  { %1931 = vmatpush2.bf16.msra.mxu0 %v5772_v54  ;;  %v340_v54 = vlaneseq }
  0xff   :  { %1972 = vmatpush2.bf16.msra.mxu1 %v5775_v55  ;;  %1932 = vmatprep.subr.bf16.mxu0 %v5780_v56 }
 0x100   :  { %1973 = vmatprep.subr.bf16.mxu1 %v5783_v57  ;;  %v6198_v55 = vshrl.u32 %v340_v54, 7  ;;  %v338_v57 = vld [vmem:[%s6412_s3] sm:$0xf] }
 0x102   :  { %1933 = vmatpush2.bf16.msra.mxu0 %v5778_v58  ;;  %v6201_v56 = vsub.s32 0, %v6198_v55  ;;  %v6207_v58 = vsub.s32 1, %v6198_v55 }
 0x103   :  { %1974 = vmatpush2.bf16.msra.mxu1 %v5781_v59  ;;  %1934 = vmatprep.subr.bf16.mxu0 %v5786_v60 }
 0x104   :  { %1975 = vmatprep.subr.bf16.mxu1 %v5789_v61  ;;  %v343_v59 = vrot.slane %v338_v57, %v6201_v56  ;;  %v347_v60 = vrot.slane %v338_v57, %v6207_v58 }
 0x106   :  { %1935 = vmatpush2.bf16.msra.mxu0 %v5784_v62 }
 0x107   :  { %1976 = vmatpush2.bf16.msra.mxu1 %v5787_v63  ;;  %1936 = vmatprep.subr.bf16.mxu0 %v5792_v0  ;;  %v5846_v63 = vld [vmem:[%s6413_s4 + $0xd0] sm:$0xff]  }
 0x108   :  { %1977 = vmatprep.subr.bf16.mxu1 %v5795_v1  ;;  %v5847_v1 = vld [vmem:[%s6413_s4 + $0x90] sm:$0xff]  }
 0x10a   :  { %1937 = vmatpush2.bf16.msra.mxu0 %v5790_v2 }
 0x10b   :  { %1978 = vmatpush2.bf16.msra.mxu1 %v5793_v3  ;;  %1938 = vmatprep.subr.bf16.mxu0 %v5798_v4 }
 0x10c   :  { %1979 = vmatprep.subr.bf16.mxu1 %v5801_v5 }
 0x10e   :  { %1939 = vmatpush2.bf16.msra.mxu0 %v5796_v8 }
 0x10f   :  { %1980 = vmatpush2.bf16.msra.mxu1 %v5799_v9  ;;  %1940 = vmatprep.subr.bf16.mxu0 %v5804_v10  ;;  %v5848_v10 = vld [vmem:[%s6413_s4 + $0xc8] sm:$0xff]  }
 0x110   :  { %1981 = vmatprep.subr.bf16.mxu1 %v5807_v11 }
 0x112   :  { %1941 = vmatpush2.bf16.msra.mxu0 %v5802_v12 }
 0x113   :  { %1982 = vmatpush2.bf16.msra.mxu1 %v5805_v13  ;;  %1942 = vmatprep.subr.bf16.mxu0 %v5810_v14  ;;  %v5849_v13 = vld [vmem:[%s6413_s4 + $0x88] sm:$0xff]  }
 0x114   :  { %1983 = vmatprep.subr.bf16.mxu1 %v5813_v15 }
 0x116   :  { %1943 = vmatpush2.bf16.msra.mxu0 %v5808_v18 }
 0x117   :  { %1984 = vmatpush2.bf16.msra.mxu1 %v5811_v19  ;;  %1944 = vmatprep.subr.bf16.mxu0 %v5816_v20 }
 0x118   :  { %1985 = vmatprep.subr.bf16.mxu1 %v5819_v21 }
 0x11a   :  { %1945 = vmatpush2.bf16.msra.mxu0 %v5814_v22  ;;  %v5850_v22 = vld [vmem:[%s6413_s4 + $0xc0] sm:$0xff]  }
 0x11b   :  { %1986 = vmatpush2.bf16.msra.mxu1 %v5817_v23  ;;  %5340 = vmatprep.subr.bf16.mxu0 %v5820_v24  ;;  %v5851_v24 = vld [vmem:[%s6413_s4 + $0x80] sm:$0xff]  }
 0x11c   :  { %5362 = vmatprep.subr.bf16.mxu1 %v5836_v7 }
 0x11d   :  { %v6121_v27 = vpop.f32.mrf.mxu0  ;;  %1947 = vmatmul.mubr.bf16.vlgmr.msra.gmra.mxu0 %v6098_v16  ;;  %v5825_v16 = vld [vmem:[%s6413_s4 + $0x28] sm:$0xff]  }
 0x11e   :  { %v6123_v28 = vpop.f32.mrf.mxu1  ;;  %1988 = vmatmul.mubr.bf16.vlgmr.msra.gmra.mxu1 %v6102_v17  ;;  %5341 = vmatpush3.bf16.msra.mxu0 %v5821_v25  ;;  %v5826_v17 = vld [vmem:[%s6413_s4 + $0x60] sm:$0xff]   ;;  %v1703_v61 = vadd.f32 %v6121_v27, %v343_v59 }
 0x11f   :  { %v1704_v30 = vpop.f32.mrf.mxu0  ;;  %5342 = vmatprep.subr.bf16.mxu0 %v5822_v26  ;;  %5363 = vmatpush3.bf16.msra.mxu1 %v5837_v51 }
 0x120   :  { %v6130_v31 = vpop.f32.mrf.mxu1  ;;  %5364 = vmatprep.subr.bf16.mxu1 %v5838_v35  ;;  %v1705_v62 = vadd.f32 %v1704_v30, %v347_v60  ;;  %v1744_v0 = vadd.f32 %v6123_v28, %v1703_v61  ;;  %v5853_v60 = vld [vmem:[%s6415_s6 + $0x10] sm:$0xff]  }
 0x121   :  { %v1706_v33 = vpop.f32.mrf.mxu0 }
 0x122   :  { %v1747_v34 = vpop.f32.mrf.mxu1  ;;  %5343 = vmatpush3.bf16.msra.mxu0 %v5823_v29  ;;  %v1746_v4 = vadd.f32 %v6130_v31, %v1705_v62 }
 0x123   :  { %v1707_v6 = vpop.f32.mrf.mxu0  ;;  %5344 = vmatprep.subr.bf16.mxu0 %v5824_v32  ;;  %5365 = vmatpush3.bf16.msra.mxu1 %v5839_v39 }
 0x124   :  { %v1748_v47 = vpop.f32.mrf.mxu1  ;;  %5366 = vmatprep.subr.bf16.mxu1 %v5840_v36  ;;  %v6239_v6 = vsub.s32 2, %v6198_v55 }
 0x125   :  { %v6242_v47 = vsub.s32 3, %v6198_v55 }
 0x126   :  { %5345 = vmatpush3.bf16.msra.mxu0 %v5825_v16  ;;  %v5852_v16 = vld [vmem:[%s6415_s6 + $0x18] sm:$0xff]   ;;  %v351_v7 = vrot.slane %v338_v57, %v6239_v6 }
 0x127   :  { %5346 = vmatprep.subr.bf16.mxu0 %v5826_v17  ;;  %5367 = vmatpush3.bf16.msra.mxu1 %v5841_v41  ;;  %v5968_v17 = vmov 0.0   ;;  %v355_v51 = vrot.slane %v338_v57, %v6242_v47 }
 0x128   :  { %5368 = vmatprep.subr.bf16.mxu1 %v5842_v43 }
 0x12a   :  { %5347 = vmatpush3.bf16.msra.mxu0 %v5827_v38 }
 0x12b   :  { %5348 = vmatprep.subr.bf16.mxu0 %v5828_v40  ;;  %5369 = vmatpush3.bf16.msra.mxu1 %v5843_v45 }
 0x12c   :  { %5370 = vmatprep.subr.bf16.mxu1 %v5844_v48 }
 0x12e   :  { %5349 = vmatpush3.bf16.msra.mxu0 %v5829_v37 }
 0x12f   :  { %5350 = vmatprep.subr.bf16.mxu0 %v5830_v42  ;;  %5371 = vmatpush3.bf16.msra.mxu1 %v5845_v50 }
 0x130   :  { %5372 = vmatprep.subr.bf16.mxu1 %v5846_v63  ;;  %v5854_v63 = vld [vmem:[%s6415_s6 + $0x8] sm:$0xff]  }
 0x132   :  { %5351 = vmatpush3.bf16.msra.mxu0 %v5831_v44 }
 0x133   :  { %5352 = vmatprep.subr.bf16.mxu0 %v5832_v46  ;;  %5373 = vmatpush3.bf16.msra.mxu1 %v5847_v1 }
 0x134   :  { %5374 = vmatprep.subr.bf16.mxu1 %v5848_v10 }
 0x136   :  { %5353 = vmatpush3.bf16.msra.mxu0 %v5833_v49 }
 0x137   :  { %5354 = vmatprep.subr.bf16.mxu0 %v5834_v52  ;;  %5375 = vmatpush3.bf16.msra.mxu1 %v5849_v13 }
 0x138   :  { %5376 = vmatprep.subr.bf16.mxu1 %v5850_v22 }
 0x13a   :  { %5355 = vmatpush3.bf16.msra.mxu0 %v5835_v53 }
 0x13b   :  { %5377 = vmatpush3.bf16.msra.mxu1 %v5851_v24  ;;  %5394 = vmatprep.subr.bf16.mxu0 %v5968_v17 }
 0x13c   :  { %5406 = vmatprep.subr.bf16.mxu1 %v5968_v17 }
 0x15d   :  { %v1784_v2 = vpop.f32.mrf.mxu0 }
 0x15e   :  { %v1825_v3 = vpop.f32.mrf.mxu1  ;;  %v1785_v5 = vadd.f32 %v1784_v2, %v1744_v0 }
 0x15f   :  { %v1786_v8 = vpop.f32.mrf.mxu0 }
 0x160   :  { %v1827_v9 = vpop.f32.mrf.mxu1  ;;  %v1826_v11 = vadd.f32 %v1825_v3, %v1785_v5  ;;  %v1787_v12 = vadd.f32 %v1786_v8, %v1746_v4  ;;  %v5855_v3 = vld [vmem:[%s6415_s6] sm:$0xff]   ;;  %s5970_s6 = smov 64  }
 0x161   :  { %v1788_v14 = vpop.f32.mrf.mxu0  ;;  %v5005_v4 = vld [vmem:[%s6414_s5] ss:$0 sm:$0xff] }
 0x162   :  { %v1829_v15 = vpop.f32.mrf.mxu1  ;;  %v1828_v18 = vadd.f32 %v1827_v9, %v1787_v12  ;;  %v1996_v19 = vmax.f32 %v1826_v11, 0.0 }
 0x163   :  { %v1789_v20 = vpop.f32.mrf.mxu0 }
 0x164   :  { %v1830_v21 = vpop.f32.mrf.mxu1  ;;  %v1997_v23 = vmax.f32 %v1828_v18, 0.0  ;;  %v2000_v26 = vpack.c.bf16 %v1996_v19, %v1996_v19  ;;  %v5856_v18 = vld [vmem:[%s6417_s8 + $0x18] sm:$0xff]   ;;  %v5857_v19 = vld [vmem:[%s6417_s8 + $0x10] sm:$0xff]   ;;  %v5038_v20 = vld [vmem:[%s6416_s7] ss:$0 sm:$0xff] }
 0x166   :  { %v2001_v25 = vpack.c.bf16 %v1997_v23, %v1997_v23 }
 0x168   :  { %2299 = vmatprep.mubr.bf16.mxu0 %v2001_v25 }
 0x169   :  { %2300 = vmatmul.mubr.bf16.vlgmr.msra.gmra.mxu0 %v2000_v26 }
 0x16a   :  { %5395 = vmatpush3.bf16.msra.mxu0 %v5852_v16  ;;  %5402 = vmatprep.mubr.msk.bf16.mxu0 %vm5969_vm0, %v5968_v17  ;;  %v5874_v16 = vld [vmem:[%s6419_s10 + $0x24] ss:$16 sps:$4 sm:$0xff]  }
 0x16b   :  { %5396 = vmatprep.subr.bf16.mxu0 %v5968_v17 }
 0x16e   :  { %5397 = vmatpush3.bf16.msra.mxu0 %v5853_v60  ;;  %v2926_v60 = vld [vmem:[#allocation4 + $0x5e0] sm:$0xff] }
 0x16f   :  { %5398 = vmatprep.subr.bf16.mxu0 %v5968_v17 }
 0x172   :  { %5399 = vmatpush3.bf16.msra.mxu0 %v5854_v63  ;;  %v5044_v63 = vld [vmem:[%s6418_s9] ss:$0 sm:$0xff] }
 0x173   :  { %5400 = vmatprep.subr.bf16.mxu0 %v5968_v17 }
 0x176   :  { %5401 = vmatpush3.bf16.msra.mxu0 %v5855_v3 }
 0x19d   :  { %v1866_v27 = vpop.f32.mrf.mxu0 }
 0x19e   :  { %v1907_v28 = vpop.f32.mrf.mxu1  ;;  %v1867_v35 = vadd.f32 %v1866_v27, %v351_v7  ;;  %v5858_v27 = vld [vmem:[%s6417_s8 + $0x8] sm:$0xff]   ;;  %v5872_v7 = vld [vmem:[%s6419_s10 + $0x20] ss:$16 sps:$4 sm:$0xff]  }
 0x19f   :  { %v1868_v29 = vpop.f32.mrf.mxu0 }
 0x1a0   :  { %v1909_v30 = vpop.f32.mrf.mxu1  ;;  %v1869_v38 = vadd.f32 %v1868_v29, %v355_v51  ;;  %v1908_v39 = vadd.f32 %v1907_v28, %v1867_v35  ;;  %v5859_v29 = vld [vmem:[%s6417_s8] sm:$0xff]  }
 0x1a1   :  { %v1870_v31 = vpop.f32.mrf.mxu0  ;;  %v2435_v51 = vld [vmem:[%s6410_s1] sm:$0xff] }
 0x1a2   :  { %v1911_v32 = vpop.f32.mrf.mxu1  ;;  %v1910_v37 = vadd.f32 %v1909_v30, %v1869_v38  ;;  %v5860_v30 = vld [vmem:[%s6419_s10 + $0x60] ss:$16 sps:$4 sm:$0xff]   ;;  %v5862_v31 = vld [vmem:[%s6419_s10 + $0x64] ss:$16 sps:$4 sm:$0xff]  }
 0x1a3   :  { %v1871_v33 = vpop.f32.mrf.mxu0  ;;  %v5865_v32 = vld [vmem:[%s6419_s10 + $0x6c] ss:$16 sps:$4 sm:$0xff]   ;;  %2656 = vmatprep.subr.bf16.mxu0 %v5862_v31 }
 0x1a4   :  { %v1912_v34 = vpop.f32.mrf.mxu1  ;;  %v5868_v33 = vld [vmem:[%s6419_s10 + $0x44] ss:$16 sps:$4 sm:$0xff]  }
 0x1a5   :  { %v5866_v34 = vld [vmem:[%s6419_s10 + $0x40] ss:$16 sps:$4 sm:$0xff]  }
 0x1dd   :  { %v1948_v40 = vpop.f32.mrf.mxu0 }
 0x1de   :  { %v1989_v36 = vpop.f32.mrf.mxu1  ;;  %v1949_v41 = vadd.f32 %v1948_v40, %v1908_v39  ;;  %v5863_v40 = vld [vmem:[%s6419_s10 + $0x68] ss:$16 sps:$4 sm:$0xff]  }
 0x1df   :  { %v1950_v42 = vpop.f32.mrf.mxu0 }
 0x1e0   :  { %v1991_v43 = vpop.f32.mrf.mxu1  ;;  %v1990_v44 = vadd.f32 %v1989_v36, %v1949_v41  ;;  %v1951_v45 = vadd.f32 %v1950_v42, %v1910_v37  ;;  %v5871_v41 = vld [vmem:[%s6419_s10 + $0x4c] ss:$16 sps:$4 sm:$0xff]   ;;  %v5869_v42 = vld [vmem:[%s6419_s10 + $0x48] ss:$16 sps:$4 sm:$0xff]  }
 0x1e1   :  { %v1952_v46 = vpop.f32.mrf.mxu0 }
 0x1e2   :  { %v1993_v48 = vpop.f32.mrf.mxu1  ;;  %v1992_v49 = vadd.f32 %v1991_v43, %v1951_v45  ;;  %v1998_v50 = vmax.f32 %v1990_v44, 0.0  ;;  %v5877_v43 = vld [vmem:[%s6419_s10 + $0x2c] ss:$16 sps:$4 sm:$0xff]   ;;  %v5875_v44 = vld [vmem:[%s6419_s10 + $0x28] ss:$16 sps:$4 sm:$0xff]  }
 0x1e3   :  { %v1953_v52 = vpop.f32.mrf.mxu0  ;;  %v5880_v45 = vld [vmem:[%s6419_s10 + $0x4] ss:$16 sps:$4 sm:$0xff]   ;;  %v5883_v46 = vld [vmem:[%s6419_s10 + $0xc] ss:$16 sps:$4 sm:$0xff]   ;;  %v5878_v48 = vld [vmem:[%s6419_s10] ss:$16 sps:$4 sm:$0xff]  }
 0x1e4   :  { %v1994_v53 = vpop.f32.mrf.mxu1  ;;  %v1999_v54 = vmax.f32 %v1992_v49, 0.0  ;;  %v2002_v57 = vpack.c.bf16 %v1998_v50, %v1998_v50  ;;  %v5881_v49 = vld [vmem:[%s6419_s10 + $0x8] ss:$16 sps:$4 sm:$0xff]   ;;  %v5971_v50 = vmov 0   ;;  %v2794_v52 = vld [vmem:[#allocation4 + $0x1c0] sm:$0xff] }
 0x1e5   :  { %v2798_v53 = vld [vmem:[#allocation4 + $0x1e0] sm:$0xff] }
 0x1e6   :  { %v2003_v59 = vpack.c.bf16 %v1999_v54, %v1999_v54  ;;  %v2922_v54 = vld [vmem:[#allocation4 + $0x5c0] sm:$0xff] }
 0x1e8   :  { %2339 = vmatprep.mubr.bf16.mxu1 %v2003_v59  ;;  %v5124_v59 = vcombine.low %v2794_v52, %v2798_v53 }
 0x1e9   :  { %2340 = vmatmul.mubr.bf16.vlgmr.msra.gmra.mxu1 %v2002_v57  ;;  %v5125_v57 = vcombine.high %v2794_v52, %v2798_v53 }
 0x1ea   :  { %5414 = vmatprep.mubr.msk.bf16.mxu1 %vm5969_vm0, %v5968_v17  ;;  %5407 = vmatpush3.bf16.msra.mxu1 %v5856_v18  ;;  %v2782_v18 = vld [vmem:[#allocation4 + $0x160] sm:$0xff] }
 0x1eb   :  { %5408 = vmatprep.subr.bf16.mxu1 %v5968_v17 }
 0x1ee   :  { %5409 = vmatpush3.bf16.msra.mxu1 %v5857_v19  ;;  %v2906_v19 = vld [vmem:[#allocation4 + $0x540] sm:$0xff] }
 0x1ef   :  { %5410 = vmatprep.subr.bf16.mxu1 %v5968_v17 }
 0x1f2   :  { %5411 = vmatpush3.bf16.msra.mxu1 %v5858_v27  ;;  %v2898_v27 = vld [vmem:[#allocation4 + $0x500] sm:$0xff] }
 0x1f3   :  { %5412 = vmatprep.subr.bf16.mxu1 %v5968_v17 }
 0x1f6   :  { %5413 = vmatpush3.bf16.msra.mxu1 %v5859_v29 }
 0x1f7   :  { %2697 = vmatprep.subr.bf16.mxu1 %v5865_v32 }
 0x229   :  { %v5356_v61 = vpop.f32.mrf.mxu0 }
 0x22b   :  { %v5357_v62 = vpop.f32.mrf.mxu0 }
 0x22c   :  { %v5358_v0 = vadd.f32 %v5357_v62, %v5356_v61  ;;  %v5252_v61 = vcombine.low %v2922_v54, %v2926_v60  ;;  %v5253_v62 = vcombine.high %v2922_v54, %v2926_v60  ;;  %v2866_v60 = vld [vmem:[#allocation4 + $0x400] sm:$0xff] }
 0x22d   :  { %v5359_v1 = vpop.f32.mrf.mxu0 }
 0x22e   :  { %v2302_v9 = vadd.f32 %v5358_v0, %v5005_v4  ;;  %v2790_v4 = vld [vmem:[#allocation4 + $0x1a0] sm:$0xff] }
 0x22f   :  { %v5360_v2 = vpop.f32.mrf.mxu0 }
 0x230   :  { %v2786_v2 = vld [vmem:[#allocation4 + $0x180] sm:$0xff] }
 0x2a9   :  { %v5378_v5 = vpop.f32.mrf.mxu1 }
 0x2ab   :  { %v5379_v8 = vpop.f32.mrf.mxu1 }
 0x2ac   :  { %v5380_v10 = vadd.f32 %v5379_v8, %v5378_v5  ;;  %v2914_v5 = vld [vmem:[#allocation4 + $0x580] sm:$0xff] }
 0x2ad   :  { %v5381_v11 = vpop.f32.mrf.mxu1  ;;  %v2918_v8 = vld [vmem:[#allocation4 + $0x5a0] sm:$0xff] }
 0x2ae   :  { %v2342_v12 = vadd.f32 %v5380_v10, %v2302_v9 }
 0x2af   :  { %v5382_v13 = vpop.f32.mrf.mxu1 }
 0x2b0   :  { %v2347_v14 = vmax.f32 %v2342_v12, 0.0  ;;  %v5117_v12 = vcombine.high %v2786_v2, %v2790_v4  ;;  %v5245_v13 = vcombine.high %v2914_v5, %v2918_v8 }
 0x2b2   :  { %v2348_v15 = vpack.c.bf16 %v2347_v14, %v2347_v14  ;;  %v2778_v14 = vld [vmem:[#allocation4 + $0x140] sm:$0xff] }
 0x2b3   :  { %v5108_v29 = vcombine.low %v2778_v14, %v2782_v18 }
 0x2b4   :  { %5403 = vmatmul.mubr.msk.bf16.vlgmr.msra.gmra.mxu0 %vm2388_vm1, %v2348_v15 }
 0x2b5   :  { %2657 = vmatpush1.bf16.msra.mxu0 %v5860_v30  ;;  %2680 = vmatprep.mubr.bf16.mxu0 %v5971_v50 }
 0x2b6   :  { %2658 = vmatprep.subr.bf16.mxu0 %v5868_v33  ;;  %v2762_v33 = vld [vmem:[#allocation4 + $0xc0] sm:$0xff] }
 0x2b9   :  { %2659 = vmatpush1.bf16.msra.mxu0 %v5866_v34  ;;  %v2766_v34 = vld [vmem:[#allocation4 + $0xe0] sm:$0xff] }
 0x2ba   :  { %2660 = vmatprep.subr.bf16.mxu0 %v5874_v16  ;;  %v2890_v16 = vld [vmem:[#allocation4 + $0x4c0] sm:$0xff] }
 0x2bd   :  { %2661 = vmatpush1.bf16.msra.mxu0 %v5872_v7 }
 0x2be   :  { %2662 = vmatprep.subr.bf16.mxu0 %v5880_v45  ;;  %v2746_v45 = vld [vmem:[#allocation4 + $0x40] sm:$0xff] }
 0x2c1   :  { %2663 = vmatpush1.bf16.msra.mxu0 %v5878_v48  ;;  %v2874_v48 = vld [vmem:[#allocation4 + $0x440] sm:$0xff] }
 0x2c2   :  { %4316 = vmatprep.subr.bf16.mxu0 %v5125_v57  ;;  %v2742_v57 = vld [vmem:[#allocation4 + $0x20] sm:$0xff] }
 0x374   :  { %v2426_v21 = vpop.f32.mrf.mxu0 }
 0x375   :  { %v2427_v22 = vadd.f32 %v5038_v20, %v2426_v21  ;;  %v2910_v20 = vld [vmem:[#allocation4 + $0x560] sm:$0xff]  ;;  %v5116_v21 = vcombine.low %v2786_v2, %v2790_v4 }
 0x376   :  { %v5404_v23 = vpop.f32.mrf.mxu0  ;;  %v5236_v30 = vcombine.low %v2906_v19, %v2910_v20  ;;  %v2858_v2 = vld [vmem:[#allocation4 + $0x3c0] sm:$0xff] }
 0x377   :  { %v2432_v24 = vmul.f32 0.5, %v2427_v22  ;;  %4729 = vst [vmem:[%s6424_s15] sm:$0xff] %v2427_v22  ;;  %v5109_v23 = vcombine.high %v2778_v14, %v2782_v18  ;;  %v2986_v4 = vld [vmem:[#allocation4 + $0x7c0] sm:$0xff] }
 0x378   :  { %v2429_v25 = vpop.f32.mrf.mxu0  ;;  %v2978_v14 = vld [vmem:[#allocation4 + $0x780] sm:$0xff] }
 0x379   :  { %v2433_v26 = vmul.f32 1.442695, %v2432_v24  ;;  %v5237_v24 = vcombine.high %v2906_v19, %v2910_v20  ;;  %v2770_v25 = vld [vmem:[#allocation4 + $0x100] sm:$0xff] }
 0x37a   :  { %v5405_v28 = vpop.f32.mrf.mxu0 }
 0x37b   :  { %5884 = vpow2.f32 %v2433_v26  ;;  %v2774_v26 = vld [vmem:[#allocation4 + $0x120] sm:$0xff] }
 0x37c   :  { %v2902_v28 = vld [vmem:[#allocation4 + $0x520] sm:$0xff]  ;;  %v5101_v31 = vcombine.high %v2770_v25, %v2774_v26  ;;  %v5100_v7 = vcombine.low %v2770_v25, %v2774_v26 }
 0x37d   :  { %v5229_v32 = vcombine.high %v2898_v27, %v2902_v28  ;;  %v2974_v25 = vld [vmem:[#allocation4 + $0x760] sm:$0xff] }
 0x388   :  { %v5885_v17 = vpop.eup %5884 }
 0x389   :  { %2437 = vrot.lane.b32.xlu0 %v5885_v17, %s5970_s6  ;;  %v2894_v17 = vld [vmem:[#allocation4 + $0x4e0] sm:$0xff] }
 0x3fb   :  { %v2438_v35 = vpop.permute.xlu0 %2437 }
 0x3fc   :  { %v2440_v38 = vmul.f32 %v2438_v35, %v2435_v51  ;;  %v5228_v51 = vcombine.low %v2898_v27, %v2902_v28  ;;  %v5093_v35 = vcombine.high %v2762_v33, %v2766_v34 }
 0x3fe   :  { %v2441_v39 = vadd.f32 %v2440_v38, %v2427_v22  ;;  %v5244_v22 = vcombine.low %v2914_v5, %v2918_v8  ;;  %v5221_v38 = vcombine.high %v2890_v16, %v2894_v17  ;;  %v2990_v5 = vld [vmem:[#allocation4 + $0x7e0] sm:$0xff] }
 0x3ff   :  { %v5316_v19 = vcombine.low %v2986_v4, %v2990_v5 }
 0x400   :  { %v2442_v36 = vpack.c.bf16 %v2441_v39, %v2441_v39  ;;  %v4728_v37 = vsel %vm2388_vm1, %v2441_v39, 0.0  ;;  %v2754_v39 = vld [vmem:[#allocation4 + $0x80] sm:$0xff] }
 0x401   :  { %4730 = vst [vmem:[%s6424_s15 + $0x8] sm:$0xff] %v4728_v37  ;;  %v2886_v37 = vld [vmem:[#allocation4 + $0x4a0] sm:$0xff] }
 0x402   :  { %5415 = vmatmul.mubr.msk.bf16.vlgmr.msra.gmra.mxu1 %vm2388_vm1, %v2442_v36  ;;  %v2882_v36 = vld [vmem:[#allocation4 + $0x480] sm:$0xff] }
 0x403   :  { %2698 = vmatpush1.bf16.msra.mxu1 %v5863_v40  ;;  %2721 = vmatprep.mubr.bf16.mxu1 %v5971_v50  ;;  %v2758_v40 = vld [vmem:[#allocation4 + $0xa0] sm:$0xff]  ;;  %v5212_v52 = vcombine.low %v2882_v36, %v2886_v37 }
 0x404   :  { %2699 = vmatprep.subr.bf16.mxu1 %v5871_v41  ;;  %v5092_v41 = vcombine.low %v2762_v33, %v2766_v34  ;;  %v5084_v50 = vcombine.low %v2754_v39, %v2758_v40  ;;  %v2966_v33 = vld [vmem:[#allocation4 + $0x720] sm:$0xff] }
 0x407   :  { %2700 = vmatpush1.bf16.msra.mxu1 %v5869_v42  ;;  %v5220_v42 = vcombine.low %v2890_v16, %v2894_v17 }
 0x408   :  { %2701 = vmatprep.subr.bf16.mxu1 %v5877_v43  ;;  %v5085_v43 = vcombine.high %v2754_v39, %v2758_v40  ;;  %v2958_v39 = vld [vmem:[#allocation4 + $0x6e0] sm:$0xff] }
 0x40b   :  { %2702 = vmatpush1.bf16.msra.mxu1 %v5875_v44  ;;  %v5213_v44 = vcombine.high %v2882_v36, %v2886_v37 }
 0x40c   :  { %2703 = vmatprep.subr.bf16.mxu1 %v5883_v46  ;;  %v2750_v46 = vld [vmem:[#allocation4 + $0x60] sm:$0xff] }
 0x40d   :  { %v5077_v53 = vcombine.high %v2746_v45, %v2750_v46 }
 0x40f   :  { %2704 = vmatpush1.bf16.msra.mxu1 %v5881_v49  ;;  %v2878_v49 = vld [vmem:[#allocation4 + $0x460] sm:$0xff] }
 0x410   :  { %4357 = vmatprep.subr.bf16.mxu1 %v5253_v62  ;;  %v5205_v54 = vcombine.high %v2874_v48, %v2878_v49  ;;  %v5076_v62 = vcombine.low %v2746_v45, %v2750_v46  ;;  %v2950_v45 = vld [vmem:[#allocation4 + $0x6a0] sm:$0xff] }
 0x4c2   :  { %v2519_v0 = vpop.f32.mrf.mxu1 }
 0x4c3   :  { %v2520_v1 = vadd.f32 %v5044_v63, %v2519_v0  ;;  %v5204_v63 = vcombine.low %v2874_v48, %v2878_v49 }
 0x4c4   :  { %v5416_v3 = vpop.f32.mrf.mxu1 }
 0x4c5   :  { %v2525_v9 = vmax.f32 %v2520_v1, 0.0  ;;  %v2862_v3 = vld [vmem:[#allocation4 + $0x3e0] sm:$0xff] }
 0x4c6   :  { %v2522_v10 = vpop.f32.mrf.mxu1  ;;  %v5188_v18 = vcombine.low %v2858_v2, %v2862_v3 }
 0x4c7   :  { %v2526_v11 = vpack.c.bf16 %v2525_v9, %v2525_v9  ;;  %v5189_v10 = vcombine.high %v2858_v2, %v2862_v3  ;;  %v2806_v2 = vld [vmem:[#allocation4 + $0x220] sm:$0xff] }
 0x4c8   :  { %v5417_v15 = vpop.f32.mrf.mxu1  ;;  %v2930_v3 = vld [vmem:[#allocation4 + $0x600] sm:$0xff] }
 0x4c9   :  { %5066 = vmatmul.mubr.msk.bf16.vlgmr.msra.gmra.mxu0 %vm2388_vm1, %v2526_v11  ;;  %5067 = vmatmul.mubr.msk.bf16.vlgmr.msra.gmra.mxu1 %vm2388_vm1, %v2526_v11  ;;  %v5317_v11 = vcombine.high %v2986_v4, %v2990_v5  ;;  %v2982_v15 = vld [vmem:[#allocation4 + $0x7a0] sm:$0xff] }
 0x4ca   :  { %4317 = vmatpush1.bf16.msra.mxu0 %v5124_v59  ;;  %4358 = vmatpush1.bf16.msra.mxu1 %v5252_v61  ;;  %v2738_v59 = vld [vmem:[#allocation4] sm:$0xff]  ;;  %v5308_v27 = vcombine.low %v2978_v14, %v2982_v15 }
 0x4cb   :  { %4318 = vmatprep.subr.bf16.mxu0 %v5117_v12  ;;  %4359 = vmatprep.subr.bf16.mxu1 %v5245_v13  ;;  %v2870_v61 = vld [vmem:[#allocation4 + $0x420] sm:$0xff]  ;;  %v5069_v0 = vcombine.high %v2738_v59, %v2742_v57  ;;  %v5068_v8 = vcombine.low %v2738_v59, %v2742_v57 }
 0x4cc   :  { %v5197_v1 = vcombine.high %v2866_v60, %v2870_v61  ;;  %v5196_v9 = vcombine.low %v2866_v60, %v2870_v61  ;;  %v2850_v12 = vld [vmem:[#allocation4 + $0x380] sm:$0xff] }
 0x4cd   :  { %v2854_v13 = vld [vmem:[#allocation4 + $0x3a0] sm:$0xff] }
 0x4ce   :  { %4319 = vmatpush1.bf16.msra.mxu0 %v5116_v21  ;;  %4360 = vmatpush1.bf16.msra.mxu1 %v5244_v22  ;;  %v5181_v20 = vcombine.high %v2850_v12, %v2854_v13  ;;  %v5309_v21 = vcombine.high %v2978_v14, %v2982_v15  ;;  %v2842_v22 = vld [vmem:[#allocation4 + $0x340] sm:$0xff]  ;;  %v5180_v26 = vcombine.low %v2850_v12, %v2854_v13  ;;  %v2799_v12 = vld [vmem:[#allocation4 + $0x1e8] sm:$0xff] }
 0x4cf   :  { %4320 = vmatprep.subr.bf16.mxu0 %v5109_v23  ;;  %4361 = vmatprep.subr.bf16.mxu1 %v5237_v24  ;;  %v2846_v23 = vld [vmem:[#allocation4 + $0x360] sm:$0xff]  ;;  %v2923_v13 = vld [vmem:[#allocation4 + $0x5c8] sm:$0xff] }
 0x4d0   :  { %v2970_v24 = vld [vmem:[#allocation4 + $0x740] sm:$0xff]  ;;  %v5173_v28 = vcombine.high %v2842_v22, %v2846_v23  ;;  %v5172_v34 = vcombine.low %v2842_v22, %v2846_v23  ;;  %v2927_v15 = vld [vmem:[#allocation4 + $0x5e8] sm:$0xff] }
 0x4d1   :  { %v5300_v16 = vcombine.low %v2970_v24, %v2974_v25  ;;  %v2814_v59 = vld [vmem:[#allocation4 + $0x260] sm:$0xff] }
 0x4d2   :  { %4321 = vmatpush1.bf16.msra.mxu0 %v5108_v29  ;;  %4362 = vmatpush1.bf16.msra.mxu1 %v5236_v30  ;;  %v5301_v29 = vcombine.high %v2970_v24, %v2974_v25  ;;  %v2834_v30 = vld [vmem:[#allocation4 + $0x300] sm:$0xff] }
 0x4d3   :  { %4322 = vmatprep.subr.bf16.mxu0 %v5101_v31  ;;  %4363 = vmatprep.subr.bf16.mxu1 %v5229_v32  ;;  %v2838_v31 = vld [vmem:[#allocation4 + $0x320] sm:$0xff] }
 0x4d4   :  { %v2962_v32 = vld [vmem:[#allocation4 + $0x700] sm:$0xff]  ;;  %v5165_v17 = vcombine.high %v2834_v30, %v2838_v31  ;;  %v5164_v40 = vcombine.low %v2834_v30, %v2838_v31 }
 0x4d5   :  { %v5292_v36 = vcombine.low %v2962_v32, %v2966_v33  ;;  %v2938_v57 = vld [vmem:[#allocation4 + $0x640] sm:$0xff] }
 0x4d6   :  { %4323 = vmatpush1.bf16.msra.mxu0 %v5100_v7  ;;  %4364 = vmatpush1.bf16.msra.mxu1 %v5228_v51  ;;  %v5293_v7 = vcombine.high %v2962_v32, %v2966_v33  ;;  %v2826_v51 = vld [vmem:[#allocation4 + $0x2c0] sm:$0xff] }
 0x4d7   :  { %4324 = vmatprep.subr.bf16.mxu0 %v5093_v35  ;;  %4365 = vmatprep.subr.bf16.mxu1 %v5221_v38  ;;  %v2830_v35 = vld [vmem:[#allocation4 + $0x2e0] sm:$0xff] }
 0x4d8   :  { %v2954_v38 = vld [vmem:[#allocation4 + $0x6c0] sm:$0xff]  ;;  %v5157_v37 = vcombine.high %v2826_v51, %v2830_v35  ;;  %v5156_v46 = vcombine.low %v2826_v51, %v2830_v35 }
 0x4d9   :  { %v5284_v48 = vcombine.low %v2954_v38, %v2958_v39  ;;  %v2942_v61 = vld [vmem:[#allocation4 + $0x660] sm:$0xff] }
 0x4da   :  { %4325 = vmatpush1.bf16.msra.mxu0 %v5092_v41  ;;  %4366 = vmatpush1.bf16.msra.mxu1 %v5220_v42  ;;  %v5285_v41 = vcombine.high %v2954_v38, %v2958_v39  ;;  %v2818_v42 = vld [vmem:[#allocation4 + $0x280] sm:$0xff]  ;;  %v2787_v38 = vld [vmem:[#allocation4 + $0x188] sm:$0xff] }
 0x4db   :  { %4326 = vmatprep.subr.bf16.mxu0 %v5085_v43  ;;  %4367 = vmatprep.subr.bf16.mxu1 %v5213_v44  ;;  %v2822_v43 = vld [vmem:[#allocation4 + $0x2a0] sm:$0xff] }
 0x4dc   :  { %v2946_v44 = vld [vmem:[#allocation4 + $0x680] sm:$0xff]  ;;  %v5149_v49 = vcombine.high %v2818_v42, %v2822_v43 }
 0x4dd   :  { %v2934_v5 = vld [vmem:[#allocation4 + $0x620] sm:$0xff] }
 0x4de   :  { %4327 = vmatpush1.bf16.msra.mxu0 %v5084_v50  ;;  %4368 = vmatpush1.bf16.msra.mxu1 %v5212_v52  ;;  %v5277_v50 = vcombine.high %v2946_v44, %v2950_v45  ;;  %v5148_v52 = vcombine.low %v2818_v42, %v2822_v43 }
 0x4df   :  { %4328 = vmatprep.subr.bf16.mxu0 %v5077_v53  ;;  %4369 = vmatprep.subr.bf16.mxu1 %v5205_v54  ;;  %v5276_v53 = vcombine.low %v2946_v44, %v2950_v45  ;;  %v2810_v54 = vld [vmem:[#allocation4 + $0x240] sm:$0xff] }
 0x4e0   :  { %v5141_v60 = vcombine.high %v2810_v54, %v2814_v59 }
 0x4e2   :  { %4329 = vmatpush1.bf16.msra.mxu0 %v5076_v62  ;;  %4370 = vmatpush1.bf16.msra.mxu1 %v5204_v63  ;;  %v5140_v62 = vcombine.low %v2810_v54, %v2814_v59  ;;  %v5268_v63 = vcombine.low %v2938_v57, %v2942_v61 }
 0x4e3   :  { %4330 = vmatprep.subr.bf16.mxu0 %v5069_v0  ;;  %4371 = vmatprep.subr.bf16.mxu1 %v5197_v1  ;;  %v5269_v0 = vcombine.high %v2938_v57, %v2942_v61  ;;  %v2802_v1 = vld [vmem:[#allocation4 + $0x200] sm:$0xff]  ;;  %v2771_v61 = vld [vmem:[#allocation4 + $0x108] sm:$0xff] }
 0x4e4   :  { %v5133_v4 = vcombine.high %v2802_v1, %v2806_v2 }
 0x4e6   :  { %4331 = vmatpush1.bf16.msra.mxu0 %v5068_v8  ;;  %4372 = vmatpush1.bf16.msra.mxu1 %v5196_v9  ;;  %v5132_v8 = vcombine.low %v2802_v1, %v2806_v2  ;;  %v5260_v9 = vcombine.low %v2930_v3, %v2934_v5 }
 0x4e7   :  { %4332 = vmatprep.subr.bf16.mxu0 %v5189_v10  ;;  %4373 = vmatprep.subr.bf16.mxu1 %v5317_v11  ;;  %v5261_v10 = vcombine.high %v2930_v3, %v2934_v5  ;;  %v2795_v11 = vld [vmem:[#allocation4 + $0x1c8] sm:$0xff] }
 0x4e8   :  { %v5127_v14 = vcombine.high %v2795_v11, %v2799_v12  ;;  %v2763_v5 = vld [vmem:[#allocation4 + $0xc8] sm:$0xff] }
 0x4ea   :  { %4333 = vmatpush2.bf16.msra.mxu0 %v5188_v18  ;;  %4374 = vmatpush2.bf16.msra.mxu1 %v5316_v19  ;;  %v5126_v18 = vcombine.low %v2795_v11, %v2799_v12  ;;  %v5254_v19 = vcombine.low %v2923_v13, %v2927_v15 }
 0x4eb   :  { %4334 = vmatprep.subr.bf16.mxu0 %v5181_v20  ;;  %4375 = vmatprep.subr.bf16.mxu1 %v5309_v21  ;;  %v5255_v20 = vcombine.high %v2923_v13, %v2927_v15  ;;  %v2543_v21 = vld [vmem:[%s6420_s11] sm:$0xf]  ;;  %v2755_v15 = vld [vmem:[#allocation4 + $0x88] sm:$0xff] }
 0x4ec   :  { %v2548_v22 = vrot.slane %v2543_v21, %v6201_v56  ;;  %v2556_v23 = vrot.slane %v2543_v21, %v6239_v6  ;;  %v2552_v24 = vrot.slane %v2543_v21, %v6207_v58  ;;  %v2560_v25 = vrot.slane %v2543_v21, %v6242_v47 }
 0x4ee   :  { %4335 = vmatpush2.bf16.msra.mxu0 %v5180_v26  ;;  %4376 = vmatpush2.bf16.msra.mxu1 %v5308_v27 }
 0x4ef   :  { %4336 = vmatprep.subr.bf16.mxu0 %v5173_v28  ;;  %4377 = vmatprep.subr.bf16.mxu1 %v5301_v29 }
 0x4f2   :  { %4337 = vmatpush2.bf16.msra.mxu0 %v5172_v34  ;;  %4378 = vmatpush2.bf16.msra.mxu1 %v5300_v16 }
 0x4f3   :  { %4338 = vmatprep.subr.bf16.mxu0 %v5165_v17  ;;  %4379 = vmatprep.subr.bf16.mxu1 %v5293_v7 }
 0x4f6   :  { %4339 = vmatpush2.bf16.msra.mxu0 %v5164_v40  ;;  %4380 = vmatpush2.bf16.msra.mxu1 %v5292_v36  ;;  %v2791_v36 = vld [vmem:[#allocation4 + $0x1a8] sm:$0xff] }
 0x4f7   :  { %4340 = vmatprep.subr.bf16.mxu0 %v5157_v37  ;;  %4381 = vmatprep.subr.bf16.mxu1 %v5285_v41  ;;  %v2915_v37 = vld [vmem:[#allocation4 + $0x588] sm:$0xff]  ;;  %v5118_v54 = vcombine.low %v2787_v38, %v2791_v36 }
 0x4f8   :  { %v2919_v41 = vld [vmem:[#allocation4 + $0x5a8] sm:$0xff] }
 0x4f9   :  { %v5246_v59 = vcombine.low %v2915_v37, %v2919_v41 }
 0x4fa   :  { %4341 = vmatpush2.bf16.msra.mxu0 %v5156_v46  ;;  %4382 = vmatpush2.bf16.msra.mxu1 %v5284_v48  ;;  %v2779_v46 = vld [vmem:[#allocation4 + $0x148] sm:$0xff]  ;;  %v5119_v48 = vcombine.high %v2787_v38, %v2791_v36 }
 0x4fb   :  { %4342 = vmatprep.subr.bf16.mxu0 %v5149_v49  ;;  %4383 = vmatprep.subr.bf16.mxu1 %v5277_v50  ;;  %v5247_v49 = vcombine.high %v2915_v37, %v2919_v41  ;;  %v2783_v50 = vld [vmem:[#allocation4 + $0x168] sm:$0xff] }
 0x4fc   :  { %v5111_v57 = vcombine.high %v2779_v46, %v2783_v50  ;;  %v5110_v1 = vcombine.low %v2779_v46, %v2783_v50  ;;  %v2987_v36 = vld [vmem:[#allocation4 + $0x7c8] sm:$0xff] }
 0x4fd   :  { %v2991_v37 = vld [vmem:[#allocation4 + $0x7e8] sm:$0xff] }
 0x4fe   :  { %4343 = vmatpush2.bf16.msra.mxu0 %v5148_v52  ;;  %4384 = vmatpush2.bf16.msra.mxu1 %v5276_v53  ;;  %v2907_v52 = vld [vmem:[#allocation4 + $0x548] sm:$0xff] }
 0x4ff   :  { %4344 = vmatprep.subr.bf16.mxu0 %v5141_v60  ;;  %4385 = vmatprep.subr.bf16.mxu1 %v5269_v0  ;;  %v2911_v53 = vld [vmem:[#allocation4 + $0x568] sm:$0xff] }
 0x500   :  { %v5239_v60 = vcombine.high %v2907_v52, %v2911_v53  ;;  %v2903_v0 = vld [vmem:[#allocation4 + $0x528] sm:$0xff]  ;;  %v5238_v2 = vcombine.low %v2907_v52, %v2911_v53 }
 0x501   :  { %v2851_v50 = vld [vmem:[#allocation4 + $0x388] sm:$0xff] }
 0x502   :  { %4345 = vmatpush2.bf16.msra.mxu0 %v5140_v62  ;;  %4386 = vmatpush2.bf16.msra.mxu1 %v5268_v63  ;;  %v2775_v62 = vld [vmem:[#allocation4 + $0x128] sm:$0xff] }
 0x503   :  { %4346 = vmatprep.subr.bf16.mxu0 %v5133_v4  ;;  %4387 = vmatprep.subr.bf16.mxu1 %v5261_v10  ;;  %v2899_v63 = vld [vmem:[#allocation4 + $0x508] sm:$0xff]  ;;  %v5103_v3 = vcombine.high %v2771_v61, %v2775_v62  ;;  %v5102_v11 = vcombine.low %v2771_v61, %v2775_v62 }
 0x504   :  { %v5231_v4 = vcombine.high %v2899_v63, %v2903_v0  ;;  %v2895_v10 = vld [vmem:[#allocation4 + $0x4e8] sm:$0xff]  ;;  %v5230_v12 = vcombine.low %v2899_v63, %v2903_v0 }
 0x505   :  { %v2855_v52 = vld [vmem:[#allocation4 + $0x3a8] sm:$0xff] }
 0x506   :  { %4347 = vmatpush2.bf16.msra.mxu0 %v5132_v8  ;;  %4388 = vmatpush2.bf16.msra.mxu1 %v5260_v9  ;;  %v2767_v8 = vld [vmem:[#allocation4 + $0xe8] sm:$0xff] }
 0x507   :  { %4398 = vmatprep.subr.bf16.mxu0 %v5127_v14  ;;  %4439 = vmatprep.subr.bf16.mxu1 %v5255_v20  ;;  %v2891_v9 = vld [vmem:[#allocation4 + $0x4c8] sm:$0xff]  ;;  %v5095_v13 = vcombine.high %v2763_v5, %v2767_v8  ;;  %v5094_v21 = vcombine.low %v2763_v5, %v2767_v8 }
 0x508   :  { %v5223_v14 = vcombine.high %v2891_v9, %v2895_v10  ;;  %v2887_v20 = vld [vmem:[#allocation4 + $0x4a8] sm:$0xff] }
 0x509   :  { %v2979_v53 = vld [vmem:[#allocation4 + $0x788] sm:$0xff] }
 0x50a   :  { %v2843_v62 = vld [vmem:[#allocation4 + $0x348] sm:$0xff] }
 0x50b   :  { %v2847_v63 = vld [vmem:[#allocation4 + $0x368] sm:$0xff] }
 0x50c   :  { %v2971_v0 = vld [vmem:[#allocation4 + $0x748] sm:$0xff] }
 0x50d   :  { %v2835_v8 = vld [vmem:[#allocation4 + $0x308] sm:$0xff] }
 0x589   :  { %v2682_v26 = vpop.f32.mrf.mxu0  ;;  %v2723_v27 = vpop.f32.mrf.mxu1 }
 0x58a   :  { %v2683_v28 = vadd.f32 %v2682_v26, %v2548_v22  ;;  %v2724_v29 = vadd.f32 %v2723_v27, %v2556_v23  ;;  %v5222_v22 = vcombine.low %v2891_v9, %v2895_v10  ;;  %v2751_v26 = vld [vmem:[#allocation4 + $0x68] sm:$0xff] }
 0x58b   :  { %v2684_v30 = vpop.f32.mrf.mxu0  ;;  %v2725_v31 = vpop.f32.mrf.mxu1  ;;  %v2875_v27 = vld [vmem:[#allocation4 + $0x448] sm:$0xff] }
 0x58c   :  { %v2685_v32 = vadd.f32 %v2684_v30, %v2552_v24  ;;  %v2726_v33 = vadd.f32 %v2725_v31, %v2560_v25  ;;  %v2730_v34 = vmax.f32 %v2683_v28, 0.0  ;;  %v2732_v16 = vmax.f32 %v2724_v29, 0.0  ;;  %v2747_v25 = vld [vmem:[#allocation4 + $0x48] sm:$0xff] }
 0x58d   :  { %v2686_v17 = vpop.f32.mrf.mxu0  ;;  %v2727_v7 = vpop.f32.mrf.mxu1  ;;  %v2879_v28 = vld [vmem:[#allocation4 + $0x468] sm:$0xff]  ;;  %v5079_v31 = vcombine.high %v2747_v25, %v2751_v26 }
 0x58e   :  { %v2731_v51 = vmax.f32 %v2685_v32, 0.0  ;;  %v2733_v35 = vmax.f32 %v2726_v33, 0.0  ;;  %v6356_v44 = vpack.c.bf16 %v2730_v34, %v2730_v34  ;;  %v6358_v45 = vpack.c.bf16 %v2732_v16, %v2732_v16  ;;  %v2739_v33 = vld [vmem:[#allocation4 + $0x8] sm:$0xff] }
 0x58f   :  { %v2687_v39 = vpop.f32.mrf.mxu0  ;;  %v2728_v40 = vpop.f32.mrf.mxu1  ;;  %v5207_v32 = vcombine.high %v2875_v27, %v2879_v28  ;;  %v2743_v34 = vld [vmem:[#allocation4 + $0x28] sm:$0xff]  ;;  %v5078_v7 = vcombine.low %v2747_v25, %v2751_v26 }
 0x590   :  { %v6352_v42 = vpack.c.bf16 %v2731_v51, %v2731_v51  ;;  %v6354_v43 = vpack.c.bf16 %v2733_v35, %v2733_v35  ;;  %v2867_v16 = vld [vmem:[#allocation4 + $0x408] sm:$0xff]  ;;  %v5206_v51 = vcombine.low %v2875_v27, %v2879_v28  ;;  %v5071_v35 = vcombine.high %v2739_v33, %v2743_v34 }
 0x591   :  { %v2871_v17 = vld [vmem:[#allocation4 + $0x428] sm:$0xff]  ;;  %v5070_v41 = vcombine.low %v2739_v33, %v2743_v34 }
 0x592   :  { %4348 = vmatprep.mubr.bf16.mxu0 %v6352_v42  ;;  %4389 = vmatprep.mubr.bf16.mxu1 %v6354_v43  ;;  %v5199_v38 = vcombine.high %v2867_v16, %v2871_v17  ;;  %v2859_v39 = vld [vmem:[#allocation4 + $0x3c8] sm:$0xff]  ;;  %v5198_v46 = vcombine.low %v2867_v16, %v2871_v17 }
 0x593   :  { %4349 = vmatmul.mubr.bf16.vlgmr.msra.gmra.mxu0 %v6356_v44  ;;  %4390 = vmatmul.mubr.bf16.vlgmr.msra.gmra.mxu1 %v6358_v45  ;;  %v2863_v40 = vld [vmem:[#allocation4 + $0x3e8] sm:$0xff] }
 0x594   :  { %4399 = vmatpush1.bf16.msra.mxu0 %v5126_v18  ;;  %4440 = vmatpush1.bf16.msra.mxu1 %v5254_v19  ;;  %v2759_v18 = vld [vmem:[#allocation4 + $0xa8] sm:$0xff] }
 0x595   :  { %4430 = vmatprep.mubr.bf16.mxu0 %v6352_v42  ;;  %4471 = vmatprep.mubr.bf16.mxu1 %v6354_v43  ;;  %v2883_v19 = vld [vmem:[#allocation4 + $0x488] sm:$0xff]  ;;  %v5087_v23 = vcombine.high %v2755_v15, %v2759_v18  ;;  %v5086_v29 = vcombine.low %v2755_v15, %v2759_v18 }
 0x596   :  { %4400 = vmatprep.subr.bf16.mxu0 %v5119_v48  ;;  %4441 = vmatprep.subr.bf16.mxu1 %v5247_v49  ;;  %v5215_v24 = vcombine.high %v2883_v19, %v2887_v20  ;;  %v5214_v30 = vcombine.low %v2883_v19, %v2887_v20  ;;  %v5191_v48 = vcombine.high %v2859_v39, %v2863_v40  ;;  %v2839_v9 = vld [vmem:[#allocation4 + $0x328] sm:$0xff] }
 0x597   :  { %v5319_v49 = vcombine.high %v2987_v36, %v2991_v37  ;;  %v2963_v10 = vld [vmem:[#allocation4 + $0x708] sm:$0xff] }
 0x598   :  { %4401 = vmatpush1.bf16.msra.mxu0 %v5118_v54  ;;  %4442 = vmatpush1.bf16.msra.mxu1 %v5246_v59  ;;  %v2983_v54 = vld [vmem:[#allocation4 + $0x7a8] sm:$0xff]  ;;  %v5190_v59 = vcombine.low %v2859_v39, %v2863_v40 }
 0x599   :  { %4402 = vmatprep.subr.bf16.mxu0 %v5111_v57  ;;  %4443 = vmatprep.subr.bf16.mxu1 %v5239_v60  ;;  %v5318_v57 = vcombine.low %v2987_v36, %v2991_v37  ;;  %v5183_v60 = vcombine.high %v2851_v50, %v2855_v52  ;;  %v5311_v61 = vcombine.high %v2979_v53, %v2983_v54  ;;  %v2827_v18 = vld [vmem:[#allocation4 + $0x2c8] sm:$0xff] }
 0x59a   :  { %v2831_v19 = vld [vmem:[#allocation4 + $0x2e8] sm:$0xff] }
 0x59b   :  { %v2955_v20 = vld [vmem:[#allocation4 + $0x6c8] sm:$0xff] }
 0x59c   :  { %4403 = vmatpush1.bf16.msra.mxu0 %v5110_v1  ;;  %4444 = vmatpush1.bf16.msra.mxu1 %v5238_v2  ;;  %v2975_v1 = vld [vmem:[#allocation4 + $0x768] sm:$0xff]  ;;  %v5182_v2 = vcombine.low %v2851_v50, %v2855_v52  ;;  %v2796_v52 = vld [vmem:[#allocation4 + $0x1d0] sm:$0xff] }
 0x59d   :  { %4404 = vmatprep.subr.bf16.mxu0 %v5103_v3  ;;  %4445 = vmatprep.subr.bf16.mxu1 %v5231_v4  ;;  %v5310_v3 = vcombine.low %v2979_v53, %v2983_v54  ;;  %v5175_v4 = vcombine.high %v2843_v62, %v2847_v63  ;;  %v5303_v5 = vcombine.high %v2971_v0, %v2975_v1  ;;  %v2819_v26 = vld [vmem:[#allocation4 + $0x288] sm:$0xff]  ;;  %v2800_v53 = vld [vmem:[#allocation4 + $0x1f0] sm:$0xff] }
 0x59e   :  { %v2823_v27 = vld [vmem:[#allocation4 + $0x2a8] sm:$0xff]  ;;  %v2924_v54 = vld [vmem:[#allocation4 + $0x5d0] sm:$0xff] }
 0x59f   :  { %v2947_v28 = vld [vmem:[#allocation4 + $0x688] sm:$0xff] }
 0x5a0   :  { %4405 = vmatpush1.bf16.msra.mxu0 %v5102_v11  ;;  %4446 = vmatpush1.bf16.msra.mxu1 %v5230_v12  ;;  %v2967_v11 = vld [vmem:[#allocation4 + $0x728] sm:$0xff]  ;;  %v5174_v12 = vcombine.low %v2843_v62, %v2847_v63  ;;  %v2788_v63 = vld [vmem:[#allocation4 + $0x190] sm:$0xff] }
 0x5a1   :  { %4406 = vmatprep.subr.bf16.mxu0 %v5095_v13  ;;  %4447 = vmatprep.subr.bf16.mxu1 %v5223_v14  ;;  %v5302_v13 = vcombine.low %v2971_v0, %v2975_v1  ;;  %v5167_v14 = vcombine.high %v2835_v8, %v2839_v9  ;;  %v5295_v15 = vcombine.high %v2963_v10, %v2967_v11  ;;  %v2811_v34 = vld [vmem:[#allocation4 + $0x248] sm:$0xff]  ;;  %v2792_v0 = vld [vmem:[#allocation4 + $0x1b0] sm:$0xff] }
 0x5a2   :  { %v2815_v16 = vld [vmem:[#allocation4 + $0x268] sm:$0xff]  ;;  %v2916_v1 = vld [vmem:[#allocation4 + $0x590] sm:$0xff] }
 0x5a3   :  { %v2939_v17 = vld [vmem:[#allocation4 + $0x648] sm:$0xff] }
 0x5a4   :  { %4407 = vmatpush1.bf16.msra.mxu0 %v5094_v21  ;;  %4448 = vmatpush1.bf16.msra.mxu1 %v5222_v22  ;;  %v2959_v21 = vld [vmem:[#allocation4 + $0x6e8] sm:$0xff]  ;;  %v5166_v22 = vcombine.low %v2835_v8, %v2839_v9  ;;  %v2780_v9 = vld [vmem:[#allocation4 + $0x150] sm:$0xff] }
 0x5a5   :  { %4408 = vmatprep.subr.bf16.mxu0 %v5087_v23  ;;  %4449 = vmatprep.subr.bf16.mxu1 %v5215_v24  ;;  %v5294_v23 = vcombine.low %v2963_v10, %v2967_v11  ;;  %v5159_v24 = vcombine.high %v2827_v18, %v2831_v19  ;;  %v5287_v25 = vcombine.high %v2955_v20, %v2959_v21  ;;  %v2803_v40 = vld [vmem:[#allocation4 + $0x208] sm:$0xff]  ;;  %v2784_v10 = vld [vmem:[#allocation4 + $0x170] sm:$0xff] }
 0x5a6   :  { %v2807_v36 = vld [vmem:[#allocation4 + $0x228] sm:$0xff]  ;;  %v2908_v11 = vld [vmem:[#allocation4 + $0x550] sm:$0xff] }
 0x5a7   :  { %v2931_v37 = vld [vmem:[#allocation4 + $0x608] sm:$0xff] }
 0x5a8   :  { %4409 = vmatpush1.bf16.msra.mxu0 %v5086_v29  ;;  %4450 = vmatpush1.bf16.msra.mxu1 %v5214_v30  ;;  %v2951_v29 = vld [vmem:[#allocation4 + $0x6a8] sm:$0xff]  ;;  %v5158_v30 = vcombine.low %v2827_v18, %v2831_v19  ;;  %v2772_v19 = vld [vmem:[#allocation4 + $0x110] sm:$0xff] }
 0x5a9   :  { %4410 = vmatprep.subr.bf16.mxu0 %v5079_v31  ;;  %4451 = vmatprep.subr.bf16.mxu1 %v5207_v32  ;;  %v5286_v31 = vcombine.low %v2955_v20, %v2959_v21  ;;  %v5151_v32 = vcombine.high %v2819_v26, %v2823_v27  ;;  %v5279_v33 = vcombine.high %v2947_v28, %v2951_v29  ;;  %v2776_v20 = vld [vmem:[#allocation4 + $0x130] sm:$0xff] }
 0x5aa   :  { %v2900_v21 = vld [vmem:[#allocation4 + $0x510] sm:$0xff] }
 0x5ac   :  { %4411 = vmatpush1.bf16.msra.mxu0 %v5078_v7  ;;  %4452 = vmatpush1.bf16.msra.mxu1 %v5206_v51  ;;  %v2943_v7 = vld [vmem:[#allocation4 + $0x668] sm:$0xff]  ;;  %v5150_v51 = vcombine.low %v2819_v26, %v2823_v27  ;;  %v2764_v27 = vld [vmem:[#allocation4 + $0xd0] sm:$0xff] }
 0x5ad   :  { %4412 = vmatprep.subr.bf16.mxu0 %v5071_v35  ;;  %4453 = vmatprep.subr.bf16.mxu1 %v5199_v38  ;;  %v5278_v35 = vcombine.low %v2947_v28, %v2951_v29  ;;  %v5143_v38 = vcombine.high %v2811_v34, %v2815_v16  ;;  %v5271_v39 = vcombine.high %v2939_v17, %v2943_v7  ;;  %v2768_v28 = vld [vmem:[#allocation4 + $0xf0] sm:$0xff] }
 0x5ae   :  { %v2892_v29 = vld [vmem:[#allocation4 + $0x4d0] sm:$0xff] }
 0x5b0   :  { %4413 = vmatpush1.bf16.msra.mxu0 %v5070_v41  ;;  %4454 = vmatpush1.bf16.msra.mxu1 %v5198_v46  ;;  %v2935_v41 = vld [vmem:[#allocation4 + $0x628] sm:$0xff]  ;;  %v5142_v46 = vcombine.low %v2811_v34, %v2815_v16  ;;  %v2756_v16 = vld [vmem:[#allocation4 + $0x90] sm:$0xff] }
 0x5b1   :  { %4414 = vmatprep.subr.bf16.mxu0 %v5191_v48  ;;  %4455 = vmatprep.subr.bf16.mxu1 %v5319_v49  ;;  %v5270_v48 = vcombine.low %v2939_v17, %v2943_v7  ;;  %v5135_v49 = vcombine.high %v2803_v40, %v2807_v36  ;;  %v5263_v50 = vcombine.high %v2931_v37, %v2935_v41  ;;  %v2760_v17 = vld [vmem:[#allocation4 + $0xb0] sm:$0xff] }
 0x5b2   :  { %v2884_v7 = vld [vmem:[#allocation4 + $0x490] sm:$0xff] }
 0x5b4   :  { %4415 = vmatpush2.bf16.msra.mxu0 %v5190_v59  ;;  %4456 = vmatpush2.bf16.msra.mxu1 %v5318_v57  ;;  %v2928_v59 = vld [vmem:[#allocation4 + $0x5f0] sm:$0xff]  ;;  %v5134_v57 = vcombine.low %v2803_v40, %v2807_v36 }
 0x5b5   :  { %4416 = vmatprep.subr.bf16.mxu0 %v5183_v60  ;;  %4457 = vmatprep.subr.bf16.mxu1 %v5311_v61  ;;  %v5262_v60 = vcombine.low %v2931_v37, %v2935_v41  ;;  %v5129_v61 = vcombine.high %v2796_v52, %v2800_v53  ;;  %v5257_v62 = vcombine.high %v2924_v54, %v2928_v59  ;;  %v2748_v36 = vld [vmem:[#allocation4 + $0x50] sm:$0xff] }
 0x5b6   :  { %v2752_v37 = vld [vmem:[#allocation4 + $0x70] sm:$0xff] }
 0x5b7   :  { %v2876_v41 = vld [vmem:[#allocation4 + $0x450] sm:$0xff] }
 0x5b8   :  { %4417 = vmatpush2.bf16.msra.mxu0 %v5182_v2  ;;  %4458 = vmatpush2.bf16.msra.mxu1 %v5310_v3  ;;  %v2920_v2 = vld [vmem:[#allocation4 + $0x5b0] sm:$0xff]  ;;  %v5128_v3 = vcombine.low %v2796_v52, %v2800_v53 }
 0x5b9   :  { %4418 = vmatprep.subr.bf16.mxu0 %v5175_v4  ;;  %4459 = vmatprep.subr.bf16.mxu1 %v5303_v5  ;;  %v5256_v4 = vcombine.low %v2924_v54, %v2928_v59  ;;  %v5121_v5 = vcombine.high %v2788_v63, %v2792_v0  ;;  %v5249_v8 = vcombine.high %v2916_v1, %v2920_v2  ;;  %v2740_v53 = vld [vmem:[#allocation4 + $0x10] sm:$0xff] }
 0x5ba   :  { %v2744_v54 = vld [vmem:[#allocation4 + $0x30] sm:$0xff] }
 0x5bb   :  { %v2868_v59 = vld [vmem:[#allocation4 + $0x410] sm:$0xff] }
 0x5bc   :  { %4419 = vmatpush2.bf16.msra.mxu0 %v5174_v12  ;;  %4460 = vmatpush2.bf16.msra.mxu1 %v5302_v13  ;;  %v2912_v12 = vld [vmem:[#allocation4 + $0x570] sm:$0xff]  ;;  %v5120_v13 = vcombine.low %v2788_v63, %v2792_v0 }
 0x5bd   :  { %4420 = vmatprep.subr.bf16.mxu0 %v5167_v14  ;;  %4461 = vmatprep.subr.bf16.mxu1 %v5295_v15  ;;  %v5248_v14 = vcombine.low %v2916_v1, %v2920_v2  ;;  %v5113_v15 = vcombine.high %v2780_v9, %v2784_v10  ;;  %v5241_v18 = vcombine.high %v2908_v11, %v2912_v12  ;;  %v2860_v0 = vld [vmem:[#allocation4 + $0x3d0] sm:$0xff] }
 0x5be   :  { %v2864_v1 = vld [vmem:[#allocation4 + $0x3f0] sm:$0xff] }
 0x5bf   :  { %v2988_v2 = vld [vmem:[#allocation4 + $0x7d0] sm:$0xff] }
 0x5c0   :  { %4421 = vmatpush2.bf16.msra.mxu0 %v5166_v22  ;;  %4462 = vmatpush2.bf16.msra.mxu1 %v5294_v23  ;;  %v2904_v22 = vld [vmem:[#allocation4 + $0x530] sm:$0xff]  ;;  %v5112_v23 = vcombine.low %v2780_v9, %v2784_v10 }
 0x5c1   :  { %4422 = vmatprep.subr.bf16.mxu0 %v5159_v24  ;;  %4463 = vmatprep.subr.bf16.mxu1 %v5287_v25  ;;  %v5240_v24 = vcombine.low %v2908_v11, %v2912_v12  ;;  %v5105_v25 = vcombine.high %v2772_v19, %v2776_v20  ;;  %v5233_v26 = vcombine.high %v2900_v21, %v2904_v22  ;;  %v2852_v10 = vld [vmem:[#allocation4 + $0x390] sm:$0xff] }
 0x5c2   :  { %v2856_v11 = vld [vmem:[#allocation4 + $0x3b0] sm:$0xff] }
 0x5c3   :  { %v2980_v12 = vld [vmem:[#allocation4 + $0x790] sm:$0xff] }
 0x5c4   :  { %4423 = vmatpush2.bf16.msra.mxu0 %v5158_v30  ;;  %4464 = vmatpush2.bf16.msra.mxu1 %v5286_v31  ;;  %v2896_v30 = vld [vmem:[#allocation4 + $0x4f0] sm:$0xff]  ;;  %v5104_v31 = vcombine.low %v2772_v19, %v2776_v20 }
 0x5c5   :  { %4424 = vmatprep.subr.bf16.mxu0 %v5151_v32  ;;  %4465 = vmatprep.subr.bf16.mxu1 %v5279_v33  ;;  %v5232_v32 = vcombine.low %v2900_v21, %v2904_v22  ;;  %v5097_v33 = vcombine.high %v2764_v27, %v2768_v28  ;;  %v5225_v34 = vcombine.high %v2892_v29, %v2896_v30  ;;  %v2844_v20 = vld [vmem:[#allocation4 + $0x350] sm:$0xff] }
 0x5c6   :  { %v2848_v21 = vld [vmem:[#allocation4 + $0x370] sm:$0xff] }
 0x5c7   :  { %v2972_v22 = vld [vmem:[#allocation4 + $0x750] sm:$0xff] }
 0x5c8   :  { %4425 = vmatpush2.bf16.msra.mxu0 %v5150_v51  ;;  %4466 = vmatpush2.bf16.msra.mxu1 %v5278_v35  ;;  %v2888_v51 = vld [vmem:[#allocation4 + $0x4b0] sm:$0xff]  ;;  %v5096_v35 = vcombine.low %v2764_v27, %v2768_v28 }
 0x5c9   :  { %4426 = vmatprep.subr.bf16.mxu0 %v5143_v38  ;;  %4467 = vmatprep.subr.bf16.mxu1 %v5271_v39  ;;  %v5224_v38 = vcombine.low %v2892_v29, %v2896_v30  ;;  %v5089_v39 = vcombine.high %v2756_v16, %v2760_v17  ;;  %v5217_v40 = vcombine.high %v2884_v7, %v2888_v51  ;;  %v2836_v28 = vld [vmem:[#allocation4 + $0x310] sm:$0xff] }
 0x5ca   :  { %v2840_v29 = vld [vmem:[#allocation4 + $0x330] sm:$0xff] }
 0x5cb   :  { %v2964_v30 = vld [vmem:[#allocation4 + $0x710] sm:$0xff] }
 0x5cc   :  { %4427 = vmatpush2.bf16.msra.mxu0 %v5142_v46  ;;  %4468 = vmatpush2.bf16.msra.mxu1 %v5270_v48  ;;  %v2880_v46 = vld [vmem:[#allocation4 + $0x470] sm:$0xff]  ;;  %v5088_v48 = vcombine.low %v2756_v16, %v2760_v17 }
 0x5cd   :  { %4428 = vmatprep.subr.bf16.mxu0 %v5135_v49  ;;  %4469 = vmatprep.subr.bf16.mxu1 %v5263_v50  ;;  %v5216_v49 = vcombine.low %v2884_v7, %v2888_v51  ;;  %v5081_v50 = vcombine.high %v2748_v36, %v2752_v37  ;;  %v5209_v52 = vcombine.high %v2876_v41, %v2880_v46  ;;  %v2828_v17 = vld [vmem:[#allocation4 + $0x2d0] sm:$0xff] }
 0x5ce   :  { %v2832_v7 = vld [vmem:[#allocation4 + $0x2f0] sm:$0xff] }
 0x5cf   :  { %v2956_v51 = vld [vmem:[#allocation4 + $0x6d0] sm:$0xff] }
 0x5d0   :  { %4429 = vmatpush2.bf16.msra.mxu0 %v5134_v57  ;;  %4470 = vmatpush2.bf16.msra.mxu1 %v5262_v60  ;;  %v2872_v57 = vld [vmem:[#allocation4 + $0x430] sm:$0xff]  ;;  %v5080_v60 = vcombine.low %v2748_v36, %v2752_v37 }
 0x5d1   :  { %4480 = vmatprep.subr.bf16.mxu0 %v5129_v61  ;;  %4521 = vmatprep.subr.bf16.mxu1 %v5257_v62  ;;  %v5208_v61 = vcombine.low %v2876_v41, %v2880_v46  ;;  %v5073_v62 = vcombine.high %v2740_v53, %v2744_v54  ;;  %v5201_v63 = vcombine.high %v2868_v59, %v2872_v57  ;;  %v2820_v37 = vld [vmem:[#allocation4 + $0x290] sm:$0xff] }
 0x5d2   :  { %v2824_v41 = vld [vmem:[#allocation4 + $0x2b0] sm:$0xff] }
 0x5d3   :  { %4431 = vmatmul.mubr.bf16.vlgmr.msra.gmra.mxu0 %v6356_v44  ;;  %4472 = vmatmul.mubr.bf16.vlgmr.msra.gmra.mxu1 %v6358_v45  ;;  %v2948_v46 = vld [vmem:[#allocation4 + $0x690] sm:$0xff] }
 0x5d4   :  { %4481 = vmatpush1.bf16.msra.mxu0 %v5128_v3  ;;  %4512 = vmatprep.mubr.bf16.mxu0 %v6352_v42  ;;  %v2992_v3 = vld [vmem:[#allocation4 + $0x7f0] sm:$0xff] }
 0x5d5   :  { %4522 = vmatpush1.bf16.msra.mxu1 %v5256_v4  ;;  %4553 = vmatprep.mubr.bf16.mxu1 %v6354_v43  ;;  %v5072_v4 = vcombine.low %v2740_v53, %v2744_v54  ;;  %v5321_v9 = vcombine.high %v2988_v2, %v2992_v3  ;;  %v2812_v54 = vld [vmem:[#allocation4 + $0x250] sm:$0xff] }
 0x5d6   :  { %4482 = vmatprep.subr.bf16.mxu0 %v5121_v5  ;;  %4523 = vmatprep.subr.bf16.mxu1 %v5249_v8  ;;  %v5200_v5 = vcombine.low %v2868_v59, %v2872_v57  ;;  %v5193_v8 = vcombine.high %v2860_v0, %v2864_v1  ;;  %v2816_v59 = vld [vmem:[#allocation4 + $0x270] sm:$0xff] }
 0x5d7   :  { %v2940_v57 = vld [vmem:[#allocation4 + $0x650] sm:$0xff] }
 0x5d8   :  { %4483 = vmatpush1.bf16.msra.mxu0 %v5120_v13  ;;  %v2984_v13 = vld [vmem:[#allocation4 + $0x7b0] sm:$0xff] }
 0x5d9   :  { %4524 = vmatpush1.bf16.msra.mxu1 %v5248_v14  ;;  %4484 = vmatprep.subr.bf16.mxu0 %v5113_v15  ;;  %v5192_v14 = vcombine.low %v2860_v0, %v2864_v1  ;;  %v5320_v15 = vcombine.low %v2988_v2, %v2992_v3  ;;  %v5313_v19 = vcombine.high %v2980_v12, %v2984_v13  ;;  %v2804_v1 = vld [vmem:[#allocation4 + $0x210] sm:$0xff] }
 0x5da   :  { %4525 = vmatprep.subr.bf16.mxu1 %v5241_v18  ;;  %v5185_v18 = vcombine.high %v2852_v10, %v2856_v11  ;;  %v2808_v2 = vld [vmem:[#allocation4 + $0x230] sm:$0xff] }
 0x5db   :  { %v2932_v3 = vld [vmem:[#allocation4 + $0x610] sm:$0xff] }
 0x5dc   :  { %4485 = vmatpush1.bf16.msra.mxu0 %v5112_v23  ;;  %v2976_v23 = vld [vmem:[#allocation4 + $0x770] sm:$0xff] }
 0x5dd   :  { %4526 = vmatpush1.bf16.msra.mxu1 %v5240_v24  ;;  %4486 = vmatprep.subr.bf16.mxu0 %v5105_v25  ;;  %v5184_v24 = vcombine.low %v2852_v10, %v2856_v11  ;;  %v5312_v25 = vcombine.low %v2980_v12, %v2984_v13  ;;  %v5305_v27 = vcombine.high %v2972_v22, %v2976_v23  ;;  %v2797_v11 = vld [vmem:[#allocation4 + $0x1d8] sm:$0xff] }
 0x5de   :  { %4527 = vmatprep.subr.bf16.mxu1 %v5233_v26  ;;  %v5177_v26 = vcombine.high %v2844_v20, %v2848_v21  ;;  %v2801_v12 = vld [vmem:[#allocation4 + $0x1f8] sm:$0xff] }
 0x5df   :  { %v2925_v13 = vld [vmem:[#allocation4 + $0x5d8] sm:$0xff] }
 0x5e0   :  { %4487 = vmatpush1.bf16.msra.mxu0 %v5104_v31  ;;  %v2968_v31 = vld [vmem:[#allocation4 + $0x730] sm:$0xff] }
 0x5e1   :  { %4528 = vmatpush1.bf16.msra.mxu1 %v5232_v32  ;;  %4488 = vmatprep.subr.bf16.mxu0 %v5097_v33  ;;  %v5176_v32 = vcombine.low %v2844_v20, %v2848_v21  ;;  %v5304_v33 = vcombine.low %v2972_v22, %v2976_v23  ;;  %v5297_v16 = vcombine.high %v2964_v30, %v2968_v31  ;;  %v2789_v21 = vld [vmem:[#allocation4 + $0x198] sm:$0xff] }
 0x5e2   :  { %4529 = vmatprep.subr.bf16.mxu1 %v5225_v34  ;;  %v5169_v34 = vcombine.high %v2836_v28, %v2840_v29  ;;  %v2793_v22 = vld [vmem:[#allocation4 + $0x1b8] sm:$0xff]  ;;  %v5130_v23 = vcombine.low %v2797_v11, %v2801_v12 }
 0x5e4   :  { %4489 = vmatpush1.bf16.msra.mxu0 %v5096_v35  ;;  %v2960_v35 = vld [vmem:[#allocation4 + $0x6f0] sm:$0xff] }
 0x5e5   :  { %4530 = vmatpush1.bf16.msra.mxu1 %v5224_v38  ;;  %4490 = vmatprep.subr.bf16.mxu0 %v5089_v39  ;;  %v5168_v38 = vcombine.low %v2836_v28, %v2840_v29  ;;  %v5296_v39 = vcombine.low %v2964_v30, %v2968_v31  ;;  %v5289_v36 = vcombine.high %v2956_v51, %v2960_v35  ;;  %v2781_v28 = vld [vmem:[#allocation4 + $0x158] sm:$0xff] }
 0x5e6   :  { %4531 = vmatprep.subr.bf16.mxu1 %v5217_v40  ;;  %v5161_v40 = vcombine.high %v2828_v17, %v2832_v7  ;;  %v2785_v29 = vld [vmem:[#allocation4 + $0x178] sm:$0xff] }
 0x5e7   :  { %v2909_v31 = vld [vmem:[#allocation4 + $0x558] sm:$0xff] }
 0x5e8   :  { %4491 = vmatpush1.bf16.msra.mxu0 %v5088_v48  ;;  %v2952_v48 = vld [vmem:[#allocation4 + $0x6b0] sm:$0xff] }
 0x5e9   :  { %4532 = vmatpush1.bf16.msra.mxu1 %v5216_v49  ;;  %4492 = vmatprep.subr.bf16.mxu0 %v5081_v50  ;;  %v5160_v49 = vcombine.low %v2828_v17, %v2832_v7  ;;  %v5288_v50 = vcombine.low %v2956_v51, %v2960_v35  ;;  %v5281_v53 = vcombine.high %v2948_v46, %v2952_v48  ;;  %v2773_v7 = vld [vmem:[#allocation4 + $0x118] sm:$0xff] }
 0x5ea   :  { %4533 = vmatprep.subr.bf16.mxu1 %v5209_v52  ;;  %v5153_v52 = vcombine.high %v2820_v37, %v2824_v41  ;;  %v2777_v51 = vld [vmem:[#allocation4 + $0x138] sm:$0xff] }
 0x5eb   :  { %v2901_v35 = vld [vmem:[#allocation4 + $0x518] sm:$0xff] }
 0x5ec   :  { %4493 = vmatpush1.bf16.msra.mxu0 %v5080_v60  ;;  %v2944_v60 = vld [vmem:[#allocation4 + $0x670] sm:$0xff] }
 0x5ed   :  { %4534 = vmatpush1.bf16.msra.mxu1 %v5208_v61  ;;  %4494 = vmatprep.subr.bf16.mxu0 %v5073_v62  ;;  %v5152_v61 = vcombine.low %v2820_v37, %v2824_v41  ;;  %v5280_v62 = vcombine.low %v2948_v46, %v2952_v48  ;;  %v5273_v0 = vcombine.high %v2940_v57, %v2944_v60  ;;  %v2765_v37 = vld [vmem:[#allocation4 + $0xd8] sm:$0xff] }
 0x5ee   :  { %4535 = vmatprep.subr.bf16.mxu1 %v5201_v63  ;;  %v5145_v63 = vcombine.high %v2812_v54, %v2816_v59  ;;  %v2769_v41 = vld [vmem:[#allocation4 + $0xf8] sm:$0xff] }
 0x5ef   :  { %v2893_v46 = vld [vmem:[#allocation4 + $0x4d8] sm:$0xff] }
 0x5f0   :  { %4495 = vmatpush1.bf16.msra.mxu0 %v5072_v4  ;;  %v2936_v4 = vld [vmem:[#allocation4 + $0x630] sm:$0xff]  ;;  %v2897_v48 = vld [vmem:[#allocation4 + $0x4f8] sm:$0xff] }
 0x5f1   :  { %4536 = vmatpush1.bf16.msra.mxu1 %v5200_v5  ;;  %4496 = vmatprep.subr.bf16.mxu0 %v5193_v8  ;;  %v5144_v5 = vcombine.low %v2812_v54, %v2816_v59  ;;  %v5272_v8 = vcombine.low %v2940_v57, %v2944_v60  ;;  %v5265_v10 = vcombine.high %v2932_v3, %v2936_v4  ;;  %v2761_v54 = vld [vmem:[#allocation4 + $0xb8] sm:$0xff] }
 0x5f2   :  { %4537 = vmatprep.subr.bf16.mxu1 %v5321_v9  ;;  %v5137_v9 = vcombine.high %v2804_v1, %v2808_v2  ;;  %v2885_v59 = vld [vmem:[#allocation4 + $0x498] sm:$0xff]  ;;  %v5098_v60 = vcombine.low %v2765_v37, %v2769_v41 }
 0x5f3   :  { %v2889_v57 = vld [vmem:[#allocation4 + $0x4b8] sm:$0xff] }
 0x5f4   :  { %4497 = vmatpush2.bf16.msra.mxu0 %v5192_v14  ;;  %v2929_v14 = vld [vmem:[#allocation4 + $0x5f8] sm:$0xff] }
 0x5f5   :  { %4538 = vmatpush2.bf16.msra.mxu1 %v5320_v15  ;;  %4498 = vmatprep.subr.bf16.mxu0 %v5185_v18  ;;  %v5136_v15 = vcombine.low %v2804_v1, %v2808_v2  ;;  %v5264_v18 = vcombine.low %v2932_v3, %v2936_v4  ;;  %v5259_v20 = vcombine.high %v2925_v13, %v2929_v14  ;;  %v2753_v1 = vld [vmem:[#allocation4 + $0x78] sm:$0xff] }
 0x5f6   :  { %4539 = vmatprep.subr.bf16.mxu1 %v5313_v19  ;;  %v5131_v19 = vcombine.high %v2797_v11, %v2801_v12  ;;  %v2877_v2 = vld [vmem:[#allocation4 + $0x458] sm:$0xff] }
 0x5f7   :  { %v2881_v3 = vld [vmem:[#allocation4 + $0x478] sm:$0xff] }
 0x5f8   :  { %4499 = vmatpush2.bf16.msra.mxu0 %v5184_v24  ;;  %v2917_v24 = vld [vmem:[#allocation4 + $0x598] sm:$0xff] }
 0x5f9   :  { %4540 = vmatpush2.bf16.msra.mxu1 %v5312_v25  ;;  %4500 = vmatprep.subr.bf16.mxu0 %v5177_v26  ;;  %v2921_v25 = vld [vmem:[#allocation4 + $0x5b8] sm:$0xff]  ;;  %v5258_v26 = vcombine.low %v2925_v13, %v2929_v14 }
 0x5fa   :  { %4541 = vmatprep.subr.bf16.mxu1 %v5305_v27  ;;  %v5123_v27 = vcombine.high %v2789_v21, %v2793_v22  ;;  %v5251_v30 = vcombine.high %v2917_v24, %v2921_v25  ;;  %v2745_v11 = vld [vmem:[#allocation4 + $0x38] sm:$0xff] }
 0x5fb   :  { %v2869_v12 = vld [vmem:[#allocation4 + $0x418] sm:$0xff] }
 0x5fc   :  { %4501 = vmatpush2.bf16.msra.mxu0 %v5176_v32  ;;  %v2913_v32 = vld [vmem:[#allocation4 + $0x578] sm:$0xff] }
 0x5fd   :  { %4542 = vmatpush2.bf16.msra.mxu1 %v5304_v33  ;;  %4502 = vmatprep.subr.bf16.mxu0 %v5169_v34  ;;  %v5122_v33 = vcombine.low %v2789_v21, %v2793_v22  ;;  %v5250_v34 = vcombine.low %v2917_v24, %v2921_v25  ;;  %v5243_v17 = vcombine.high %v2909_v31, %v2913_v32  ;;  %v2873_v13 = vld [vmem:[#allocation4 + $0x438] sm:$0xff] }
 0x5fe   :  { %4543 = vmatprep.subr.bf16.mxu1 %v5297_v16  ;;  %v5115_v16 = vcombine.high %v2781_v28, %v2785_v29  ;;  %v2865_v21 = vld [vmem:[#allocation4 + $0x3f8] sm:$0xff]  ;;  %v5202_v25 = vcombine.low %v2869_v12, %v2873_v13 }
 0x5ff   :  { %v2989_v22 = vld [vmem:[#allocation4 + $0x7d8] sm:$0xff] }
 0x600   :  { %4503 = vmatpush2.bf16.msra.mxu0 %v5168_v38  ;;  %v2905_v38 = vld [vmem:[#allocation4 + $0x538] sm:$0xff] }
 0x601   :  { %4544 = vmatpush2.bf16.msra.mxu1 %v5296_v39  ;;  %4504 = vmatprep.subr.bf16.mxu0 %v5161_v40  ;;  %v5114_v39 = vcombine.low %v2781_v28, %v2785_v29  ;;  %v5242_v40 = vcombine.low %v2909_v31, %v2913_v32  ;;  %v2853_v28 = vld [vmem:[#allocation4 + $0x398] sm:$0xff] }
 0x602   :  { %4545 = vmatprep.subr.bf16.mxu1 %v5289_v36  ;;  %v5107_v36 = vcombine.high %v2773_v7, %v2777_v51  ;;  %v2857_v29 = vld [vmem:[#allocation4 + $0x3b8] sm:$0xff] }
 0x603   :  { %v2985_v31 = vld [vmem:[#allocation4 + $0x7b8] sm:$0xff] }
 0x604   :  { %4505 = vmatpush2.bf16.msra.mxu0 %v5160_v49  ;;  %v5234_v49 = vcombine.low %v2901_v35, %v2905_v38 }
 0x605   :  { %4546 = vmatpush2.bf16.msra.mxu1 %v5288_v50  ;;  %4506 = vmatprep.subr.bf16.mxu0 %v5153_v52  ;;  %v5099_v50 = vcombine.high %v2765_v37, %v2769_v41  ;;  %v5227_v52 = vcombine.high %v2893_v46, %v2897_v48  ;;  %v2841_v37 = vld [vmem:[#allocation4 + $0x338] sm:$0xff] }
 0x606   :  { %4547 = vmatprep.subr.bf16.mxu1 %v5281_v53  ;;  %v2757_v53 = vld [vmem:[#allocation4 + $0x98] sm:$0xff] }
 0x607   :  { %v5090_v4 = vcombine.low %v2757_v53, %v2761_v54  ;;  %v2965_v41 = vld [vmem:[#allocation4 + $0x718] sm:$0xff] }
 0x608   :  { %4507 = vmatpush2.bf16.msra.mxu0 %v5152_v61  ;;  %v5226_v61 = vcombine.low %v2893_v46, %v2897_v48  ;;  %v2969_v46 = vld [vmem:[#allocation4 + $0x738] sm:$0xff] }
 0x609   :  { %4548 = vmatpush2.bf16.msra.mxu1 %v5280_v62  ;;  %4508 = vmatprep.subr.bf16.mxu0 %v5145_v63  ;;  %v5091_v62 = vcombine.high %v2757_v53, %v2761_v54  ;;  %v5219_v63 = vcombine.high %v2885_v59, %v2889_v57  ;;  %v2833_v53 = vld [vmem:[#allocation4 + $0x2f8] sm:$0xff] }
 0x60a   :  { %4549 = vmatprep.subr.bf16.mxu1 %v5273_v0  ;;  %v2749_v0 = vld [vmem:[#allocation4 + $0x58] sm:$0xff] }
 0x60b   :  { %v5082_v14 = vcombine.low %v2749_v0, %v2753_v1  ;;  %v2957_v54 = vld [vmem:[#allocation4 + $0x6d8] sm:$0xff] }
 0x60c   :  { %4509 = vmatpush2.bf16.msra.mxu0 %v5144_v5  ;;  %v5218_v5 = vcombine.low %v2885_v59, %v2889_v57  ;;  %v2961_v59 = vld [vmem:[#allocation4 + $0x6f8] sm:$0xff] }
 0x60d   :  { %4550 = vmatpush2.bf16.msra.mxu1 %v5272_v8  ;;  %4510 = vmatprep.subr.bf16.mxu0 %v5137_v9  ;;  %v5083_v8 = vcombine.high %v2749_v0, %v2753_v1  ;;  %v5211_v9 = vcombine.high %v2877_v2, %v2881_v3  ;;  %v2825_v0 = vld [vmem:[#allocation4 + $0x2b8] sm:$0xff] }
 0x60e   :  { %4551 = vmatprep.subr.bf16.mxu1 %v5265_v10  ;;  %v2741_v10 = vld [vmem:[#allocation4 + $0x18] sm:$0xff] }
 0x60f   :  { %v5074_v24 = vcombine.low %v2741_v10, %v2745_v11  ;;  %v2949_v1 = vld [vmem:[#allocation4 + $0x698] sm:$0xff] }
 0x610   :  { %4511 = vmatpush2.bf16.msra.mxu0 %v5136_v15  ;;  %v5210_v15 = vcombine.low %v2877_v2, %v2881_v3  ;;  %v2953_v2 = vld [vmem:[#allocation4 + $0x6b8] sm:$0xff] }
 0x611   :  { %4552 = vmatpush2.bf16.msra.mxu1 %v5264_v18  ;;  %4562 = vmatprep.subr.bf16.mxu0 %v5131_v19  ;;  %v5075_v18 = vcombine.high %v2741_v10, %v2745_v11  ;;  %v5203_v19 = vcombine.high %v2869_v12, %v2873_v13  ;;  %v2817_v10 = vld [vmem:[#allocation4 + $0x278] sm:$0xff] }
 0x612   :  { %4603 = vmatprep.subr.bf16.mxu1 %v5259_v20  ;;  %v2861_v20 = vld [vmem:[#allocation4 + $0x3d8] sm:$0xff] }
 0x613   :  { %4513 = vmatmul.mubr.bf16.vlgmr.msra.gmra.mxu0 %v6356_v44  ;;  %v5194_v32 = vcombine.low %v2861_v20, %v2865_v21  ;;  %v2941_v11 = vld [vmem:[#allocation4 + $0x658] sm:$0xff] }
 0x614   :  { %4554 = vmatmul.mubr.bf16.vlgmr.msra.gmra.mxu1 %v6358_v45  ;;  %4563 = vmatpush1.bf16.msra.mxu0 %v5130_v23  ;;  %v2993_v23 = vld [vmem:[#allocation4 + $0x7f8] sm:$0xff] }
 0x615   :  { %4594 = vmatprep.mubr.bf16.mxu0 %v6352_v42  ;;  %4604 = vmatpush1.bf16.msra.mxu1 %v5258_v26  ;;  %v5235_v42 = vcombine.high %v2901_v35, %v2905_v38  ;;  %v5195_v26 = vcombine.high %v2861_v20, %v2865_v21  ;;  %v2977_v35 = vld [vmem:[#allocation4 + $0x778] sm:$0xff]  ;;  %v5186_v38 = vcombine.low %v2853_v28, %v2857_v29 }
 0x616   :  { %4635 = vmatprep.mubr.bf16.mxu1 %v6354_v43  ;;  %4564 = vmatprep.subr.bf16.mxu0 %v5123_v27  ;;  %v5106_v43 = vcombine.low %v2773_v7, %v2777_v51  ;;  %v5323_v27 = vcombine.high %v2989_v22, %v2993_v23  ;;  %v2849_v7 = vld [vmem:[#allocation4 + $0x378] sm:$0xff] }
 0x617   :  { %4605 = vmatprep.subr.bf16.mxu1 %v5251_v30  ;;  %v2981_v30 = vld [vmem:[#allocation4 + $0x798] sm:$0xff] }
 0x618   :  { %4565 = vmatpush1.bf16.msra.mxu0 %v5122_v33  ;;  %v5322_v33 = vcombine.low %v2989_v22, %v2993_v23  ;;  %v2973_v51 = vld [vmem:[#allocation4 + $0x758] sm:$0xff] }
 0x619   :  { %4606 = vmatpush1.bf16.msra.mxu1 %v5250_v34  ;;  %4566 = vmatprep.subr.bf16.mxu0 %v5115_v16  ;;  %v5187_v34 = vcombine.high %v2853_v28, %v2857_v29  ;;  %v5315_v16 = vcombine.high %v2981_v30, %v2985_v31  ;;  %v2945_v12 = vld [vmem:[#allocation4 + $0x678] sm:$0xff]  ;;  %v6377_v29 = vld [vmem:[%s6422_s13] sm:$0xff] }
 0x61a   :  { %4607 = vmatprep.subr.bf16.mxu1 %v5243_v17  ;;  %v2845_v17 = vld [vmem:[#allocation4 + $0x358] sm:$0xff] }
 0x61b   :  { %v5178_v48 = vcombine.low %v2845_v17, %v2849_v7  ;;  %v2809_v20 = vld [vmem:[#allocation4 + $0x238] sm:$0xff] }
 0x61c   :  { %4567 = vmatpush1.bf16.msra.mxu0 %v5114_v39  ;;  %v5314_v39 = vcombine.low %v2981_v30, %v2985_v31  ;;  %v2933_v21 = vld [vmem:[#allocation4 + $0x618] sm:$0xff]  ;;  %v2999_v30 = vrot.slane %v6377_v29, %v6201_v56  ;;  %v3003_v31 = vrot.slane %v6377_v29, %v6207_v58 }
 0x61d   :  { %4608 = vmatpush1.bf16.msra.mxu1 %v5242_v40  ;;  %4568 = vmatprep.subr.bf16.mxu0 %v5107_v36  ;;  %v5179_v40 = vcombine.high %v2845_v17, %v2849_v7  ;;  %v5307_v36 = vcombine.high %v2973_v51, %v2977_v35  ;;  %v2937_v22 = vld [vmem:[#allocation4 + $0x638] sm:$0xff] }
 0x61e   :  { %4609 = vmatprep.subr.bf16.mxu1 %v5235_v42  ;;  %v2837_v42 = vld [vmem:[#allocation4 + $0x318] sm:$0xff]  ;;  %v5266_v28 = vcombine.low %v2933_v21, %v2937_v22 }
 0x61f   :  { %v5170_v57 = vcombine.low %v2837_v42, %v2841_v37 }
 0x620   :  { %4569 = vmatpush1.bf16.msra.mxu0 %v5106_v43  ;;  %v5306_v43 = vcombine.low %v2973_v51, %v2977_v35 }
 0x621   :  { %4610 = vmatpush1.bf16.msra.mxu1 %v5234_v49  ;;  %4570 = vmatprep.subr.bf16.mxu0 %v5099_v50  ;;  %v5171_v49 = vcombine.high %v2837_v42, %v2841_v37  ;;  %v5299_v50 = vcombine.high %v2965_v41, %v2969_v46 }
 0x622   :  { %4611 = vmatprep.subr.bf16.mxu1 %v5227_v52  ;;  %v2829_v52 = vld [vmem:[#allocation4 + $0x2d8] sm:$0xff] }
 0x623   :  { %v5162_v3 = vcombine.low %v2829_v52, %v2833_v53 }
 0x624   :  { %4571 = vmatpush1.bf16.msra.mxu0 %v5098_v60  ;;  %v5298_v60 = vcombine.low %v2965_v41, %v2969_v46 }
 0x625   :  { %4612 = vmatpush1.bf16.msra.mxu1 %v5226_v61  ;;  %4572 = vmatprep.subr.bf16.mxu0 %v5091_v62  ;;  %v5163_v61 = vcombine.high %v2829_v52, %v2833_v53  ;;  %v5291_v62 = vcombine.high %v2957_v54, %v2961_v59 }
 0x626   :  { %4613 = vmatprep.subr.bf16.mxu1 %v5219_v63  ;;  %v2821_v63 = vld [vmem:[#allocation4 + $0x298] sm:$0xff] }
 0x627   :  { %v5154_v13 = vcombine.low %v2821_v63, %v2825_v0 }
 0x628   :  { %4573 = vmatpush1.bf16.msra.mxu0 %v5090_v4  ;;  %v5290_v4 = vcombine.low %v2957_v54, %v2961_v59 }
 0x629   :  { %4614 = vmatpush1.bf16.msra.mxu1 %v5218_v5  ;;  %4574 = vmatprep.subr.bf16.mxu0 %v5083_v8  ;;  %v5155_v5 = vcombine.high %v2821_v63, %v2825_v0  ;;  %v5283_v8 = vcombine.high %v2949_v1, %v2953_v2 }
 0x62a   :  { %4615 = vmatprep.subr.bf16.mxu1 %v5211_v9  ;;  %v2813_v9 = vld [vmem:[#allocation4 + $0x258] sm:$0xff] }
 0x62b   :  { %v5146_v23 = vcombine.low %v2813_v9, %v2817_v10 }
 0x62c   :  { %4575 = vmatpush1.bf16.msra.mxu0 %v5082_v14  ;;  %v5282_v14 = vcombine.low %v2949_v1, %v2953_v2 }
 0x62d   :  { %4616 = vmatpush1.bf16.msra.mxu1 %v5210_v15  ;;  %4576 = vmatprep.subr.bf16.mxu0 %v5075_v18  ;;  %v5147_v15 = vcombine.high %v2813_v9, %v2817_v10  ;;  %v5275_v18 = vcombine.high %v2941_v11, %v2945_v12 }
 0x62e   :  { %4617 = vmatprep.subr.bf16.mxu1 %v5203_v19  ;;  %v2805_v19 = vld [vmem:[#allocation4 + $0x218] sm:$0xff] }
 0x630   :  { %4577 = vmatpush1.bf16.msra.mxu0 %v5074_v24  ;;  %v5274_v24 = vcombine.low %v2941_v11, %v2945_v12  ;;  %v3014_v11 = vsub.s32 4, %v6198_v55  ;;  %v3018_v12 = vsub.s32 5, %v6198_v55 }
 0x631   :  { %4618 = vmatpush1.bf16.msra.mxu1 %v5202_v25  ;;  %4578 = vmatprep.subr.bf16.mxu0 %v5195_v26  ;;  %v5139_v25 = vcombine.high %v2805_v19, %v2809_v20  ;;  %v5267_v26 = vcombine.high %v2933_v21, %v2937_v22 }
 0x632   :  { %4619 = vmatprep.subr.bf16.mxu1 %v5323_v27  ;;  %v5138_v27 = vcombine.low %v2805_v19, %v2809_v20 }
 0x634   :  { %4579 = vmatpush2.bf16.msra.mxu0 %v5194_v32 }
 0x635   :  { %4620 = vmatpush2.bf16.msra.mxu1 %v5322_v33  ;;  %4580 = vmatprep.subr.bf16.mxu0 %v5187_v34 }
 0x636   :  { %4621 = vmatprep.subr.bf16.mxu1 %v5315_v16 }
 0x638   :  { %4581 = vmatpush2.bf16.msra.mxu0 %v5186_v38 }
 0x639   :  { %4622 = vmatpush2.bf16.msra.mxu1 %v5314_v39  ;;  %4582 = vmatprep.subr.bf16.mxu0 %v5179_v40 }
 0x63a   :  { %4623 = vmatprep.subr.bf16.mxu1 %v5307_v36 }
 0x63c   :  { %4583 = vmatpush2.bf16.msra.mxu0 %v5178_v48 }
 0x63d   :  { %4624 = vmatpush2.bf16.msra.mxu1 %v5306_v43  ;;  %4584 = vmatprep.subr.bf16.mxu0 %v5171_v49  ;;  %v3007_v43 = vrot.slane %v6377_v29, %v6239_v6  ;;  %v3011_v49 = vrot.slane %v6377_v29, %v6242_v47 }
 0x63e   :  { %4625 = vmatprep.subr.bf16.mxu1 %v5299_v50 }
 0x640   :  { %4585 = vmatpush2.bf16.msra.mxu0 %v5170_v57 }
 0x641   :  { %4626 = vmatpush2.bf16.msra.mxu1 %v5298_v60  ;;  %4586 = vmatprep.subr.bf16.mxu0 %v5163_v61 }
 0x642   :  { %4627 = vmatprep.subr.bf16.mxu1 %v5291_v62 }
 0x644   :  { %4587 = vmatpush2.bf16.msra.mxu0 %v5162_v3 }
 0x645   :  { %4628 = vmatpush2.bf16.msra.mxu1 %v5290_v4  ;;  %4588 = vmatprep.subr.bf16.mxu0 %v5155_v5 }
 0x646   :  { %4629 = vmatprep.subr.bf16.mxu1 %v5283_v8 }
 0x648   :  { %4589 = vmatpush2.bf16.msra.mxu0 %v5154_v13  ;;  %v3015_v13 = vrot.slane %v6377_v29, %v3014_v11 }
 0x649   :  { %4630 = vmatpush2.bf16.msra.mxu1 %v5282_v14  ;;  %4590 = vmatprep.subr.bf16.mxu0 %v5147_v15  ;;  %v3019_v14 = vrot.slane %v6377_v29, %v3018_v12 }
 0x64a   :  { %4631 = vmatprep.subr.bf16.mxu1 %v5275_v18 }
 0x64c   :  { %4591 = vmatpush2.bf16.msra.mxu0 %v5146_v23 }
 0x64d   :  { %4632 = vmatpush2.bf16.msra.mxu1 %v5274_v24  ;;  %4592 = vmatprep.subr.bf16.mxu0 %v5139_v25 }
 0x64e   :  { %4633 = vmatprep.subr.bf16.mxu1 %v5267_v26 }
 0x650   :  { %4593 = vmatpush2.bf16.msra.mxu0 %v5138_v27 }
 0x651   :  { %4634 = vmatpush2.bf16.msra.mxu1 %v5266_v28 }
 0x653   :  { %4595 = vmatmul.mubr.bf16.vlgmr.msra.gmra.mxu0 %v6356_v44  ;;  %v4350_v32 = vpop.f32.mrf.mxu0  ;;  %v4391_v33 = vpop.f32.mrf.mxu1 }
 0x654   :  { %4636 = vmatmul.mubr.bf16.vlgmr.msra.gmra.mxu1 %v6358_v45  ;;  %v4351_v34 = vadd.f32 %v4350_v32, %v2999_v30 }
 0x655   :  { %v4352_v16 = vpop.f32.mrf.mxu0  ;;  %v4393_v17 = vpop.f32.mrf.mxu1 }
 0x656   :  { %v4392_v7 = vadd.f32 %v4391_v33, %v4351_v34  ;;  %v4353_v51 = vadd.f32 %v4352_v16, %v3003_v31 }
 0x657   :  { %v4354_v35 = vpop.f32.mrf.mxu0  ;;  %v4395_v38 = vpop.f32.mrf.mxu1 }
 0x658   :  { %v5324_v39 = vmul.f32 -1.442695, %v4392_v7  ;;  %v4394_v40 = vadd.f32 %v4393_v17, %v4353_v51  ;;  %v3022_v35 = vsub.s32 6, %v6198_v55  ;;  %v3026_v38 = vsub.s32 7, %v6198_v55 }
 0x659   :  { %v4355_v56 = vpop.f32.mrf.mxu0  ;;  %v4396_v36 = vpop.f32.mrf.mxu1 }
 0x65a   :  { %5886 = vpow2.f32 %v5324_v39  ;;  %v5325_v42 = vmul.f32 -1.442695, %v4394_v40  ;;  %v3023_v39 = vrot.slane %v6377_v29, %v3022_v35  ;;  %v3027_v40 = vrot.slane %v6377_v29, %v3026_v38 }
 0x65c   :  { %5888 = vpow2.f32 %v5325_v42 }
 0x667   :  { %v5887_v58 = vpop.eup %5886 }
 0x668   :  { %v4668_v44 = vadd.f32 1.0, %v5887_v58 }
 0x669   :  { %v5889_v37 = vpop.eup %5888 }
 0x66a   :  { %v4669_v41 = vadd.f32 1.0, %v5889_v37  ;;  %5890 = vrcp.f32 %v4668_v44 }
 0x66c   :  { %5892 = vrcp.f32 %v4669_v41 }
 0x677   :  { %v5891_v45 = vpop.eup %5890 }
 0x679   :  { %v5893_v46 = vpop.eup %5892 }
 0x67a   :  { %v5336_v48 = vpack.c.bf16 %v5893_v46, %v5891_v45 }
 0x67c   :  { %4724 = vst [vmem:[%s6423_s14] sm:$0xff] %v5336_v48 }
 0x693   :  { %v4432_v50 = vpop.f32.mrf.mxu0  ;;  %v4473_v52 = vpop.f32.mrf.mxu1 }
 0x694   :  { %v4433_v53 = vadd.f32 %v4432_v50, %v3007_v43 }
 0x695   :  { %v4434_v54 = vpop.f32.mrf.mxu0  ;;  %v4475_v59 = vpop.f32.mrf.mxu1 }
 0x696   :  { %v4474_v57 = vadd.f32 %v4473_v52, %v4433_v53  ;;  %v4435_v60 = vadd.f32 %v4434_v54, %v3011_v49 }
 0x697   :  { %v4436_v61 = vpop.f32.mrf.mxu0  ;;  %v4477_v62 = vpop.f32.mrf.mxu1 }
 0x698   :  { %v5326_v63 = vmul.f32 -1.442695, %v4474_v57  ;;  %v4476_v0 = vadd.f32 %v4475_v59, %v4435_v60 }
 0x699   :  { %v4437_v1 = vpop.f32.mrf.mxu0  ;;  %v4478_v2 = vpop.f32.mrf.mxu1 }
 0x69a   :  { %5894 = vpow2.f32 %v5326_v63  ;;  %v5327_v3 = vmul.f32 -1.442695, %v4476_v0 }
 0x69c   :  { %5896 = vpow2.f32 %v5327_v3 }
 0x6a7   :  { %v5895_v6 = vpop.eup %5894 }
 0x6a8   :  { %v4670_v4 = vadd.f32 1.0, %v5895_v6 }
 0x6a9   :  { %v5897_v5 = vpop.eup %5896 }
 0x6aa   :  { %v4671_v47 = vadd.f32 1.0, %v5897_v5  ;;  %5898 = vrcp.f32 %v4670_v4 }
 0x6ac   :  { %5900 = vrcp.f32 %v4671_v47 }
 0x6b7   :  { %v5899_v8 = vpop.eup %5898 }
 0x6b9   :  { %v5901_v9 = vpop.eup %5900 }
 0x6ba   :  { %v5337_v10 = vpack.c.bf16 %v5901_v9, %v5899_v8 }
 0x6bc   :  { %4725 = vst [vmem:[%s6423_s14 + $0x8] sm:$0xff] %v5337_v10 }
 0x6d3   :  { %v4514_v15 = vpop.f32.mrf.mxu0 }
 0x6d4   :  { %v4515_v18 = vadd.f32 %v4514_v15, %v3015_v13  ;;  %v4555_v19 = vpop.f32.mrf.mxu1 }
 0x6d5   :  { %v4516_v20 = vpop.f32.mrf.mxu0 }
 0x6d6   :  { %v4556_v21 = vadd.f32 %v4555_v19, %v4515_v18  ;;  %v4517_v22 = vadd.f32 %v4516_v20, %v3019_v14  ;;  %v4557_v23 = vpop.f32.mrf.mxu1 }
 0x6d7   :  { %v4518_v24 = vpop.f32.mrf.mxu0 }
 0x6d8   :  { %v5328_v25 = vmul.f32 -1.442695, %v4556_v21  ;;  %v4558_v26 = vadd.f32 %v4557_v23, %v4517_v22  ;;  %v4559_v27 = vpop.f32.mrf.mxu1 }
 0x6d9   :  { %v4519_v28 = vpop.f32.mrf.mxu0 }
 0x6da   :  { %5902 = vpow2.f32 %v5328_v25  ;;  %v5329_v30 = vmul.f32 -1.442695, %v4558_v26  ;;  %v4560_v31 = vpop.f32.mrf.mxu1 }
 0x6dc   :  { %5904 = vpow2.f32 %v5329_v30 }
 0x6e7   :  { %v5903_v32 = vpop.eup %5902 }
 0x6e8   :  { %v4672_v33 = vadd.f32 1.0, %v5903_v32 }
 0x6e9   :  { %v5905_v34 = vpop.eup %5904 }
 0x6ea   :  { %v4673_v16 = vadd.f32 1.0, %v5905_v34  ;;  %5906 = vrcp.f32 %v4672_v33 }
 0x6ec   :  { %5908 = vrcp.f32 %v4673_v16 }
 0x6f7   :  { %v5907_v17 = vpop.eup %5906 }
 0x6f9   :  { %v5909_v7 = vpop.eup %5908 }
 0x6fa   :  { %v5338_v51 = vpack.c.bf16 %v5909_v7, %v5907_v17 }
 0x6fc   :  { %4726 = vst [vmem:[%s6423_s14 + $0x10] sm:$0xff] %v5338_v51 }
 0x713   :  { %v4596_v56 = vpop.f32.mrf.mxu0 }
 0x714   :  { %v4597_v36 = vadd.f32 %v4596_v56, %v3023_v39  ;;  %v4637_v42 = vpop.f32.mrf.mxu1 }
 0x715   :  { %v4598_v58 = vpop.f32.mrf.mxu0 }
 0x716   :  { %v4638_v44 = vadd.f32 %v4637_v42, %v4597_v36  ;;  %v4599_v37 = vadd.f32 %v4598_v58, %v3027_v40  ;;  %v4639_v41 = vpop.f32.mrf.mxu1 }
 0x717   :  { %v4600_v45 = vpop.f32.mrf.mxu0 }
 0x718   :  { %v5330_v46 = vmul.f32 -1.442695, %v4638_v44  ;;  %v4640_v48 = vadd.f32 %v4639_v41, %v4599_v37  ;;  %v4641_v43 = vpop.f32.mrf.mxu1 }
 0x719   :  { %v4601_v49 = vpop.f32.mrf.mxu0 }
 0x71a   :  { %5910 = vpow2.f32 %v5330_v46  ;;  %v5331_v50 = vmul.f32 -1.442695, %v4640_v48  ;;  %v4642_v52 = vpop.f32.mrf.mxu1 }
 0x71c   :  { %5912 = vpow2.f32 %v5331_v50 }
 0x727   :  { %v5911_v55 = vpop.eup %5910 }
 0x728   :  { %v4674_v53 = vadd.f32 1.0, %v5911_v55 }
 0x729   :  { %v5913_v54 = vpop.eup %5912 }
 0x72a   :  { %v4675_v29 = vadd.f32 1.0, %v5913_v54  ;;  %5914 = vrcp.f32 %v4674_v53 }
 0x72c   :  { %5916 = vrcp.f32 %v4675_v29 }
 0x737   :  { %v5915_v59 = vpop.eup %5914 }
 0x739   :  { %v5917_v57 = vpop.eup %5916 }
 0x73a   :  { %v5339_v60 = vpack.c.bf16 %v5917_v57, %v5915_v59 }
 0x73c   :  { %4727 = vst [vmem:[%s6423_s14 + $0x18] sm:$0xff] %v5339_v60 }
 0x73d   :  { %4739 = vsyncpa [#allocation3], 1 }
 0x73e   :  { %4740 = vsyncpa [#allocation5], 1 }

</bundles_post_ra>
